<compile_context>
chip_gen: v6e
topology: v6e:2x2x1
jax: 0.10.0
libtpu: 0.0.40
codegen_flags: <defaults>
</compile_context>

<pallas_src>
import functools

import jax
import jax.numpy as jnp
import numpy as np
from jax.experimental import pallas as pl
from jax.experimental.pallas import tpu as pltpu


def _hangman_kernel(H, T_pad, L,
                    x_ref, pg_ref,
                    wih_f_ref, whh_f_ref, bih_f_ref, bhn_f_ref,
                    wih_b_ref, whh_b_ref, bih_b_ref, bhn_b_ref,
                    wfc_f_ref, wfc_b_ref, wfc_g_ref, bfc_ref,
                    out_ref):
    x = x_ref[...]                                  # (L*T_pad, 27), time-major

    # Per-gate input projections for every (position, hangman-step) pair,
    # both directions.  One M = L*T_pad MXU matmul per gate; gate order [r,z,n].
    def proj(wih_ref, bih_ref):
        return [jnp.dot(x, wih_ref[g], preferred_element_type=jnp.float32)
                + bih_ref[g]
                for g in range(3)]                  # each (L*T_pad, H)

    gi_f = proj(wih_f_ref, bih_f_ref)
    gi_b = proj(wih_b_ref, bih_b_ref)

    # Hoist recurrent weights / biases out of the unrolled loop (load once).
    whh_f = [whh_f_ref[g] for g in range(3)]
    whh_b = [whh_b_ref[g] for g in range(3)]
    bhn_f = bhn_f_ref[...]
    bhn_b = bhn_b_ref[...]

    def cell(gi, h, whh, bhn):
        # gi = [gi_r, gi_z, gi_n], each (T_pad, H).  PyTorch GRU semantics:
        # r/z biases already folded into gi; b_hh_n stays inside the r*() term.
        gh_r = jnp.dot(h, whh[0], preferred_element_type=jnp.float32)
        gh_z = jnp.dot(h, whh[1], preferred_element_type=jnp.float32)
        gh_n = jnp.dot(h, whh[2], preferred_element_type=jnp.float32) + bhn
        r = jax.nn.sigmoid(gi[0] + gh_r)
        z = jax.nn.sigmoid(gi[1] + gh_z)
        n = jnp.tanh(gi[2] + r * gh_n)
        return (1.0 - z) * n + z * h

    h_f = jnp.zeros((T_pad, H), jnp.float32)
    h_b = jnp.zeros((T_pad, H), jnp.float32)
    # Fully unrolled L-step bidirectional recurrence; slice starts are static
    # multiples of T_pad (one sublane tile), so no unaligned/dynamic extracts.
    for t in range(L):
        fs = slice(t * T_pad, (t + 1) * T_pad)            # forward: position t
        bs = slice((L - 1 - t) * T_pad, (L - t) * T_pad)  # backward: L-1-t
        h_f = cell([g[fs] for g in gi_f], h_f, whh_f, bhn_f)
        h_b = cell([g[bs] for g in gi_b], h_b, whh_b, bhn_b)

    # fc(cat(h_f, h_b, prev_guess)) as a split matmul (no lane concatenate).
    out = (jnp.dot(h_f, wfc_f_ref[...], preferred_element_type=jnp.float32)
           + jnp.dot(h_b, wfc_b_ref[...], preferred_element_type=jnp.float32)
           + jnp.dot(pg_ref[...], wfc_g_ref[...],
                     preferred_element_type=jnp.float32)
           + bfc_ref[...])
    out_ref[...] = out


def hangman_gru_net_forward(obscure_word, prev_guess, params, hidden_dim):
    T, L, IN = obscure_word.shape
    H = hidden_dim
    T_pad = ((T + 7) // 8) * 8        # hangman steps rounded up to sublane tile

    (wih_f, whh_f, bih_f, bhn_f,
     wih_b, whh_b, bih_b, bhn_b,
     wfc_f, wfc_b, wfc_g, bfc) = params

    # Time-major layout, pad the T (GRU batch) dim, flatten so the kernel's
    # per-position slices are aligned (T_pad, H) slabs.  Padded rows are junk
    # and get dropped when slicing the output back to T.
    x = jnp.transpose(obscure_word, (1, 0, 2))                 # (L, T, IN)
    x = jnp.pad(x, ((0, 0), (0, T_pad - T), (0, 0)))           # (L, T_pad, IN)
    x = x.reshape(L * T_pad, IN)
    pg = jnp.pad(prev_guess, ((0, T_pad - T), (0, 0)))         # (T_pad, 26)

    def full(arr):
        n = arr.ndim
        return pl.BlockSpec(arr.shape, lambda i: (0,) * n)

    operands = (x, pg,
                wih_f, whh_f, bih_f, bhn_f,
                wih_b, whh_b, bih_b, bhn_b,
                wfc_f, wfc_b, wfc_g, bfc)

    grid_spec = pltpu.PrefetchScalarGridSpec(
        num_scalar_prefetch=0,
        grid=(1,),
        in_specs=[full(a) for a in operands],
        out_specs=pl.BlockSpec((T_pad, 26), lambda i: (0, 0)),
    )

    # TODO(synk): on v7x a 2-way "parallel" split of T across the two
    # TensorCores would give ~2x; skipped here to keep blocks full/aligned.
    kernel = functools.partial(_hangman_kernel, H, T_pad, L)
    out = pl.pallas_call(
        kernel,
        out_shape=jax.ShapeDtypeStruct((T_pad, 26), jnp.float32),
        grid_spec=grid_spec,
        compiler_params=pltpu.CompilerParams(
            dimension_semantics=("arbitrary",)),
    )(*operands)

    return out[:T][:, None, :]        # (T, 1, 26), matching torch.stack output


def init_params(key, hidden_dim, input_dim=27, target_dim=26):
    """Deterministic init mirroring the PyTorch parameter shapes."""
    H = hidden_dim
    k_gru = 1.0 / np.sqrt(H)
    k_fc = 1.0 / np.sqrt(2 * H + 26)
    keys = jax.random.split(key, 10)
    u = lambda k, shape, b: jax.random.uniform(k, shape, jnp.float32, -b, b)

    # nn.GRU(27, H, bidirectional=True) parameters, gate order [r, z, n].
    w_ih_f = u(keys[0], (3 * H, input_dim), k_gru)
    w_hh_f = u(keys[1], (3 * H, H), k_gru)
    b_ih_f = u(keys[2], (3 * H,), k_gru)
    b_hh_f = u(keys[3], (3 * H,), k_gru)
    w_ih_b = u(keys[4], (3 * H, input_dim), k_gru)
    w_hh_b = u(keys[5], (3 * H, H), k_gru)
    b_ih_b = u(keys[6], (3 * H,), k_gru)
    b_hh_b = u(keys[7], (3 * H,), k_gru)
    # nn.Linear(2H + 26, 26)
    w_fc = u(keys[8], (target_dim, 2 * H + 26), k_fc)
    b_fc = u(keys[9], (target_dim,), k_fc)

    def pack_dir(w_ih, w_hh, b_ih, b_hh):
        # Per-gate, pre-transposed weight stacks so the kernel never slices
        # gates off the lane axis.
        wih = jnp.stack([w_ih[g * H:(g + 1) * H].T for g in range(3)])  # (3,IN,H)
        whh = jnp.stack([w_hh[g * H:(g + 1) * H].T for g in range(3)])  # (3,H,H)
        # r/z biases fold b_ih + b_hh; n keeps b_hh_n separate (inside r*()).
        bih = jnp.stack([(b_ih[:H] + b_hh[:H])[None, :],
                         (b_ih[H:2 * H] + b_hh[H:2 * H])[None, :],
                         b_ih[2 * H:][None, :]])                        # (3,1,H)
        bhn = b_hh[2 * H:][None, :]                                     # (1,H)
        return wih, whh, bih, bhn

    wih_f, whh_f, bih_f, bhn_f = pack_dir(w_ih_f, w_hh_f, b_ih_f, b_hh_f)
    wih_b, whh_b, bih_b, bhn_b = pack_dir(w_ih_b, w_hh_b, b_ih_b, b_hh_b)

    w_fc_t = w_fc.T                                                     # (2H+26,26)
    params = (wih_f, whh_f, bih_f, bhn_f,
              wih_b, whh_b, bih_b, bhn_b,
              w_fc_t[:H], w_fc_t[H:2 * H], w_fc_t[2 * H:], b_fc[None, :])
    torch_like = (w_ih_f, w_hh_f, b_ih_f, b_hh_f,
                  w_ih_b, w_hh_b, b_ih_b, b_hh_b, w_fc, b_fc)
    return params, torch_like


def reference_forward(obscure_word, prev_guess, torch_like, hidden_dim):
    """Plain-JAX replica of the PyTorch forward (for correctness checking)."""
    (w_ih_f, w_hh_f, b_ih_f, b_hh_f,
     w_ih_b, w_hh_b, b_ih_b, b_hh_b, w_fc, b_fc) = torch_like
    H = hidden_dim
    T, L, _ = obscure_word.shape

    def run_dir(x, w_ih, w_hh, b_ih, b_hh, reverse):
        h = jnp.zeros((H,), jnp.float32)
        order = range(L - 1, -1, -1) if reverse else range(L)
        for t in order:
            gi = x[t] @ w_ih.T + b_ih
            gh = h @ w_hh.T + b_hh
            r = jax.nn.sigmoid(gi[:H] + gh[:H])
            z = jax.nn.sigmoid(gi[H:2 * H] + gh[H:2 * H])
            n = jnp.tanh(gi[2 * H:] + r * gh[2 * H:])
            h = (1.0 - z) * n + z * h
        return h

    outs = []
    for i in range(T):
        x = obscure_word[i]
        h_f = run_dir(x, w_ih_f, w_hh_f, b_ih_f, b_hh_f, reverse=False)
        h_b = run_dir(x, w_ih_b, w_hh_b, b_ih_b, b_hh_b, reverse=True)
        combined = jnp.concatenate([h_f, h_b, prev_guess[i]])
        outs.append((combined @ w_fc.T + b_fc)[None, :])
    return jnp.stack(outs)  # (T, 1, 26)


if __name__ == "__main__":
    T, L, IN, H = 6, 8, 27, 32

    key = jax.random.PRNGKey(0)
    k_p, k_x, k_g = jax.random.split(key, 3)
    params, torch_like = init_params(k_p, H, input_dim=IN)

    obscure_word = jax.random.normal(k_x, (T, L, IN), jnp.float32)
    prev_guess = jax.random.normal(k_g, (T, 26), jnp.float32)

    out = hangman_gru_net_forward(obscure_word, prev_guess, params, H)
    out = jax.block_until_ready(out)
    assert out.shape == (T, 1, 26), out.shape

    ref = reference_forward(obscure_word, prev_guess, torch_like, H)
    np.testing.assert_allclose(np.asarray(out), np.asarray(ref),
                               rtol=2e-2, atol=2e-2)

    print("KERNEL_OK")
</pallas_src>

<mosaic_0001>
module attributes {stable_mosaic.version = 11 : i64} {
  func.func @_hangman_kernel(%arg0: i32, %arg1: memref<64x27xf32, #tpu.memory_space<vmem>>, %arg2: memref<8x26xf32, #tpu.memory_space<vmem>>, %arg3: memref<3x27x32xf32, #tpu.memory_space<vmem>>, %arg4: memref<3x32x32xf32, #tpu.memory_space<vmem>>, %arg5: memref<3x1x32xf32, #tpu.memory_space<vmem>>, %arg6: memref<1x32xf32, #tpu.memory_space<vmem>>, %arg7: memref<3x27x32xf32, #tpu.memory_space<vmem>>, %arg8: memref<3x32x32xf32, #tpu.memory_space<vmem>>, %arg9: memref<3x1x32xf32, #tpu.memory_space<vmem>>, %arg10: memref<1x32xf32, #tpu.memory_space<vmem>>, %arg11: memref<32x26xf32, #tpu.memory_space<vmem>>, %arg12: memref<32x26xf32, #tpu.memory_space<vmem>>, %arg13: memref<26x26xf32, #tpu.memory_space<vmem>>, %arg14: memref<1x26xf32, #tpu.memory_space<vmem>>, %arg15: memref<8x26xf32, #tpu.memory_space<vmem>>) attributes {dimension_semantics = [#tpu.dimension_semantics<arbitrary>], iteration_bounds = array<i64: 1>, scalar_prefetch = 0 : i64, scratch_operands = 0 : i64, tpu.core_type = #tpu.core_type<tc>, window_params = [{pipeline_mode = #tpu.pipeline_mode<synchronous>, transform_indices = @transform_0, window_bounds = array<i64: 64, 27>}, {pipeline_mode = #tpu.pipeline_mode<synchronous>, transform_indices = @transform_1, window_bounds = array<i64: 8, 26>}, {pipeline_mode = #tpu.pipeline_mode<synchronous>, transform_indices = @transform_2, window_bounds = array<i64: 3, 27, 32>}, {pipeline_mode = #tpu.pipeline_mode<synchronous>, transform_indices = @transform_3, window_bounds = array<i64: 3, 32, 32>}, {pipeline_mode = #tpu.pipeline_mode<synchronous>, transform_indices = @transform_4, window_bounds = array<i64: 3, 1, 32>}, {pipeline_mode = #tpu.pipeline_mode<synchronous>, transform_indices = @transform_5, window_bounds = array<i64: 1, 32>}, {pipeline_mode = #tpu.pipeline_mode<synchronous>, transform_indices = @transform_6, window_bounds = array<i64: 3, 27, 32>}, {pipeline_mode = #tpu.pipeline_mode<synchronous>, transform_indices = @transform_7, window_bounds = array<i64: 3, 32, 32>}, {pipeline_mode = #tpu.pipeline_mode<synchronous>, transform_indices = @transform_8, window_bounds = array<i64: 3, 1, 32>}, {pipeline_mode = #tpu.pipeline_mode<synchronous>, transform_indices = @transform_9, window_bounds = array<i64: 1, 32>}, {pipeline_mode = #tpu.pipeline_mode<synchronous>, transform_indices = @transform_10, window_bounds = array<i64: 32, 26>}, {pipeline_mode = #tpu.pipeline_mode<synchronous>, transform_indices = @transform_11, window_bounds = array<i64: 32, 26>}, {pipeline_mode = #tpu.pipeline_mode<synchronous>, transform_indices = @transform_12, window_bounds = array<i64: 26, 26>}, {pipeline_mode = #tpu.pipeline_mode<synchronous>, transform_indices = @transform_13, window_bounds = array<i64: 1, 26>}, {pipeline_mode = #tpu.pipeline_mode<synchronous>, transform_indices = @transform_14, window_bounds = array<i64: 8, 26>}]} {
    %c0 = arith.constant 0 : index
    %c0_0 = arith.constant 0 : index
    %0 = vector.load %arg1[%c0, %c0_0] : memref<64x27xf32, #tpu.memory_space<vmem>>, vector<64x27xf32>
    %c0_1 = arith.constant 0 : index
    %c0_2 = arith.constant 0 : index
    %c0_3 = arith.constant 0 : index
    %1 = vector.load %arg3[%c0_1, %c0_2, %c0_3] : memref<3x27x32xf32, #tpu.memory_space<vmem>>, vector<1x27x32xf32>
    %2 = vector.shape_cast %1 : vector<1x27x32xf32> to vector<27x32xf32>
    %cst = arith.constant dense<0.000000e+00> : vector<64x32xf32>
    %3 = tpu.matmul %0, %2, %cst {dimension_numbers = #tpu.dot_dimension_numbers<[1], [0], [0], [1], [0, 0, 1, 1], [], []>} : vector<64x27xf32>, vector<27x32xf32>, vector<64x32xf32> -> vector<64x32xf32>
    %c0_4 = arith.constant 0 : index
    %c0_5 = arith.constant 0 : index
    %c0_6 = arith.constant 0 : index
    %4 = vector.load %arg5[%c0_4, %c0_5, %c0_6] : memref<3x1x32xf32, #tpu.memory_space<vmem>>, vector<1x1x32xf32>
    %5 = vector.shape_cast %4 : vector<1x1x32xf32> to vector<1x32xf32>
    %6 = vector.broadcast %5 : vector<1x32xf32> to vector<64x32xf32>
    %7 = arith.addf %3, %6 : vector<64x32xf32>
    %c1 = arith.constant 1 : index
    %c0_7 = arith.constant 0 : index
    %c0_8 = arith.constant 0 : index
    %8 = vector.load %arg3[%c1, %c0_7, %c0_8] : memref<3x27x32xf32, #tpu.memory_space<vmem>>, vector<1x27x32xf32>
    %9 = vector.shape_cast %8 : vector<1x27x32xf32> to vector<27x32xf32>
    %cst_9 = arith.constant dense<0.000000e+00> : vector<64x32xf32>
    %10 = tpu.matmul %0, %9, %cst_9 {dimension_numbers = #tpu.dot_dimension_numbers<[1], [0], [0], [1], [0, 0, 1, 1], [], []>} : vector<64x27xf32>, vector<27x32xf32>, vector<64x32xf32> -> vector<64x32xf32>
    %c1_10 = arith.constant 1 : index
    %c0_11 = arith.constant 0 : index
    %c0_12 = arith.constant 0 : index
    %11 = vector.load %arg5[%c1_10, %c0_11, %c0_12] : memref<3x1x32xf32, #tpu.memory_space<vmem>>, vector<1x1x32xf32>
    %12 = vector.shape_cast %11 : vector<1x1x32xf32> to vector<1x32xf32>
    %13 = vector.broadcast %12 : vector<1x32xf32> to vector<64x32xf32>
    %14 = arith.addf %10, %13 : vector<64x32xf32>
    %c2 = arith.constant 2 : index
    %c0_13 = arith.constant 0 : index
    %c0_14 = arith.constant 0 : index
    %15 = vector.load %arg3[%c2, %c0_13, %c0_14] : memref<3x27x32xf32, #tpu.memory_space<vmem>>, vector<1x27x32xf32>
    %16 = vector.shape_cast %15 : vector<1x27x32xf32> to vector<27x32xf32>
    %cst_15 = arith.constant dense<0.000000e+00> : vector<64x32xf32>
    %17 = tpu.matmul %0, %16, %cst_15 {dimension_numbers = #tpu.dot_dimension_numbers<[1], [0], [0], [1], [0, 0, 1, 1], [], []>} : vector<64x27xf32>, vector<27x32xf32>, vector<64x32xf32> -> vector<64x32xf32>
    %c2_16 = arith.constant 2 : index
    %c0_17 = arith.constant 0 : index
    %c0_18 = arith.constant 0 : index
    %18 = vector.load %arg5[%c2_16, %c0_17, %c0_18] : memref<3x1x32xf32, #tpu.memory_space<vmem>>, vector<1x1x32xf32>
    %19 = vector.shape_cast %18 : vector<1x1x32xf32> to vector<1x32xf32>
    %20 = vector.broadcast %19 : vector<1x32xf32> to vector<64x32xf32>
    %21 = arith.addf %17, %20 : vector<64x32xf32>
    %c0_19 = arith.constant 0 : index
    %c0_20 = arith.constant 0 : index
    %c0_21 = arith.constant 0 : index
    %22 = vector.load %arg7[%c0_19, %c0_20, %c0_21] : memref<3x27x32xf32, #tpu.memory_space<vmem>>, vector<1x27x32xf32>
    %23 = vector.shape_cast %22 : vector<1x27x32xf32> to vector<27x32xf32>
    %cst_22 = arith.constant dense<0.000000e+00> : vector<64x32xf32>
    %24 = tpu.matmul %0, %23, %cst_22 {dimension_numbers = #tpu.dot_dimension_numbers<[1], [0], [0], [1], [0, 0, 1, 1], [], []>} : vector<64x27xf32>, vector<27x32xf32>, vector<64x32xf32> -> vector<64x32xf32>
    %c0_23 = arith.constant 0 : index
    %c0_24 = arith.constant 0 : index
    %c0_25 = arith.constant 0 : index
    %25 = vector.load %arg9[%c0_23, %c0_24, %c0_25] : memref<3x1x32xf32, #tpu.memory_space<vmem>>, vector<1x1x32xf32>
    %26 = vector.shape_cast %25 : vector<1x1x32xf32> to vector<1x32xf32>
    %27 = vector.broadcast %26 : vector<1x32xf32> to vector<64x32xf32>
    %28 = arith.addf %24, %27 : vector<64x32xf32>
    %c1_26 = arith.constant 1 : index
    %c0_27 = arith.constant 0 : index
    %c0_28 = arith.constant 0 : index
    %29 = vector.load %arg7[%c1_26, %c0_27, %c0_28] : memref<3x27x32xf32, #tpu.memory_space<vmem>>, vector<1x27x32xf32>
    %30 = vector.shape_cast %29 : vector<1x27x32xf32> to vector<27x32xf32>
    %cst_29 = arith.constant dense<0.000000e+00> : vector<64x32xf32>
    %31 = tpu.matmul %0, %30, %cst_29 {dimension_numbers = #tpu.dot_dimension_numbers<[1], [0], [0], [1], [0, 0, 1, 1], [], []>} : vector<64x27xf32>, vector<27x32xf32>, vector<64x32xf32> -> vector<64x32xf32>
    %c1_30 = arith.constant 1 : index
    %c0_31 = arith.constant 0 : index
    %c0_32 = arith.constant 0 : index
    %32 = vector.load %arg9[%c1_30, %c0_31, %c0_32] : memref<3x1x32xf32, #tpu.memory_space<vmem>>, vector<1x1x32xf32>
    %33 = vector.shape_cast %32 : vector<1x1x32xf32> to vector<1x32xf32>
    %34 = vector.broadcast %33 : vector<1x32xf32> to vector<64x32xf32>
    %35 = arith.addf %31, %34 : vector<64x32xf32>
    %c2_33 = arith.constant 2 : index
    %c0_34 = arith.constant 0 : index
    %c0_35 = arith.constant 0 : index
    %36 = vector.load %arg7[%c2_33, %c0_34, %c0_35] : memref<3x27x32xf32, #tpu.memory_space<vmem>>, vector<1x27x32xf32>
    %37 = vector.shape_cast %36 : vector<1x27x32xf32> to vector<27x32xf32>
    %cst_36 = arith.constant dense<0.000000e+00> : vector<64x32xf32>
    %38 = tpu.matmul %0, %37, %cst_36 {dimension_numbers = #tpu.dot_dimension_numbers<[1], [0], [0], [1], [0, 0, 1, 1], [], []>} : vector<64x27xf32>, vector<27x32xf32>, vector<64x32xf32> -> vector<64x32xf32>
    %c2_37 = arith.constant 2 : index
    %c0_38 = arith.constant 0 : index
    %c0_39 = arith.constant 0 : index
    %39 = vector.load %arg9[%c2_37, %c0_38, %c0_39] : memref<3x1x32xf32, #tpu.memory_space<vmem>>, vector<1x1x32xf32>
    %40 = vector.shape_cast %39 : vector<1x1x32xf32> to vector<1x32xf32>
    %41 = vector.broadcast %40 : vector<1x32xf32> to vector<64x32xf32>
    %42 = arith.addf %38, %41 : vector<64x32xf32>
    %c0_40 = arith.constant 0 : index
    %c0_41 = arith.constant 0 : index
    %c0_42 = arith.constant 0 : index
    %43 = vector.load %arg4[%c0_40, %c0_41, %c0_42] : memref<3x32x32xf32, #tpu.memory_space<vmem>>, vector<1x32x32xf32>
    %44 = vector.shape_cast %43 : vector<1x32x32xf32> to vector<32x32xf32>
    %c1_43 = arith.constant 1 : index
    %c0_44 = arith.constant 0 : index
    %c0_45 = arith.constant 0 : index
    %45 = vector.load %arg4[%c1_43, %c0_44, %c0_45] : memref<3x32x32xf32, #tpu.memory_space<vmem>>, vector<1x32x32xf32>
    %46 = vector.shape_cast %45 : vector<1x32x32xf32> to vector<32x32xf32>
    %c2_46 = arith.constant 2 : index
    %c0_47 = arith.constant 0 : index
    %c0_48 = arith.constant 0 : index
    %47 = vector.load %arg4[%c2_46, %c0_47, %c0_48] : memref<3x32x32xf32, #tpu.memory_space<vmem>>, vector<1x32x32xf32>
    %48 = vector.shape_cast %47 : vector<1x32x32xf32> to vector<32x32xf32>
    %c0_49 = arith.constant 0 : index
    %c0_50 = arith.constant 0 : index
    %c0_51 = arith.constant 0 : index
    %49 = vector.load %arg8[%c0_49, %c0_50, %c0_51] : memref<3x32x32xf32, #tpu.memory_space<vmem>>, vector<1x32x32xf32>
    %50 = vector.shape_cast %49 : vector<1x32x32xf32> to vector<32x32xf32>
    %c1_52 = arith.constant 1 : index
    %c0_53 = arith.constant 0 : index
    %c0_54 = arith.constant 0 : index
    %51 = vector.load %arg8[%c1_52, %c0_53, %c0_54] : memref<3x32x32xf32, #tpu.memory_space<vmem>>, vector<1x32x32xf32>
    %52 = vector.shape_cast %51 : vector<1x32x32xf32> to vector<32x32xf32>
    %c2_55 = arith.constant 2 : index
    %c0_56 = arith.constant 0 : index
    %c0_57 = arith.constant 0 : index
    %53 = vector.load %arg8[%c2_55, %c0_56, %c0_57] : memref<3x32x32xf32, #tpu.memory_space<vmem>>, vector<1x32x32xf32>
    %54 = vector.shape_cast %53 : vector<1x32x32xf32> to vector<32x32xf32>
    %c0_58 = arith.constant 0 : index
    %c0_59 = arith.constant 0 : index
    %55 = vector.load %arg6[%c0_58, %c0_59] : memref<1x32xf32, #tpu.memory_space<vmem>>, vector<1x32xf32>
    %c0_60 = arith.constant 0 : index
    %c0_61 = arith.constant 0 : index
    %56 = vector.load %arg10[%c0_60, %c0_61] : memref<1x32xf32, #tpu.memory_space<vmem>>, vector<1x32xf32>
    %cst_62 = arith.constant 0.000000e+00 : f32
    %57 = vector.broadcast %cst_62 : f32 to vector<8x32xf32>
    %cst_63 = arith.constant 0.000000e+00 : f32
    %58 = vector.broadcast %cst_63 : f32 to vector<8x32xf32>
    %59 = vector.extract_strided_slice %7 {offsets = [0, 0], sizes = [8, 32], strides = [1, 1]} : vector<64x32xf32> to vector<8x32xf32>
    %60 = vector.extract_strided_slice %14 {offsets = [0, 0], sizes = [8, 32], strides = [1, 1]} : vector<64x32xf32> to vector<8x32xf32>
    %61 = vector.extract_strided_slice %21 {offsets = [0, 0], sizes = [8, 32], strides = [1, 1]} : vector<64x32xf32> to vector<8x32xf32>
    %cst_64 = arith.constant dense<0.000000e+00> : vector<8x32xf32>
    %62 = tpu.matmul %57, %44, %cst_64 {dimension_numbers = #tpu.dot_dimension_numbers<[1], [0], [0], [1], [0, 0, 1, 1], [], []>} : vector<8x32xf32>, vector<32x32xf32>, vector<8x32xf32> -> vector<8x32xf32>
    %cst_65 = arith.constant dense<0.000000e+00> : vector<8x32xf32>
    %63 = tpu.matmul %57, %46, %cst_65 {dimension_numbers = #tpu.dot_dimension_numbers<[1], [0], [0], [1], [0, 0, 1, 1], [], []>} : vector<8x32xf32>, vector<32x32xf32>, vector<8x32xf32> -> vector<8x32xf32>
    %cst_66 = arith.constant dense<0.000000e+00> : vector<8x32xf32>
    %64 = tpu.matmul %57, %48, %cst_66 {dimension_numbers = #tpu.dot_dimension_numbers<[1], [0], [0], [1], [0, 0, 1, 1], [], []>} : vector<8x32xf32>, vector<32x32xf32>, vector<8x32xf32> -> vector<8x32xf32>
    %65 = vector.broadcast %55 : vector<1x32xf32> to vector<8x32xf32>
    %66 = arith.addf %64, %65 : vector<8x32xf32>
    %67 = arith.addf %59, %62 : vector<8x32xf32>
    %68 = arith.negf %67 : vector<8x32xf32>
    %69 = math.exp %68 : vector<8x32xf32>
    %cst_67 = arith.constant 1.000000e+00 : f32
    %70 = vector.broadcast %cst_67 : f32 to vector<8x32xf32>
    %71 = arith.addf %70, %69 : vector<8x32xf32>
    %72 = arith.divf %70, %71 : vector<8x32xf32>
    %73 = arith.addf %60, %63 : vector<8x32xf32>
    %74 = arith.negf %73 : vector<8x32xf32>
    %75 = math.exp %74 : vector<8x32xf32>
    %cst_68 = arith.constant 1.000000e+00 : f32
    %76 = vector.broadcast %cst_68 : f32 to vector<8x32xf32>
    %77 = arith.addf %76, %75 : vector<8x32xf32>
    %78 = arith.divf %76, %77 : vector<8x32xf32>
    %79 = arith.mulf %72, %66 : vector<8x32xf32>
    %80 = arith.addf %61, %79 : vector<8x32xf32>
    %81 = math.tanh %80 : vector<8x32xf32>
    %cst_69 = arith.constant 1.000000e+00 : f32
    %82 = vector.broadcast %cst_69 : f32 to vector<8x32xf32>
    %83 = arith.subf %82, %78 : vector<8x32xf32>
    %84 = arith.mulf %83, %81 : vector<8x32xf32>
    %85 = arith.mulf %78, %57 : vector<8x32xf32>
    %86 = arith.addf %84, %85 : vector<8x32xf32>
    %87 = vector.extract_strided_slice %28 {offsets = [56, 0], sizes = [8, 32], strides = [1, 1]} : vector<64x32xf32> to vector<8x32xf32>
    %88 = vector.extract_strided_slice %35 {offsets = [56, 0], sizes = [8, 32], strides = [1, 1]} : vector<64x32xf32> to vector<8x32xf32>
    %89 = vector.extract_strided_slice %42 {offsets = [56, 0], sizes = [8, 32], strides = [1, 1]} : vector<64x32xf32> to vector<8x32xf32>
    %cst_70 = arith.constant dense<0.000000e+00> : vector<8x32xf32>
    %90 = tpu.matmul %58, %50, %cst_70 {dimension_numbers = #tpu.dot_dimension_numbers<[1], [0], [0], [1], [0, 0, 1, 1], [], []>} : vector<8x32xf32>, vector<32x32xf32>, vector<8x32xf32> -> vector<8x32xf32>
    %cst_71 = arith.constant dense<0.000000e+00> : vector<8x32xf32>
    %91 = tpu.matmul %58, %52, %cst_71 {dimension_numbers = #tpu.dot_dimension_numbers<[1], [0], [0], [1], [0, 0, 1, 1], [], []>} : vector<8x32xf32>, vector<32x32xf32>, vector<8x32xf32> -> vector<8x32xf32>
    %cst_72 = arith.constant dense<0.000000e+00> : vector<8x32xf32>
    %92 = tpu.matmul %58, %54, %cst_72 {dimension_numbers = #tpu.dot_dimension_numbers<[1], [0], [0], [1], [0, 0, 1, 1], [], []>} : vector<8x32xf32>, vector<32x32xf32>, vector<8x32xf32> -> vector<8x32xf32>
    %93 = vector.broadcast %56 : vector<1x32xf32> to vector<8x32xf32>
    %94 = arith.addf %92, %93 : vector<8x32xf32>
    %95 = arith.addf %87, %90 : vector<8x32xf32>
    %96 = arith.negf %95 : vector<8x32xf32>
    %97 = math.exp %96 : vector<8x32xf32>
    %cst_73 = arith.constant 1.000000e+00 : f32
    %98 = vector.broadcast %cst_73 : f32 to vector<8x32xf32>
    %99 = arith.addf %98, %97 : vector<8x32xf32>
    %100 = arith.divf %98, %99 : vector<8x32xf32>
    %101 = arith.addf %88, %91 : vector<8x32xf32>
    %102 = arith.negf %101 : vector<8x32xf32>
    %103 = math.exp %102 : vector<8x32xf32>
    %cst_74 = arith.constant 1.000000e+00 : f32
    %104 = vector.broadcast %cst_74 : f32 to vector<8x32xf32>
    %105 = arith.addf %104, %103 : vector<8x32xf32>
    %106 = arith.divf %104, %105 : vector<8x32xf32>
    %107 = arith.mulf %100, %94 : vector<8x32xf32>
    %108 = arith.addf %89, %107 : vector<8x32xf32>
    %109 = math.tanh %108 : vector<8x32xf32>
    %cst_75 = arith.constant 1.000000e+00 : f32
    %110 = vector.broadcast %cst_75 : f32 to vector<8x32xf32>
    %111 = arith.subf %110, %106 : vector<8x32xf32>
    %112 = arith.mulf %111, %109 : vector<8x32xf32>
    %113 = arith.mulf %106, %58 : vector<8x32xf32>
    %114 = arith.addf %112, %113 : vector<8x32xf32>
    %115 = vector.extract_strided_slice %7 {offsets = [8, 0], sizes = [8, 32], strides = [1, 1]} : vector<64x32xf32> to vector<8x32xf32>
    %116 = vector.extract_strided_slice %14 {offsets = [8, 0], sizes = [8, 32], strides = [1, 1]} : vector<64x32xf32> to vector<8x32xf32>
    %117 = vector.extract_strided_slice %21 {offsets = [8, 0], sizes = [8, 32], strides = [1, 1]} : vector<64x32xf32> to vector<8x32xf32>
    %cst_76 = arith.constant dense<0.000000e+00> : vector<8x32xf32>
    %118 = tpu.matmul %86, %44, %cst_76 {dimension_numbers = #tpu.dot_dimension_numbers<[1], [0], [0], [1], [0, 0, 1, 1], [], []>} : vector<8x32xf32>, vector<32x32xf32>, vector<8x32xf32> -> vector<8x32xf32>
    %cst_77 = arith.constant dense<0.000000e+00> : vector<8x32xf32>
    %119 = tpu.matmul %86, %46, %cst_77 {dimension_numbers = #tpu.dot_dimension_numbers<[1], [0], [0], [1], [0, 0, 1, 1], [], []>} : vector<8x32xf32>, vector<32x32xf32>, vector<8x32xf32> -> vector<8x32xf32>
    %cst_78 = arith.constant dense<0.000000e+00> : vector<8x32xf32>
    %120 = tpu.matmul %86, %48, %cst_78 {dimension_numbers = #tpu.dot_dimension_numbers<[1], [0], [0], [1], [0, 0, 1, 1], [], []>} : vector<8x32xf32>, vector<32x32xf32>, vector<8x32xf32> -> vector<8x32xf32>
    %121 = vector.broadcast %55 : vector<1x32xf32> to vector<8x32xf32>
    %122 = arith.addf %120, %121 : vector<8x32xf32>
    %123 = arith.addf %115, %118 : vector<8x32xf32>
    %124 = arith.negf %123 : vector<8x32xf32>
    %125 = math.exp %124 : vector<8x32xf32>
    %cst_79 = arith.constant 1.000000e+00 : f32
    %126 = vector.broadcast %cst_79 : f32 to vector<8x32xf32>
    %127 = arith.addf %126, %125 : vector<8x32xf32>
    %128 = arith.divf %126, %127 : vector<8x32xf32>
    %129 = arith.addf %116, %119 : vector<8x32xf32>
    %130 = arith.negf %129 : vector<8x32xf32>
    %131 = math.exp %130 : vector<8x32xf32>
    %cst_80 = arith.constant 1.000000e+00 : f32
    %132 = vector.broadcast %cst_80 : f32 to vector<8x32xf32>
    %133 = arith.addf %132, %131 : vector<8x32xf32>
    %134 = arith.divf %132, %133 : vector<8x32xf32>
    %135 = arith.mulf %128, %122 : vector<8x32xf32>
    %136 = arith.addf %117, %135 : vector<8x32xf32>
    %137 = math.tanh %136 : vector<8x32xf32>
    %cst_81 = arith.constant 1.000000e+00 : f32
    %138 = vector.broadcast %cst_81 : f32 to vector<8x32xf32>
    %139 = arith.subf %138, %134 : vector<8x32xf32>
    %140 = arith.mulf %139, %137 : vector<8x32xf32>
    %141 = arith.mulf %134, %86 : vector<8x32xf32>
    %142 = arith.addf %140, %141 : vector<8x32xf32>
    %143 = vector.extract_strided_slice %28 {offsets = [48, 0], sizes = [8, 32], strides = [1, 1]} : vector<64x32xf32> to vector<8x32xf32>
    %144 = vector.extract_strided_slice %35 {offsets = [48, 0], sizes = [8, 32], strides = [1, 1]} : vector<64x32xf32> to vector<8x32xf32>
    %145 = vector.extract_strided_slice %42 {offsets = [48, 0], sizes = [8, 32], strides = [1, 1]} : vector<64x32xf32> to vector<8x32xf32>
    %cst_82 = arith.constant dense<0.000000e+00> : vector<8x32xf32>
    %146 = tpu.matmul %114, %50, %cst_82 {dimension_numbers = #tpu.dot_dimension_numbers<[1], [0], [0], [1], [0, 0, 1, 1], [], []>} : vector<8x32xf32>, vector<32x32xf32>, vector<8x32xf32> -> vector<8x32xf32>
    %cst_83 = arith.constant dense<0.000000e+00> : vector<8x32xf32>
    %147 = tpu.matmul %114, %52, %cst_83 {dimension_numbers = #tpu.dot_dimension_numbers<[1], [0], [0], [1], [0, 0, 1, 1], [], []>} : vector<8x32xf32>, vector<32x32xf32>, vector<8x32xf32> -> vector<8x32xf32>
    %cst_84 = arith.constant dense<0.000000e+00> : vector<8x32xf32>
    %148 = tpu.matmul %114, %54, %cst_84 {dimension_numbers = #tpu.dot_dimension_numbers<[1], [0], [0], [1], [0, 0, 1, 1], [], []>} : vector<8x32xf32>, vector<32x32xf32>, vector<8x32xf32> -> vector<8x32xf32>
    %149 = vector.broadcast %56 : vector<1x32xf32> to vector<8x32xf32>
    %150 = arith.addf %148, %149 : vector<8x32xf32>
    %151 = arith.addf %143, %146 : vector<8x32xf32>
    %152 = arith.negf %151 : vector<8x32xf32>
    %153 = math.exp %152 : vector<8x32xf32>
    %cst_85 = arith.constant 1.000000e+00 : f32
    %154 = vector.broadcast %cst_85 : f32 to vector<8x32xf32>
    %155 = arith.addf %154, %153 : vector<8x32xf32>
    %156 = arith.divf %154, %155 : vector<8x32xf32>
    %157 = arith.addf %144, %147 : vector<8x32xf32>
    %158 = arith.negf %157 : vector<8x32xf32>
    %159 = math.exp %158 : vector<8x32xf32>
    %cst_86 = arith.constant 1.000000e+00 : f32
    %160 = vector.broadcast %cst_86 : f32 to vector<8x32xf32>
    %161 = arith.addf %160, %159 : vector<8x32xf32>
    %162 = arith.divf %160, %161 : vector<8x32xf32>
    %163 = arith.mulf %156, %150 : vector<8x32xf32>
    %164 = arith.addf %145, %163 : vector<8x32xf32>
    %165 = math.tanh %164 : vector<8x32xf32>
    %cst_87 = arith.constant 1.000000e+00 : f32
    %166 = vector.broadcast %cst_87 : f32 to vector<8x32xf32>
    %167 = arith.subf %166, %162 : vector<8x32xf32>
    %168 = arith.mulf %167, %165 : vector<8x32xf32>
    %169 = arith.mulf %162, %114 : vector<8x32xf32>
    %170 = arith.addf %168, %169 : vector<8x32xf32>
    %171 = vector.extract_strided_slice %7 {offsets = [16, 0], sizes = [8, 32], strides = [1, 1]} : vector<64x32xf32> to vector<8x32xf32>
    %172 = vector.extract_strided_slice %14 {offsets = [16, 0], sizes = [8, 32], strides = [1, 1]} : vector<64x32xf32> to vector<8x32xf32>
    %173 = vector.extract_strided_slice %21 {offsets = [16, 0], sizes = [8, 32], strides = [1, 1]} : vector<64x32xf32> to vector<8x32xf32>
    %cst_88 = arith.constant dense<0.000000e+00> : vector<8x32xf32>
    %174 = tpu.matmul %142, %44, %cst_88 {dimension_numbers = #tpu.dot_dimension_numbers<[1], [0], [0], [1], [0, 0, 1, 1], [], []>} : vector<8x32xf32>, vector<32x32xf32>, vector<8x32xf32> -> vector<8x32xf32>
    %cst_89 = arith.constant dense<0.000000e+00> : vector<8x32xf32>
    %175 = tpu.matmul %142, %46, %cst_89 {dimension_numbers = #tpu.dot_dimension_numbers<[1], [0], [0], [1], [0, 0, 1, 1], [], []>} : vector<8x32xf32>, vector<32x32xf32>, vector<8x32xf32> -> vector<8x32xf32>
    %cst_90 = arith.constant dense<0.000000e+00> : vector<8x32xf32>
    %176 = tpu.matmul %142, %48, %cst_90 {dimension_numbers = #tpu.dot_dimension_numbers<[1], [0], [0], [1], [0, 0, 1, 1], [], []>} : vector<8x32xf32>, vector<32x32xf32>, vector<8x32xf32> -> vector<8x32xf32>
    %177 = vector.broadcast %55 : vector<1x32xf32> to vector<8x32xf32>
    %178 = arith.addf %176, %177 : vector<8x32xf32>
    %179 = arith.addf %171, %174 : vector<8x32xf32>
    %180 = arith.negf %179 : vector<8x32xf32>
    %181 = math.exp %180 : vector<8x32xf32>
    %cst_91 = arith.constant 1.000000e+00 : f32
    %182 = vector.broadcast %cst_91 : f32 to vector<8x32xf32>
    %183 = arith.addf %182, %181 : vector<8x32xf32>
    %184 = arith.divf %182, %183 : vector<8x32xf32>
    %185 = arith.addf %172, %175 : vector<8x32xf32>
    %186 = arith.negf %185 : vector<8x32xf32>
    %187 = math.exp %186 : vector<8x32xf32>
    %cst_92 = arith.constant 1.000000e+00 : f32
    %188 = vector.broadcast %cst_92 : f32 to vector<8x32xf32>
    %189 = arith.addf %188, %187 : vector<8x32xf32>
    %190 = arith.divf %188, %189 : vector<8x32xf32>
    %191 = arith.mulf %184, %178 : vector<8x32xf32>
    %192 = arith.addf %173, %191 : vector<8x32xf32>
    %193 = math.tanh %192 : vector<8x32xf32>
    %cst_93 = arith.constant 1.000000e+00 : f32
    %194 = vector.broadcast %cst_93 : f32 to vector<8x32xf32>
    %195 = arith.subf %194, %190 : vector<8x32xf32>
    %196 = arith.mulf %195, %193 : vector<8x32xf32>
    %197 = arith.mulf %190, %142 : vector<8x32xf32>
    %198 = arith.addf %196, %197 : vector<8x32xf32>
    %199 = vector.extract_strided_slice %28 {offsets = [40, 0], sizes = [8, 32], strides = [1, 1]} : vector<64x32xf32> to vector<8x32xf32>
    %200 = vector.extract_strided_slice %35 {offsets = [40, 0], sizes = [8, 32], strides = [1, 1]} : vector<64x32xf32> to vector<8x32xf32>
    %201 = vector.extract_strided_slice %42 {offsets = [40, 0], sizes = [8, 32], strides = [1, 1]} : vector<64x32xf32> to vector<8x32xf32>
    %cst_94 = arith.constant dense<0.000000e+00> : vector<8x32xf32>
    %202 = tpu.matmul %170, %50, %cst_94 {dimension_numbers = #tpu.dot_dimension_numbers<[1], [0], [0], [1], [0, 0, 1, 1], [], []>} : vector<8x32xf32>, vector<32x32xf32>, vector<8x32xf32> -> vector<8x32xf32>
    %cst_95 = arith.constant dense<0.000000e+00> : vector<8x32xf32>
    %203 = tpu.matmul %170, %52, %cst_95 {dimension_numbers = #tpu.dot_dimension_numbers<[1], [0], [0], [1], [0, 0, 1, 1], [], []>} : vector<8x32xf32>, vector<32x32xf32>, vector<8x32xf32> -> vector<8x32xf32>
    %cst_96 = arith.constant dense<0.000000e+00> : vector<8x32xf32>
    %204 = tpu.matmul %170, %54, %cst_96 {dimension_numbers = #tpu.dot_dimension_numbers<[1], [0], [0], [1], [0, 0, 1, 1], [], []>} : vector<8x32xf32>, vector<32x32xf32>, vector<8x32xf32> -> vector<8x32xf32>
    %205 = vector.broadcast %56 : vector<1x32xf32> to vector<8x32xf32>
    %206 = arith.addf %204, %205 : vector<8x32xf32>
    %207 = arith.addf %199, %202 : vector<8x32xf32>
    %208 = arith.negf %207 : vector<8x32xf32>
    %209 = math.exp %208 : vector<8x32xf32>
    %cst_97 = arith.constant 1.000000e+00 : f32
    %210 = vector.broadcast %cst_97 : f32 to vector<8x32xf32>
    %211 = arith.addf %210, %209 : vector<8x32xf32>
    %212 = arith.divf %210, %211 : vector<8x32xf32>
    %213 = arith.addf %200, %203 : vector<8x32xf32>
    %214 = arith.negf %213 : vector<8x32xf32>
    %215 = math.exp %214 : vector<8x32xf32>
    %cst_98 = arith.constant 1.000000e+00 : f32
    %216 = vector.broadcast %cst_98 : f32 to vector<8x32xf32>
    %217 = arith.addf %216, %215 : vector<8x32xf32>
    %218 = arith.divf %216, %217 : vector<8x32xf32>
    %219 = arith.mulf %212, %206 : vector<8x32xf32>
    %220 = arith.addf %201, %219 : vector<8x32xf32>
    %221 = math.tanh %220 : vector<8x32xf32>
    %cst_99 = arith.constant 1.000000e+00 : f32
    %222 = vector.broadcast %cst_99 : f32 to vector<8x32xf32>
    %223 = arith.subf %222, %218 : vector<8x32xf32>
    %224 = arith.mulf %223, %221 : vector<8x32xf32>
    %225 = arith.mulf %218, %170 : vector<8x32xf32>
    %226 = arith.addf %224, %225 : vector<8x32xf32>
    %227 = vector.extract_strided_slice %7 {offsets = [24, 0], sizes = [8, 32], strides = [1, 1]} : vector<64x32xf32> to vector<8x32xf32>
    %228 = vector.extract_strided_slice %14 {offsets = [24, 0], sizes = [8, 32], strides = [1, 1]} : vector<64x32xf32> to vector<8x32xf32>
    %229 = vector.extract_strided_slice %21 {offsets = [24, 0], sizes = [8, 32], strides = [1, 1]} : vector<64x32xf32> to vector<8x32xf32>
    %cst_100 = arith.constant dense<0.000000e+00> : vector<8x32xf32>
    %230 = tpu.matmul %198, %44, %cst_100 {dimension_numbers = #tpu.dot_dimension_numbers<[1], [0], [0], [1], [0, 0, 1, 1], [], []>} : vector<8x32xf32>, vector<32x32xf32>, vector<8x32xf32> -> vector<8x32xf32>
    %cst_101 = arith.constant dense<0.000000e+00> : vector<8x32xf32>
    %231 = tpu.matmul %198, %46, %cst_101 {dimension_numbers = #tpu.dot_dimension_numbers<[1], [0], [0], [1], [0, 0, 1, 1], [], []>} : vector<8x32xf32>, vector<32x32xf32>, vector<8x32xf32> -> vector<8x32xf32>
    %cst_102 = arith.constant dense<0.000000e+00> : vector<8x32xf32>
    %232 = tpu.matmul %198, %48, %cst_102 {dimension_numbers = #tpu.dot_dimension_numbers<[1], [0], [0], [1], [0, 0, 1, 1], [], []>} : vector<8x32xf32>, vector<32x32xf32>, vector<8x32xf32> -> vector<8x32xf32>
    %233 = vector.broadcast %55 : vector<1x32xf32> to vector<8x32xf32>
    %234 = arith.addf %232, %233 : vector<8x32xf32>
    %235 = arith.addf %227, %230 : vector<8x32xf32>
    %236 = arith.negf %235 : vector<8x32xf32>
    %237 = math.exp %236 : vector<8x32xf32>
    %cst_103 = arith.constant 1.000000e+00 : f32
    %238 = vector.broadcast %cst_103 : f32 to vector<8x32xf32>
    %239 = arith.addf %238, %237 : vector<8x32xf32>
    %240 = arith.divf %238, %239 : vector<8x32xf32>
    %241 = arith.addf %228, %231 : vector<8x32xf32>
    %242 = arith.negf %241 : vector<8x32xf32>
    %243 = math.exp %242 : vector<8x32xf32>
    %cst_104 = arith.constant 1.000000e+00 : f32
    %244 = vector.broadcast %cst_104 : f32 to vector<8x32xf32>
    %245 = arith.addf %244, %243 : vector<8x32xf32>
    %246 = arith.divf %244, %245 : vector<8x32xf32>
    %247 = arith.mulf %240, %234 : vector<8x32xf32>
    %248 = arith.addf %229, %247 : vector<8x32xf32>
    %249 = math.tanh %248 : vector<8x32xf32>
    %cst_105 = arith.constant 1.000000e+00 : f32
    %250 = vector.broadcast %cst_105 : f32 to vector<8x32xf32>
    %251 = arith.subf %250, %246 : vector<8x32xf32>
    %252 = arith.mulf %251, %249 : vector<8x32xf32>
    %253 = arith.mulf %246, %198 : vector<8x32xf32>
    %254 = arith.addf %252, %253 : vector<8x32xf32>
    %255 = vector.extract_strided_slice %28 {offsets = [32, 0], sizes = [8, 32], strides = [1, 1]} : vector<64x32xf32> to vector<8x32xf32>
    %256 = vector.extract_strided_slice %35 {offsets = [32, 0], sizes = [8, 32], strides = [1, 1]} : vector<64x32xf32> to vector<8x32xf32>
    %257 = vector.extract_strided_slice %42 {offsets = [32, 0], sizes = [8, 32], strides = [1, 1]} : vector<64x32xf32> to vector<8x32xf32>
    %cst_106 = arith.constant dense<0.000000e+00> : vector<8x32xf32>
    %258 = tpu.matmul %226, %50, %cst_106 {dimension_numbers = #tpu.dot_dimension_numbers<[1], [0], [0], [1], [0, 0, 1, 1], [], []>} : vector<8x32xf32>, vector<32x32xf32>, vector<8x32xf32> -> vector<8x32xf32>
    %cst_107 = arith.constant dense<0.000000e+00> : vector<8x32xf32>
    %259 = tpu.matmul %226, %52, %cst_107 {dimension_numbers = #tpu.dot_dimension_numbers<[1], [0], [0], [1], [0, 0, 1, 1], [], []>} : vector<8x32xf32>, vector<32x32xf32>, vector<8x32xf32> -> vector<8x32xf32>
    %cst_108 = arith.constant dense<0.000000e+00> : vector<8x32xf32>
    %260 = tpu.matmul %226, %54, %cst_108 {dimension_numbers = #tpu.dot_dimension_numbers<[1], [0], [0], [1], [0, 0, 1, 1], [], []>} : vector<8x32xf32>, vector<32x32xf32>, vector<8x32xf32> -> vector<8x32xf32>
    %261 = vector.broadcast %56 : vector<1x32xf32> to vector<8x32xf32>
    %262 = arith.addf %260, %261 : vector<8x32xf32>
    %263 = arith.addf %255, %258 : vector<8x32xf32>
    %264 = arith.negf %263 : vector<8x32xf32>
    %265 = math.exp %264 : vector<8x32xf32>
    %cst_109 = arith.constant 1.000000e+00 : f32
    %266 = vector.broadcast %cst_109 : f32 to vector<8x32xf32>
    %267 = arith.addf %266, %265 : vector<8x32xf32>
    %268 = arith.divf %266, %267 : vector<8x32xf32>
    %269 = arith.addf %256, %259 : vector<8x32xf32>
    %270 = arith.negf %269 : vector<8x32xf32>
    %271 = math.exp %270 : vector<8x32xf32>
    %cst_110 = arith.constant 1.000000e+00 : f32
    %272 = vector.broadcast %cst_110 : f32 to vector<8x32xf32>
    %273 = arith.addf %272, %271 : vector<8x32xf32>
    %274 = arith.divf %272, %273 : vector<8x32xf32>
    %275 = arith.mulf %268, %262 : vector<8x32xf32>
    %276 = arith.addf %257, %275 : vector<8x32xf32>
    %277 = math.tanh %276 : vector<8x32xf32>
    %cst_111 = arith.constant 1.000000e+00 : f32
    %278 = vector.broadcast %cst_111 : f32 to vector<8x32xf32>
    %279 = arith.subf %278, %274 : vector<8x32xf32>
    %280 = arith.mulf %279, %277 : vector<8x32xf32>
    %281 = arith.mulf %274, %226 : vector<8x32xf32>
    %282 = arith.addf %280, %281 : vector<8x32xf32>
    %283 = vector.extract_strided_slice %7 {offsets = [32, 0], sizes = [8, 32], strides = [1, 1]} : vector<64x32xf32> to vector<8x32xf32>
    %284 = vector.extract_strided_slice %14 {offsets = [32, 0], sizes = [8, 32], strides = [1, 1]} : vector<64x32xf32> to vector<8x32xf32>
    %285 = vector.extract_strided_slice %21 {offsets = [32, 0], sizes = [8, 32], strides = [1, 1]} : vector<64x32xf32> to vector<8x32xf32>
    %cst_112 = arith.constant dense<0.000000e+00> : vector<8x32xf32>
    %286 = tpu.matmul %254, %44, %cst_112 {dimension_numbers = #tpu.dot_dimension_numbers<[1], [0], [0], [1], [0, 0, 1, 1], [], []>} : vector<8x32xf32>, vector<32x32xf32>, vector<8x32xf32> -> vector<8x32xf32>
    %cst_113 = arith.constant dense<0.000000e+00> : vector<8x32xf32>
    %287 = tpu.matmul %254, %46, %cst_113 {dimension_numbers = #tpu.dot_dimension_numbers<[1], [0], [0], [1], [0, 0, 1, 1], [], []>} : vector<8x32xf32>, vector<32x32xf32>, vector<8x32xf32> -> vector<8x32xf32>
    %cst_114 = arith.constant dense<0.000000e+00> : vector<8x32xf32>
    %288 = tpu.matmul %254, %48, %cst_114 {dimension_numbers = #tpu.dot_dimension_numbers<[1], [0], [0], [1], [0, 0, 1, 1], [], []>} : vector<8x32xf32>, vector<32x32xf32>, vector<8x32xf32> -> vector<8x32xf32>
    %289 = vector.broadcast %55 : vector<1x32xf32> to vector<8x32xf32>
    %290 = arith.addf %288, %289 : vector<8x32xf32>
    %291 = arith.addf %283, %286 : vector<8x32xf32>
    %292 = arith.negf %291 : vector<8x32xf32>
    %293 = math.exp %292 : vector<8x32xf32>
    %cst_115 = arith.constant 1.000000e+00 : f32
    %294 = vector.broadcast %cst_115 : f32 to vector<8x32xf32>
    %295 = arith.addf %294, %293 : vector<8x32xf32>
    %296 = arith.divf %294, %295 : vector<8x32xf32>
    %297 = arith.addf %284, %287 : vector<8x32xf32>
    %298 = arith.negf %297 : vector<8x32xf32>
    %299 = math.exp %298 : vector<8x32xf32>
    %cst_116 = arith.constant 1.000000e+00 : f32
    %300 = vector.broadcast %cst_116 : f32 to vector<8x32xf32>
    %301 = arith.addf %300, %299 : vector<8x32xf32>
    %302 = arith.divf %300, %301 : vector<8x32xf32>
    %303 = arith.mulf %296, %290 : vector<8x32xf32>
    %304 = arith.addf %285, %303 : vector<8x32xf32>
    %305 = math.tanh %304 : vector<8x32xf32>
    %cst_117 = arith.constant 1.000000e+00 : f32
    %306 = vector.broadcast %cst_117 : f32 to vector<8x32xf32>
    %307 = arith.subf %306, %302 : vector<8x32xf32>
    %308 = arith.mulf %307, %305 : vector<8x32xf32>
    %309 = arith.mulf %302, %254 : vector<8x32xf32>
    %310 = arith.addf %308, %309 : vector<8x32xf32>
    %311 = vector.extract_strided_slice %28 {offsets = [24, 0], sizes = [8, 32], strides = [1, 1]} : vector<64x32xf32> to vector<8x32xf32>
    %312 = vector.extract_strided_slice %35 {offsets = [24, 0], sizes = [8, 32], strides = [1, 1]} : vector<64x32xf32> to vector<8x32xf32>
    %313 = vector.extract_strided_slice %42 {offsets = [24, 0], sizes = [8, 32], strides = [1, 1]} : vector<64x32xf32> to vector<8x32xf32>
    %cst_118 = arith.constant dense<0.000000e+00> : vector<8x32xf32>
    %314 = tpu.matmul %282, %50, %cst_118 {dimension_numbers = #tpu.dot_dimension_numbers<[1], [0], [0], [1], [0, 0, 1, 1], [], []>} : vector<8x32xf32>, vector<32x32xf32>, vector<8x32xf32> -> vector<8x32xf32>
    %cst_119 = arith.constant dense<0.000000e+00> : vector<8x32xf32>
    %315 = tpu.matmul %282, %52, %cst_119 {dimension_numbers = #tpu.dot_dimension_numbers<[1], [0], [0], [1], [0, 0, 1, 1], [], []>} : vector<8x32xf32>, vector<32x32xf32>, vector<8x32xf32> -> vector<8x32xf32>
    %cst_120 = arith.constant dense<0.000000e+00> : vector<8x32xf32>
    %316 = tpu.matmul %282, %54, %cst_120 {dimension_numbers = #tpu.dot_dimension_numbers<[1], [0], [0], [1], [0, 0, 1, 1], [], []>} : vector<8x32xf32>, vector<32x32xf32>, vector<8x32xf32> -> vector<8x32xf32>
    %317 = vector.broadcast %56 : vector<1x32xf32> to vector<8x32xf32>
    %318 = arith.addf %316, %317 : vector<8x32xf32>
    %319 = arith.addf %311, %314 : vector<8x32xf32>
    %320 = arith.negf %319 : vector<8x32xf32>
    %321 = math.exp %320 : vector<8x32xf32>
    %cst_121 = arith.constant 1.000000e+00 : f32
    %322 = vector.broadcast %cst_121 : f32 to vector<8x32xf32>
    %323 = arith.addf %322, %321 : vector<8x32xf32>
    %324 = arith.divf %322, %323 : vector<8x32xf32>
    %325 = arith.addf %312, %315 : vector<8x32xf32>
    %326 = arith.negf %325 : vector<8x32xf32>
    %327 = math.exp %326 : vector<8x32xf32>
    %cst_122 = arith.constant 1.000000e+00 : f32
    %328 = vector.broadcast %cst_122 : f32 to vector<8x32xf32>
    %329 = arith.addf %328, %327 : vector<8x32xf32>
    %330 = arith.divf %328, %329 : vector<8x32xf32>
    %331 = arith.mulf %324, %318 : vector<8x32xf32>
    %332 = arith.addf %313, %331 : vector<8x32xf32>
    %333 = math.tanh %332 : vector<8x32xf32>
    %cst_123 = arith.constant 1.000000e+00 : f32
    %334 = vector.broadcast %cst_123 : f32 to vector<8x32xf32>
    %335 = arith.subf %334, %330 : vector<8x32xf32>
    %336 = arith.mulf %335, %333 : vector<8x32xf32>
    %337 = arith.mulf %330, %282 : vector<8x32xf32>
    %338 = arith.addf %336, %337 : vector<8x32xf32>
    %339 = vector.extract_strided_slice %7 {offsets = [40, 0], sizes = [8, 32], strides = [1, 1]} : vector<64x32xf32> to vector<8x32xf32>
    %340 = vector.extract_strided_slice %14 {offsets = [40, 0], sizes = [8, 32], strides = [1, 1]} : vector<64x32xf32> to vector<8x32xf32>
    %341 = vector.extract_strided_slice %21 {offsets = [40, 0], sizes = [8, 32], strides = [1, 1]} : vector<64x32xf32> to vector<8x32xf32>
    %cst_124 = arith.constant dense<0.000000e+00> : vector<8x32xf32>
    %342 = tpu.matmul %310, %44, %cst_124 {dimension_numbers = #tpu.dot_dimension_numbers<[1], [0], [0], [1], [0, 0, 1, 1], [], []>} : vector<8x32xf32>, vector<32x32xf32>, vector<8x32xf32> -> vector<8x32xf32>
    %cst_125 = arith.constant dense<0.000000e+00> : vector<8x32xf32>
    %343 = tpu.matmul %310, %46, %cst_125 {dimension_numbers = #tpu.dot_dimension_numbers<[1], [0], [0], [1], [0, 0, 1, 1], [], []>} : vector<8x32xf32>, vector<32x32xf32>, vector<8x32xf32> -> vector<8x32xf32>
    %cst_126 = arith.constant dense<0.000000e+00> : vector<8x32xf32>
    %344 = tpu.matmul %310, %48, %cst_126 {dimension_numbers = #tpu.dot_dimension_numbers<[1], [0], [0], [1], [0, 0, 1, 1], [], []>} : vector<8x32xf32>, vector<32x32xf32>, vector<8x32xf32> -> vector<8x32xf32>
    %345 = vector.broadcast %55 : vector<1x32xf32> to vector<8x32xf32>
    %346 = arith.addf %344, %345 : vector<8x32xf32>
    %347 = arith.addf %339, %342 : vector<8x32xf32>
    %348 = arith.negf %347 : vector<8x32xf32>
    %349 = math.exp %348 : vector<8x32xf32>
    %cst_127 = arith.constant 1.000000e+00 : f32
    %350 = vector.broadcast %cst_127 : f32 to vector<8x32xf32>
    %351 = arith.addf %350, %349 : vector<8x32xf32>
    %352 = arith.divf %350, %351 : vector<8x32xf32>
    %353 = arith.addf %340, %343 : vector<8x32xf32>
    %354 = arith.negf %353 : vector<8x32xf32>
    %355 = math.exp %354 : vector<8x32xf32>
    %cst_128 = arith.constant 1.000000e+00 : f32
    %356 = vector.broadcast %cst_128 : f32 to vector<8x32xf32>
    %357 = arith.addf %356, %355 : vector<8x32xf32>
    %358 = arith.divf %356, %357 : vector<8x32xf32>
    %359 = arith.mulf %352, %346 : vector<8x32xf32>
    %360 = arith.addf %341, %359 : vector<8x32xf32>
    %361 = math.tanh %360 : vector<8x32xf32>
    %cst_129 = arith.constant 1.000000e+00 : f32
    %362 = vector.broadcast %cst_129 : f32 to vector<8x32xf32>
    %363 = arith.subf %362, %358 : vector<8x32xf32>
    %364 = arith.mulf %363, %361 : vector<8x32xf32>
    %365 = arith.mulf %358, %310 : vector<8x32xf32>
    %366 = arith.addf %364, %365 : vector<8x32xf32>
    %367 = vector.extract_strided_slice %28 {offsets = [16, 0], sizes = [8, 32], strides = [1, 1]} : vector<64x32xf32> to vector<8x32xf32>
    %368 = vector.extract_strided_slice %35 {offsets = [16, 0], sizes = [8, 32], strides = [1, 1]} : vector<64x32xf32> to vector<8x32xf32>
    %369 = vector.extract_strided_slice %42 {offsets = [16, 0], sizes = [8, 32], strides = [1, 1]} : vector<64x32xf32> to vector<8x32xf32>
    %cst_130 = arith.constant dense<0.000000e+00> : vector<8x32xf32>
    %370 = tpu.matmul %338, %50, %cst_130 {dimension_numbers = #tpu.dot_dimension_numbers<[1], [0], [0], [1], [0, 0, 1, 1], [], []>} : vector<8x32xf32>, vector<32x32xf32>, vector<8x32xf32> -> vector<8x32xf32>
    %cst_131 = arith.constant dense<0.000000e+00> : vector<8x32xf32>
    %371 = tpu.matmul %338, %52, %cst_131 {dimension_numbers = #tpu.dot_dimension_numbers<[1], [0], [0], [1], [0, 0, 1, 1], [], []>} : vector<8x32xf32>, vector<32x32xf32>, vector<8x32xf32> -> vector<8x32xf32>
    %cst_132 = arith.constant dense<0.000000e+00> : vector<8x32xf32>
    %372 = tpu.matmul %338, %54, %cst_132 {dimension_numbers = #tpu.dot_dimension_numbers<[1], [0], [0], [1], [0, 0, 1, 1], [], []>} : vector<8x32xf32>, vector<32x32xf32>, vector<8x32xf32> -> vector<8x32xf32>
    %373 = vector.broadcast %56 : vector<1x32xf32> to vector<8x32xf32>
    %374 = arith.addf %372, %373 : vector<8x32xf32>
    %375 = arith.addf %367, %370 : vector<8x32xf32>
    %376 = arith.negf %375 : vector<8x32xf32>
    %377 = math.exp %376 : vector<8x32xf32>
    %cst_133 = arith.constant 1.000000e+00 : f32
    %378 = vector.broadcast %cst_133 : f32 to vector<8x32xf32>
    %379 = arith.addf %378, %377 : vector<8x32xf32>
    %380 = arith.divf %378, %379 : vector<8x32xf32>
    %381 = arith.addf %368, %371 : vector<8x32xf32>
    %382 = arith.negf %381 : vector<8x32xf32>
    %383 = math.exp %382 : vector<8x32xf32>
    %cst_134 = arith.constant 1.000000e+00 : f32
    %384 = vector.broadcast %cst_134 : f32 to vector<8x32xf32>
    %385 = arith.addf %384, %383 : vector<8x32xf32>
    %386 = arith.divf %384, %385 : vector<8x32xf32>
    %387 = arith.mulf %380, %374 : vector<8x32xf32>
    %388 = arith.addf %369, %387 : vector<8x32xf32>
    %389 = math.tanh %388 : vector<8x32xf32>
    %cst_135 = arith.constant 1.000000e+00 : f32
    %390 = vector.broadcast %cst_135 : f32 to vector<8x32xf32>
    %391 = arith.subf %390, %386 : vector<8x32xf32>
    %392 = arith.mulf %391, %389 : vector<8x32xf32>
    %393 = arith.mulf %386, %338 : vector<8x32xf32>
    %394 = arith.addf %392, %393 : vector<8x32xf32>
    %395 = vector.extract_strided_slice %7 {offsets = [48, 0], sizes = [8, 32], strides = [1, 1]} : vector<64x32xf32> to vector<8x32xf32>
    %396 = vector.extract_strided_slice %14 {offsets = [48, 0], sizes = [8, 32], strides = [1, 1]} : vector<64x32xf32> to vector<8x32xf32>
    %397 = vector.extract_strided_slice %21 {offsets = [48, 0], sizes = [8, 32], strides = [1, 1]} : vector<64x32xf32> to vector<8x32xf32>
    %cst_136 = arith.constant dense<0.000000e+00> : vector<8x32xf32>
    %398 = tpu.matmul %366, %44, %cst_136 {dimension_numbers = #tpu.dot_dimension_numbers<[1], [0], [0], [1], [0, 0, 1, 1], [], []>} : vector<8x32xf32>, vector<32x32xf32>, vector<8x32xf32> -> vector<8x32xf32>
    %cst_137 = arith.constant dense<0.000000e+00> : vector<8x32xf32>
    %399 = tpu.matmul %366, %46, %cst_137 {dimension_numbers = #tpu.dot_dimension_numbers<[1], [0], [0], [1], [0, 0, 1, 1], [], []>} : vector<8x32xf32>, vector<32x32xf32>, vector<8x32xf32> -> vector<8x32xf32>
    %cst_138 = arith.constant dense<0.000000e+00> : vector<8x32xf32>
    %400 = tpu.matmul %366, %48, %cst_138 {dimension_numbers = #tpu.dot_dimension_numbers<[1], [0], [0], [1], [0, 0, 1, 1], [], []>} : vector<8x32xf32>, vector<32x32xf32>, vector<8x32xf32> -> vector<8x32xf32>
    %401 = vector.broadcast %55 : vector<1x32xf32> to vector<8x32xf32>
    %402 = arith.addf %400, %401 : vector<8x32xf32>
    %403 = arith.addf %395, %398 : vector<8x32xf32>
    %404 = arith.negf %403 : vector<8x32xf32>
    %405 = math.exp %404 : vector<8x32xf32>
    %cst_139 = arith.constant 1.000000e+00 : f32
    %406 = vector.broadcast %cst_139 : f32 to vector<8x32xf32>
    %407 = arith.addf %406, %405 : vector<8x32xf32>
    %408 = arith.divf %406, %407 : vector<8x32xf32>
    %409 = arith.addf %396, %399 : vector<8x32xf32>
    %410 = arith.negf %409 : vector<8x32xf32>
    %411 = math.exp %410 : vector<8x32xf32>
    %cst_140 = arith.constant 1.000000e+00 : f32
    %412 = vector.broadcast %cst_140 : f32 to vector<8x32xf32>
    %413 = arith.addf %412, %411 : vector<8x32xf32>
    %414 = arith.divf %412, %413 : vector<8x32xf32>
    %415 = arith.mulf %408, %402 : vector<8x32xf32>
    %416 = arith.addf %397, %415 : vector<8x32xf32>
    %417 = math.tanh %416 : vector<8x32xf32>
    %cst_141 = arith.constant 1.000000e+00 : f32
    %418 = vector.broadcast %cst_141 : f32 to vector<8x32xf32>
    %419 = arith.subf %418, %414 : vector<8x32xf32>
    %420 = arith.mulf %419, %417 : vector<8x32xf32>
    %421 = arith.mulf %414, %366 : vector<8x32xf32>
    %422 = arith.addf %420, %421 : vector<8x32xf32>
    %423 = vector.extract_strided_slice %28 {offsets = [8, 0], sizes = [8, 32], strides = [1, 1]} : vector<64x32xf32> to vector<8x32xf32>
    %424 = vector.extract_strided_slice %35 {offsets = [8, 0], sizes = [8, 32], strides = [1, 1]} : vector<64x32xf32> to vector<8x32xf32>
    %425 = vector.extract_strided_slice %42 {offsets = [8, 0], sizes = [8, 32], strides = [1, 1]} : vector<64x32xf32> to vector<8x32xf32>
    %cst_142 = arith.constant dense<0.000000e+00> : vector<8x32xf32>
    %426 = tpu.matmul %394, %50, %cst_142 {dimension_numbers = #tpu.dot_dimension_numbers<[1], [0], [0], [1], [0, 0, 1, 1], [], []>} : vector<8x32xf32>, vector<32x32xf32>, vector<8x32xf32> -> vector<8x32xf32>
    %cst_143 = arith.constant dense<0.000000e+00> : vector<8x32xf32>
    %427 = tpu.matmul %394, %52, %cst_143 {dimension_numbers = #tpu.dot_dimension_numbers<[1], [0], [0], [1], [0, 0, 1, 1], [], []>} : vector<8x32xf32>, vector<32x32xf32>, vector<8x32xf32> -> vector<8x32xf32>
    %cst_144 = arith.constant dense<0.000000e+00> : vector<8x32xf32>
    %428 = tpu.matmul %394, %54, %cst_144 {dimension_numbers = #tpu.dot_dimension_numbers<[1], [0], [0], [1], [0, 0, 1, 1], [], []>} : vector<8x32xf32>, vector<32x32xf32>, vector<8x32xf32> -> vector<8x32xf32>
    %429 = vector.broadcast %56 : vector<1x32xf32> to vector<8x32xf32>
    %430 = arith.addf %428, %429 : vector<8x32xf32>
    %431 = arith.addf %423, %426 : vector<8x32xf32>
    %432 = arith.negf %431 : vector<8x32xf32>
    %433 = math.exp %432 : vector<8x32xf32>
    %cst_145 = arith.constant 1.000000e+00 : f32
    %434 = vector.broadcast %cst_145 : f32 to vector<8x32xf32>
    %435 = arith.addf %434, %433 : vector<8x32xf32>
    %436 = arith.divf %434, %435 : vector<8x32xf32>
    %437 = arith.addf %424, %427 : vector<8x32xf32>
    %438 = arith.negf %437 : vector<8x32xf32>
    %439 = math.exp %438 : vector<8x32xf32>
    %cst_146 = arith.constant 1.000000e+00 : f32
    %440 = vector.broadcast %cst_146 : f32 to vector<8x32xf32>
    %441 = arith.addf %440, %439 : vector<8x32xf32>
    %442 = arith.divf %440, %441 : vector<8x32xf32>
    %443 = arith.mulf %436, %430 : vector<8x32xf32>
    %444 = arith.addf %425, %443 : vector<8x32xf32>
    %445 = math.tanh %444 : vector<8x32xf32>
    %cst_147 = arith.constant 1.000000e+00 : f32
    %446 = vector.broadcast %cst_147 : f32 to vector<8x32xf32>
    %447 = arith.subf %446, %442 : vector<8x32xf32>
    %448 = arith.mulf %447, %445 : vector<8x32xf32>
    %449 = arith.mulf %442, %394 : vector<8x32xf32>
    %450 = arith.addf %448, %449 : vector<8x32xf32>
    %451 = vector.extract_strided_slice %7 {offsets = [56, 0], sizes = [8, 32], strides = [1, 1]} : vector<64x32xf32> to vector<8x32xf32>
    %452 = vector.extract_strided_slice %14 {offsets = [56, 0], sizes = [8, 32], strides = [1, 1]} : vector<64x32xf32> to vector<8x32xf32>
    %453 = vector.extract_strided_slice %21 {offsets = [56, 0], sizes = [8, 32], strides = [1, 1]} : vector<64x32xf32> to vector<8x32xf32>
    %cst_148 = arith.constant dense<0.000000e+00> : vector<8x32xf32>
    %454 = tpu.matmul %422, %44, %cst_148 {dimension_numbers = #tpu.dot_dimension_numbers<[1], [0], [0], [1], [0, 0, 1, 1], [], []>} : vector<8x32xf32>, vector<32x32xf32>, vector<8x32xf32> -> vector<8x32xf32>
    %cst_149 = arith.constant dense<0.000000e+00> : vector<8x32xf32>
    %455 = tpu.matmul %422, %46, %cst_149 {dimension_numbers = #tpu.dot_dimension_numbers<[1], [0], [0], [1], [0, 0, 1, 1], [], []>} : vector<8x32xf32>, vector<32x32xf32>, vector<8x32xf32> -> vector<8x32xf32>
    %cst_150 = arith.constant dense<0.000000e+00> : vector<8x32xf32>
    %456 = tpu.matmul %422, %48, %cst_150 {dimension_numbers = #tpu.dot_dimension_numbers<[1], [0], [0], [1], [0, 0, 1, 1], [], []>} : vector<8x32xf32>, vector<32x32xf32>, vector<8x32xf32> -> vector<8x32xf32>
    %457 = vector.broadcast %55 : vector<1x32xf32> to vector<8x32xf32>
    %458 = arith.addf %456, %457 : vector<8x32xf32>
    %459 = arith.addf %451, %454 : vector<8x32xf32>
    %460 = arith.negf %459 : vector<8x32xf32>
    %461 = math.exp %460 : vector<8x32xf32>
    %cst_151 = arith.constant 1.000000e+00 : f32
    %462 = vector.broadcast %cst_151 : f32 to vector<8x32xf32>
    %463 = arith.addf %462, %461 : vector<8x32xf32>
    %464 = arith.divf %462, %463 : vector<8x32xf32>
    %465 = arith.addf %452, %455 : vector<8x32xf32>
    %466 = arith.negf %465 : vector<8x32xf32>
    %467 = math.exp %466 : vector<8x32xf32>
    %cst_152 = arith.constant 1.000000e+00 : f32
    %468 = vector.broadcast %cst_152 : f32 to vector<8x32xf32>
    %469 = arith.addf %468, %467 : vector<8x32xf32>
    %470 = arith.divf %468, %469 : vector<8x32xf32>
    %471 = arith.mulf %464, %458 : vector<8x32xf32>
    %472 = arith.addf %453, %471 : vector<8x32xf32>
    %473 = math.tanh %472 : vector<8x32xf32>
    %cst_153 = arith.constant 1.000000e+00 : f32
    %474 = vector.broadcast %cst_153 : f32 to vector<8x32xf32>
    %475 = arith.subf %474, %470 : vector<8x32xf32>
    %476 = arith.mulf %475, %473 : vector<8x32xf32>
    %477 = arith.mulf %470, %422 : vector<8x32xf32>
    %478 = arith.addf %476, %477 : vector<8x32xf32>
    %479 = vector.extract_strided_slice %28 {offsets = [0, 0], sizes = [8, 32], strides = [1, 1]} : vector<64x32xf32> to vector<8x32xf32>
    %480 = vector.extract_strided_slice %35 {offsets = [0, 0], sizes = [8, 32], strides = [1, 1]} : vector<64x32xf32> to vector<8x32xf32>
    %481 = vector.extract_strided_slice %42 {offsets = [0, 0], sizes = [8, 32], strides = [1, 1]} : vector<64x32xf32> to vector<8x32xf32>
    %cst_154 = arith.constant dense<0.000000e+00> : vector<8x32xf32>
    %482 = tpu.matmul %450, %50, %cst_154 {dimension_numbers = #tpu.dot_dimension_numbers<[1], [0], [0], [1], [0, 0, 1, 1], [], []>} : vector<8x32xf32>, vector<32x32xf32>, vector<8x32xf32> -> vector<8x32xf32>
    %cst_155 = arith.constant dense<0.000000e+00> : vector<8x32xf32>
    %483 = tpu.matmul %450, %52, %cst_155 {dimension_numbers = #tpu.dot_dimension_numbers<[1], [0], [0], [1], [0, 0, 1, 1], [], []>} : vector<8x32xf32>, vector<32x32xf32>, vector<8x32xf32> -> vector<8x32xf32>
    %cst_156 = arith.constant dense<0.000000e+00> : vector<8x32xf32>
    %484 = tpu.matmul %450, %54, %cst_156 {dimension_numbers = #tpu.dot_dimension_numbers<[1], [0], [0], [1], [0, 0, 1, 1], [], []>} : vector<8x32xf32>, vector<32x32xf32>, vector<8x32xf32> -> vector<8x32xf32>
    %485 = vector.broadcast %56 : vector<1x32xf32> to vector<8x32xf32>
    %486 = arith.addf %484, %485 : vector<8x32xf32>
    %487 = arith.addf %479, %482 : vector<8x32xf32>
    %488 = arith.negf %487 : vector<8x32xf32>
    %489 = math.exp %488 : vector<8x32xf32>
    %cst_157 = arith.constant 1.000000e+00 : f32
    %490 = vector.broadcast %cst_157 : f32 to vector<8x32xf32>
    %491 = arith.addf %490, %489 : vector<8x32xf32>
    %492 = arith.divf %490, %491 : vector<8x32xf32>
    %493 = arith.addf %480, %483 : vector<8x32xf32>
    %494 = arith.negf %493 : vector<8x32xf32>
    %495 = math.exp %494 : vector<8x32xf32>
    %cst_158 = arith.constant 1.000000e+00 : f32
    %496 = vector.broadcast %cst_158 : f32 to vector<8x32xf32>
    %497 = arith.addf %496, %495 : vector<8x32xf32>
    %498 = arith.divf %496, %497 : vector<8x32xf32>
    %499 = arith.mulf %492, %486 : vector<8x32xf32>
    %500 = arith.addf %481, %499 : vector<8x32xf32>
    %501 = math.tanh %500 : vector<8x32xf32>
    %cst_159 = arith.constant 1.000000e+00 : f32
    %502 = vector.broadcast %cst_159 : f32 to vector<8x32xf32>
    %503 = arith.subf %502, %498 : vector<8x32xf32>
    %504 = arith.mulf %503, %501 : vector<8x32xf32>
    %505 = arith.mulf %498, %450 : vector<8x32xf32>
    %506 = arith.addf %504, %505 : vector<8x32xf32>
    %c0_160 = arith.constant 0 : index
    %c0_161 = arith.constant 0 : index
    %507 = vector.load %arg11[%c0_160, %c0_161] : memref<32x26xf32, #tpu.memory_space<vmem>>, vector<32x26xf32>
    %cst_162 = arith.constant dense<0.000000e+00> : vector<8x26xf32>
    %508 = tpu.matmul %478, %507, %cst_162 {dimension_numbers = #tpu.dot_dimension_numbers<[1], [0], [0], [1], [0, 0, 1, 1], [], []>} : vector<8x32xf32>, vector<32x26xf32>, vector<8x26xf32> -> vector<8x26xf32>
    %c0_163 = arith.constant 0 : index
    %c0_164 = arith.constant 0 : index
    %509 = vector.load %arg12[%c0_163, %c0_164] : memref<32x26xf32, #tpu.memory_space<vmem>>, vector<32x26xf32>
    %cst_165 = arith.constant dense<0.000000e+00> : vector<8x26xf32>
    %510 = tpu.matmul %506, %509, %cst_165 {dimension_numbers = #tpu.dot_dimension_numbers<[1], [0], [0], [1], [0, 0, 1, 1], [], []>} : vector<8x32xf32>, vector<32x26xf32>, vector<8x26xf32> -> vector<8x26xf32>
    %511 = arith.addf %508, %510 : vector<8x26xf32>
    %c0_166 = arith.constant 0 : index
    %c0_167 = arith.constant 0 : index
    %512 = vector.load %arg2[%c0_166, %c0_167] : memref<8x26xf32, #tpu.memory_space<vmem>>, vector<8x26xf32>
    %c0_168 = arith.constant 0 : index
    %c0_169 = arith.constant 0 : index
    %513 = vector.load %arg13[%c0_168, %c0_169] : memref<26x26xf32, #tpu.memory_space<vmem>>, vector<26x26xf32>
    %cst_170 = arith.constant dense<0.000000e+00> : vector<8x26xf32>
    %514 = tpu.matmul %512, %513, %cst_170 {dimension_numbers = #tpu.dot_dimension_numbers<[1], [0], [0], [1], [0, 0, 1, 1], [], []>} : vector<8x26xf32>, vector<26x26xf32>, vector<8x26xf32> -> vector<8x26xf32>
    %515 = arith.addf %511, %514 : vector<8x26xf32>
    %c0_171 = arith.constant 0 : index
    %c0_172 = arith.constant 0 : index
    %516 = vector.load %arg14[%c0_171, %c0_172] : memref<1x26xf32, #tpu.memory_space<vmem>>, vector<1x26xf32>
    %517 = vector.broadcast %516 : vector<1x26xf32> to vector<8x26xf32>
    %518 = arith.addf %515, %517 : vector<8x26xf32>
    %c0_173 = arith.constant 0 : index
    %c0_174 = arith.constant 0 : index
    %519 = vector.load %arg15[%c0_173, %c0_174] : memref<8x26xf32, #tpu.memory_space<vmem>>, vector<8x26xf32>
    tpu.vector_store %arg15[%c0_173, %c0_174], %518 {strides = array<i32>} : memref<8x26xf32, #tpu.memory_space<vmem>>, vector<8x26xf32>,
    return
  }
  func.func @transform_0(%arg0: i32) -> (i32, i32) {
    %c0_i32 = arith.constant 0 : i32
    %c0_i32_0 = arith.constant 0 : i32
    %c0_i32_1 = arith.constant 0 : i32
    return %c0_i32, %c0_i32_0 : i32, i32
  }
  func.func @transform_1(%arg0: i32) -> (i32, i32) {
    %c0_i32 = arith.constant 0 : i32
    %c0_i32_0 = arith.constant 0 : i32
    %c0_i32_1 = arith.constant 0 : i32
    return %c0_i32, %c0_i32_0 : i32, i32
  }
  func.func @transform_2(%arg0: i32) -> (i32, i32, i32) {
    %c0_i32 = arith.constant 0 : i32
    %c0_i32_0 = arith.constant 0 : i32
    %c0_i32_1 = arith.constant 0 : i32
    %c0_i32_2 = arith.constant 0 : i32
    return %c0_i32, %c0_i32_0, %c0_i32_1 : i32, i32, i32
  }
  func.func @transform_3(%arg0: i32) -> (i32, i32, i32) {
    %c0_i32 = arith.constant 0 : i32
    %c0_i32_0 = arith.constant 0 : i32
    %c0_i32_1 = arith.constant 0 : i32
    %c0_i32_2 = arith.constant 0 : i32
    return %c0_i32, %c0_i32_0, %c0_i32_1 : i32, i32, i32
  }
  func.func @transform_4(%arg0: i32) -> (i32, i32, i32) {
    %c0_i32 = arith.constant 0 : i32
    %c0_i32_0 = arith.constant 0 : i32
    %c0_i32_1 = arith.constant 0 : i32
    %c0_i32_2 = arith.constant 0 : i32
    return %c0_i32, %c0_i32_0, %c0_i32_1 : i32, i32, i32
  }
  func.func @transform_5(%arg0: i32) -> (i32, i32) {
    %c0_i32 = arith.constant 0 : i32
    %c0_i32_0 = arith.constant 0 : i32
    %c0_i32_1 = arith.constant 0 : i32
    return %c0_i32, %c0_i32_0 : i32, i32
  }
  func.func @transform_6(%arg0: i32) -> (i32, i32, i32) {
    %c0_i32 = arith.constant 0 : i32
    %c0_i32_0 = arith.constant 0 : i32
    %c0_i32_1 = arith.constant 0 : i32
    %c0_i32_2 = arith.constant 0 : i32
    return %c0_i32, %c0_i32_0, %c0_i32_1 : i32, i32, i32
  }
  func.func @transform_7(%arg0: i32) -> (i32, i32, i32) {
    %c0_i32 = arith.constant 0 : i32
    %c0_i32_0 = arith.constant 0 : i32
    %c0_i32_1 = arith.constant 0 : i32
    %c0_i32_2 = arith.constant 0 : i32
    return %c0_i32, %c0_i32_0, %c0_i32_1 : i32, i32, i32
  }
  func.func @transform_8(%arg0: i32) -> (i32, i32, i32) {
    %c0_i32 = arith.constant 0 : i32
    %c0_i32_0 = arith.constant 0 : i32
    %c0_i32_1 = arith.constant 0 : i32
    %c0_i32_2 = arith.constant 0 : i32
    return %c0_i32, %c0_i32_0, %c0_i32_1 : i32, i32, i32
  }
  func.func @transform_9(%arg0: i32) -> (i32, i32) {
    %c0_i32 = arith.constant 0 : i32
    %c0_i32_0 = arith.constant 0 : i32
    %c0_i32_1 = arith.constant 0 : i32
    return %c0_i32, %c0_i32_0 : i32, i32
  }
  func.func @transform_10(%arg0: i32) -> (i32, i32) {
    %c0_i32 = arith.constant 0 : i32
    %c0_i32_0 = arith.constant 0 : i32
    %c0_i32_1 = arith.constant 0 : i32
    return %c0_i32, %c0_i32_0 : i32, i32
  }
  func.func @transform_11(%arg0: i32) -> (i32, i32) {
    %c0_i32 = arith.constant 0 : i32
    %c0_i32_0 = arith.constant 0 : i32
    %c0_i32_1 = arith.constant 0 : i32
    return %c0_i32, %c0_i32_0 : i32, i32
  }
  func.func @transform_12(%arg0: i32) -> (i32, i32) {
    %c0_i32 = arith.constant 0 : i32
    %c0_i32_0 = arith.constant 0 : i32
    %c0_i32_1 = arith.constant 0 : i32
    return %c0_i32, %c0_i32_0 : i32, i32
  }
  func.func @transform_13(%arg0: i32) -> (i32, i32) {
    %c0_i32 = arith.constant 0 : i32
    %c0_i32_0 = arith.constant 0 : i32
    %c0_i32_1 = arith.constant 0 : i32
    return %c0_i32, %c0_i32_0 : i32, i32
  }
  func.func @transform_14(%arg0: i32) -> (i32, i32) {
    %c0_i32 = arith.constant 0 : i32
    %c0_i32_0 = arith.constant 0 : i32
    %c0_i32_1 = arith.constant 0 : i32
    return %c0_i32, %c0_i32_0 : i32, i32
  }
}

</mosaic_0001>

<bundles_post_ra>
// kernel: tpu_custom_call.1
= control target key start
LH: loop header
LB: loop body
LE: loop exit
PB: predicated region body
PF: predicated region fallthrough
CT: control target
= control target key end

     0   :  { %19 = vsyncpa [#allocation3], 0  ;;  %s7760_s0 = inlined_call_operand.vmem [shape: f32[64,27], index: 0, kind: input, shape index: {}]   ;;  %s7761_s1 = inlined_call_operand.hbm [shape: f32[8,26], index: 1, kind: input, shape index: {}]   ;;  %s7762_s2 = inlined_call_operand.vmem [shape: f32[3,27,32], index: 2, kind: input, shape index: {}]   ;;  %s7763_s3 = inlined_call_operand.hbm [shape: f32[3,32,32], index: 3, kind: input, shape index: {}]   ;;  %s7764_s4 = inlined_call_operand.vmem [shape: f32[3,1,32], index: 4, kind: input, shape index: {}]   ;;  %s7765_s5 = inlined_call_operand.vmem [shape: f32[1,32], index: 5, kind: input, shape index: {}]   ;;  %s7766_s6 = inlined_call_operand.hbm [shape: f32[3,27,32], index: 6, kind: input, shape index: {}]   ;;  %s7767_s7 = inlined_call_operand.hbm [shape: f32[3,32,32], index: 7, kind: input, shape index: {}]   ;;  %s7768_s8 = inlined_call_operand.vmem [shape: f32[3,1,32], index: 8, kind: input, shape index: {}]   ;;  %s7769_s9 = inlined_call_operand.vmem [shape: f32[1,32], index: 9, kind: input, shape index: {}]   ;;  %s7770_s10 = inlined_call_operand.hbm [shape: f32[32,26], index: 10, kind: input, shape index: {}]   ;;  %s7771_s11 = inlined_call_operand.hbm [shape: f32[32,26], index: 11, kind: input, shape index: {}]   ;;  %s7772_s12 = inlined_call_operand.hbm [shape: f32[26,26], index: 12, kind: input, shape index: {}]   ;;  %s7773_s13 = inlined_call_operand.vmem [shape: f32[1,26], index: 13, kind: input, shape index: {}]   ;;  %s7774_s14 = inlined_call_operand.hbm [shape: f32[8,26], index: 14, kind: output, shape index: {}]  }
   0x1   :  { %20 = vsyncpa [#allocation6], 0 }
   0x2   :  { %21 = vsyncpa [#allocation9], 0 }
   0x3   :  { %22 = vsyncpa [#allocation12], 0 }
   0x4   :  { %23 = vsyncpa [#allocation4], 0  ;;  %s6475_s29 = smov [#allocation5]  }
   0x5   :  { %s43_s30 = sshll.u32 %s6475_s29, 4  ;;  %s44_s30 = int_to_ptr.vmem [resolvable:$true] %s43_s30 }
   0x6   :  { %s6313_s15 = scalar_lea.vmem %s44_s30, 1536  ;;  %p6318_p1 = scmp.lt.s32.totalorder %s44_s30, %s44_s30 }
   0x7   :  { %p6314_p0 = scmp.ne.s32.totalorder %s44_s30, %s6313_s15  ;;  %p6319_p2 = scmp.lt.s32.totalorder %s6313_s15, %s6313_s15 }
   0x9   :  { %p6320_p3 = por %p6319_p2, %p6318_p1 }
   0xb   :  { %p6321_p4 = pnand %p6320_p3, %p6314_p0 }
   0xd   :  { %6324 = shalt.err (!%p6321_p4)
}
   0xe   :  { %s6476_s16 = smov 128   ;;  %s6477_s17 = smov 8  }
   0xf   :  { %49 = dma.hbm_to_vmem [thread:$0]  %s7763_s3, 1536, %s44_s30, [#allocation6], %s6476_s16, %s6476_s16, %s6477_s17  }
  0x10   :  { %s6478_s20 = smov [#allocation8]   ;;  %s6479_s22 = smov [#allocation11]  }
  0x11   :  { %s71_s21 = sshll.u32 %s6478_s20, 4  ;;  %s99_s23 = sshll.u32 %s6479_s22, 4  ;;  %s72_s21 = int_to_ptr.vmem [resolvable:$true] %s71_s21  ;;  %s100_s23 = int_to_ptr.vmem [resolvable:$true] %s99_s23 }
  0x12   :  { %s6333_s24 = scalar_lea.vmem %s72_s21, 1536  ;;  %p6338_p6 = scmp.lt.s32.totalorder %s72_s21, %s72_s21 }
  0x13   :  { %p6334_p5 = scmp.ne.s32.totalorder %s72_s21, %s6333_s24  ;;  %p6339_p7 = scmp.lt.s32.totalorder %s6333_s24, %s6333_s24 }
  0x15   :  { %p6340_p8 = por %p6339_p7, %p6338_p6 }
  0x17   :  { %p6341_p9 = pnand %p6340_p8, %p6334_p5 }
  0x19   :  { %6344 = shalt.err (!%p6341_p9)
}
  0x1a   :  { %77 = dma.hbm_to_vmem [thread:$0]  %s7767_s7, 1536, %s72_s21, [#allocation9], %s6476_s16, %s6476_s16, %s6477_s17  }
  0x1b   :  { %s6353_s3 = scalar_lea.vmem %s100_s23, 512  ;;  %p6358_p11 = scmp.lt.s32.totalorder %s100_s23, %s100_s23 }
  0x1c   :  { %p6354_p10 = scmp.ne.s32.totalorder %s100_s23, %s6353_s3  ;;  %p6359_p12 = scmp.lt.s32.totalorder %s6353_s3, %s6353_s3 }
  0x1e   :  { %p6360_p13 = por %p6359_p12, %p6358_p11 }
  0x20   :  { %p6361_p0 = pnand %p6360_p13, %p6354_p10 }
  0x22   :  { %6364 = shalt.err (!%p6361_p0)
}
  0x23   :  { %105 = dma.hbm_to_vmem [thread:$0]  %s7771_s11, 512, %s100_s23, [#allocation12], %s6476_s16, %s6476_s16, %s6477_s17  }
  0x24   :  { %s6480_s29 = smov [#allocation2]   ;;  %s6481_s15 = smov [#allocation7]  }
  0x25   :  { %s32_s30 = sshll.u32 %s6480_s29, 4  ;;  %s59_s7 = sshll.u32 %s6481_s15, 4  ;;  %s33_s30 = int_to_ptr.vmem [resolvable:$true] %s32_s30  ;;  %s60_s7 = int_to_ptr.vmem [resolvable:$true] %s59_s7 }
  0x26   :  { %s6373_s18 = scalar_lea.vmem %s33_s30, 128  ;;  %p6378_p2 = scmp.lt.s32.totalorder %s33_s30, %s33_s30 }
  0x27   :  { %p6374_p1 = scmp.ne.s32.totalorder %s33_s30, %s6373_s18  ;;  %p6379_p3 = scmp.lt.s32.totalorder %s6373_s18, %s6373_s18 }
  0x29   :  { %p6380_p4 = por %p6379_p3, %p6378_p2 }
  0x2b   :  { %p6381_p5 = pnand %p6380_p4, %p6374_p1 }
  0x2d   :  { %6384 = shalt.err (!%p6381_p5)
}
  0x2e   :  { %35 = dma.hbm_to_vmem [thread:$0]  %s7761_s1, 128, %s33_s30, [#allocation3]  }
  0x2f   :  { %s6393_s21 = scalar_lea.vmem %s60_s7, 1536  ;;  %p6398_p7 = scmp.lt.s32.totalorder %s60_s7, %s60_s7 }
  0x30   :  { %p6394_p6 = scmp.ne.s32.totalorder %s60_s7, %s6393_s21  ;;  %p6399_p8 = scmp.lt.s32.totalorder %s6393_s21, %s6393_s21 }
  0x32   :  { %p6400_p9 = por %p6399_p8, %p6398_p7 }
  0x34   :  { %p6401_p10 = pnand %p6400_p9, %p6394_p6 }
  0x36   :  { %6404 = shalt.err (!%p6401_p10)
}
  0x37   :  { %65 = dma.hbm_to_vmem [thread:$0]  %s7766_s6, 1536, %s60_s7, [#allocation6], %s6476_s16, %s6476_s16, %s6477_s17  }
  0x38   :  { %s6482_s23 = smov [#allocation10]   ;;  %s6483_s25 = smov [#allocation13]  }
  0x39   :  { %s87_s24 = sshll.u32 %s6482_s23, 4  ;;  %s111_s1 = sshll.u32 %s6483_s25, 4  ;;  %s88_s24 = int_to_ptr.vmem [resolvable:$true] %s87_s24  ;;  %s112_s1 = int_to_ptr.vmem [resolvable:$true] %s111_s1 }
  0x3a   :  { %s6413_s26 = scalar_lea.vmem %s88_s24, 512  ;;  %p6418_p12 = scmp.lt.s32.totalorder %s88_s24, %s88_s24 }
  0x3b   :  { %p6414_p11 = scmp.ne.s32.totalorder %s88_s24, %s6413_s26  ;;  %p6419_p13 = scmp.lt.s32.totalorder %s6413_s26, %s6413_s26 }
  0x3d   :  { %p6420_p0 = por %p6419_p13, %p6418_p12 }
  0x3f   :  { %p6421_p1 = pnand %p6420_p0, %p6414_p11 }
  0x41   :  { %6424 = shalt.err (!%p6421_p1)
}
  0x42   :  { %93 = dma.hbm_to_vmem [thread:$0]  %s7770_s10, 512, %s88_s24, [#allocation9], %s6476_s16, %s6476_s16, %s6477_s17  }
  0x43   :  { %s6433_s6 = scalar_lea.vmem %s112_s1, 512  ;;  %p6438_p3 = scmp.lt.s32.totalorder %s112_s1, %s112_s1 }
  0x44   :  { %p6434_p2 = scmp.ne.s32.totalorder %s112_s1, %s6433_s6  ;;  %p6439_p4 = scmp.lt.s32.totalorder %s6433_s6, %s6433_s6 }
  0x46   :  { %p6440_p5 = por %p6439_p4, %p6438_p3 }
  0x48   :  { %p6441_p6 = pnand %p6440_p5, %p6434_p2 }
  0x4a   :  { %6444 = shalt.err (!%p6441_p6)
}
  0x4b   :  { %117 = dma.hbm_to_vmem [thread:$0]  %s7772_s12, 512, %s112_s1, [#allocation12], %s6476_s16, %s6476_s16, %s6477_s17  }
  0x4c   :  { %6465 = dma.done.wait [#allocation3], 128  }
  0x4d   :  { %6466 = vsyncadd [#allocation3], 4294967168 }
  0x4e   :  { %6467 = dma.done.wait [#allocation6], 3072  }
  0x4f   :  { %6468 = vsyncadd [#allocation6], 4294964224 }
  0x50   :  { %6469 = dma.done.wait [#allocation9], 2048  }
  0x51   :  { %6470 = vsyncadd [#allocation9], 4294965248 }
  0x52   :  { %6471 = dma.done.wait [#allocation12], 1024  }
  0x53   :  { %6472 = vsyncadd [#allocation12], 4294966272  ;;  %vm185_vm0 = vcmask 1042432   ;;  %v152_v0 = vld [vmem:[%s7762_s2 + $0x18] sm:$0x7]  ;;  %v151_v2 = vld [vmem:[%s7762_s2 + $0x10] sm:$0xff] }
  0x54   :  { %v4959_v1 = vld [vmem:[%s7762_s2 + $0x38] sm:$0x7]  ;;  %5426 = vmatprep.subr.msk.mxu0 %vm185_vm0, %v152_v0  ;;  %v4958_v3 = vld [vmem:[%s7762_s2 + $0x30] sm:$0xff]  ;;  %v150_v4 = vld [vmem:[%s7762_s2 + $0x8] sm:$0xff]  ;;  %vm160_vm1 = vcmask 220160   ;;  %v7775_v34 = vmov 0.0  }
  0x55   :  { %5446 = vmatprep.subr.msk.mxu1 %vm185_vm0, %v4959_v1  ;;  %5427 = vmatpush3.msk.msra.mxu0 %vm185_vm0, %v152_v0  ;;  %v4957_v5 = vld [vmem:[%s7762_s2 + $0x28] sm:$0xff]  ;;  %v149_v6 = vld [vmem:[%s7762_s2] sm:$0xff]  ;;  %v4974_v10 = vld [vmem:[%s7762_s2 + $0x58] sm:$0x7]  ;;  %vm6485_vm2 = vmmov 0   ;;  %vm927_vm3 = vcmask 261120  }
  0x56   :  { %5447 = vmatpush3.msk.msra.mxu1 %vm185_vm0, %v4959_v1  ;;  %5428 = vmatprep.subr.mxu0 %v151_v2  ;;  %v4956_v7 = vld [vmem:[%s7762_s2 + $0x20] sm:$0xff]  ;;  %v6637_v9 = vld [vmem:[%s7760_s0 + $0x8] sm:$0xff]  ;;  %v6653_v12 = vld [vmem:[%s7760_s0 + $0x10] sm:$0xff]  ;;  %vm4844_vm4 = vcmask 1041408   ;;  %vm4840_vm5 = vcmask 211968   ;;  %s6486_s21 = smov [#allocation14]  }
  0x57   :  { %5448 = vmatprep.subr.mxu1 %v4958_v3  ;;  %5429 = vmatpush3.msra.mxu0 %v151_v2  ;;  %v6632_v8 = vld [vmem:[%s7760_s0] sm:$0xff]  ;;  %v6660_v13 = vld [vmem:[%s7760_s0 + $0x18] sm:$0xff]  ;;  %v4973_v14 = vld [vmem:[%s7762_s2 + $0x50] sm:$0xff]  ;;  %s4934_s11 = sshll.u32 %s6486_s21, 4  ;;  %s4935_s11 = int_to_ptr.vmem [resolvable:$true] %s4934_s11 }
  0x58   :  { %5449 = vmatpush3.msra.mxu1 %v4958_v3  ;;  %5430 = vmatprep.subr.mxu0 %v150_v4  ;;  %v539_v11 = vld [vmem:[#allocation7 + $0x18] sm:$0x7]  ;;  %v538_v15 = vld [vmem:[#allocation7 + $0x10] sm:$0xff]  ;;  %v6683_v17 = vld [vmem:[%s7760_s0 + $0x28] sm:$0xff]  ;;  %s6445_s22 = scalar_lea.vmem %s4935_s11, 128  ;;  %p6450_p8 = scmp.lt.s32.totalorder %s4935_s11, %s4935_s11 }
  0x59   :  { %5450 = vmatprep.subr.mxu1 %v4957_v5  ;;  %5431 = vmatpush3.msra.mxu0 %v150_v4  ;;  %v6678_v16 = vld [vmem:[%s7760_s0 + $0x20] sm:$0xff]  ;;  %v4972_v18 = vld [vmem:[%s7762_s2 + $0x48] sm:$0xff]  ;;  %v537_v19 = vld [vmem:[#allocation7 + $0x8] sm:$0xff]  ;;  %p6446_p7 = scmp.ne.s32.totalorder %s4935_s11, %s6445_s22  ;;  %p6451_p9 = scmp.lt.s32.totalorder %s6445_s22, %s6445_s22 }
  0x5a   :  { %5451 = vmatpush3.msra.mxu1 %v4957_v5  ;;  %5432 = vmatprep.subr.mxu0 %v149_v6  ;;  %v6699_v20 = vld [vmem:[%s7760_s0 + $0x30] sm:$0xff]  ;;  %v6704_v21 = vld [vmem:[%s7760_s0 + $0x38] sm:$0xff]  ;;  %v4971_v22 = vld [vmem:[%s7762_s2 + $0x40] sm:$0xff] }
  0x5b   :  { %5452 = vmatprep.subr.mxu1 %v4956_v7  ;;  %5433 = vmatpush3.msra.mxu0 %v149_v6  ;;  %v536_v23 = vld [vmem:[#allocation7] sm:$0xff]  ;;  %v659_v24 = vld [vmem:[#allocation7 + $0x38] sm:$0x7]  ;;  %v658_v26 = vld [vmem:[#allocation7 + $0x30] sm:$0xff]  ;;  %p6452_p10 = por %p6451_p9, %p6450_p8 }
  0x5c   :  { %5434 = vmatprep.mubr.msk.f32.mxu0 %vm160_vm1, %v6632_v8  ;;  %5453 = vmatpush3.msra.mxu1 %v4956_v7  ;;  %v780_v25 = vld [vmem:[#allocation7 + $0x58] sm:$0x7]  ;;  %v779_v27 = vld [vmem:[#allocation7 + $0x50] sm:$0xff]  ;;  %v657_v28 = vld [vmem:[#allocation7 + $0x28] sm:$0xff] }
  0x5d   :  { %5454 = vmatprep.mubr.msk.f32.mxu1 %vm160_vm1, %v6632_v8  ;;  %5435 = vmatmul.mubr.msk.f32.vlgmr.msra.gmra.mxu0 %vm160_vm1, %v6637_v9  ;;  %v778_v29 = vld [vmem:[#allocation7 + $0x48] sm:$0xff]  ;;  %v656_v30 = vld [vmem:[#allocation7 + $0x20] sm:$0xff]  ;;  %v6757_v32 = vld [vmem:[#allocation5 + $0x18] sm:$0xff]  ;;  %p6453_p11 = pnand %p6452_p10, %p6446_p7 }
  0x5e   :  { %5455 = vmatmul.mubr.msk.f32.vlgmr.msra.gmra.mxu1 %vm160_vm1, %v6637_v9  ;;  %5466 = vmatprep.subr.msk.mxu0 %vm185_vm0, %v4974_v10  ;;  %v777_v31 = vld [vmem:[#allocation7 + $0x40] sm:$0xff]  ;;  %v6759_v33 = vld [vmem:[#allocation5 + $0x38] sm:$0xff]  ;;  %v6773_v35 = vld [vmem:[#allocation5 + $0x10] sm:$0xff] }
  0x5f   :  { %5486 = vmatprep.subr.msk.mxu1 %vm185_vm0, %v539_v11  ;;  %5467 = vmatpush3.msk.msra.mxu0 %vm185_vm0, %v4974_v10  ;;  %v6775_v36 = vld [vmem:[#allocation5 + $0x30] sm:$0xff]  ;;  %v6789_v37 = vld [vmem:[#allocation5 + $0x8] sm:$0xff]  ;;  %v6805_v39 = vld [vmem:[#allocation5] sm:$0xff] }
  0x60   :  { %5487 = vmatpush3.msk.msra.mxu1 %vm185_vm0, %v539_v11  ;;  %5437 = vmatprep.mubr.msk.f32.mxu0 %vm160_vm1, %v6653_v12  ;;  %v6791_v38 = vld [vmem:[#allocation5 + $0x28] sm:$0xff]  ;;  %v6807_v40 = vld [vmem:[#allocation5 + $0x20] sm:$0xff]  ;;  %v6821_v41 = vld [vmem:[#allocation5 + $0x58] sm:$0xff] }
  0x61   :  { %5457 = vmatprep.mubr.msk.f32.mxu1 %vm160_vm1, %v6653_v12  ;;  %5438 = vmatmul.mubr.msk.f32.gmra.mxu0 %vm160_vm1, %v6660_v13  ;;  %v6823_v42 = vld [vmem:[#allocation8 + $0x18] sm:$0xff]  ;;  %v6829_v43 = vld [vmem:[#allocation5 + $0x50] sm:$0xff]  ;;  %v6837_v45 = vld [vmem:[#allocation5 + $0x48] sm:$0xff] }
  0x62   :  { %5458 = vmatmul.mubr.msk.f32.gmra.mxu1 %vm160_vm1, %v6660_v13  ;;  %5468 = vmatprep.subr.mxu0 %v4973_v14  ;;  %v6831_v44 = vld [vmem:[#allocation8 + $0x10] sm:$0xff]  ;;  %v6839_v46 = vld [vmem:[#allocation8 + $0x8] sm:$0xff]  ;;  %v6845_v47 = vld [vmem:[#allocation5 + $0x40] sm:$0xff] }
  0x63   :  { %5488 = vmatprep.subr.mxu1 %v538_v15  ;;  %5469 = vmatpush3.msra.mxu0 %v4973_v14  ;;  %v6847_v48 = vld [vmem:[#allocation8] sm:$0xff]  ;;  %v6859_v49 = vld [vmem:[#allocation8 + $0x38] sm:$0xff]  ;;  %v6866_v51 = vld [vmem:[#allocation8 + $0x30] sm:$0xff] }
  0x64   :  { %5489 = vmatpush3.msra.mxu1 %v538_v15  ;;  %5440 = vmatprep.mubr.msk.f32.mxu0 %vm160_vm1, %v6678_v16  ;;  %v6863_v50 = vld [vmem:[#allocation8 + $0x58] sm:$0xff]  ;;  %v6872_v52 = vld [vmem:[#allocation8 + $0x50] sm:$0xff]  ;;  %v6875_v53 = vld [vmem:[#allocation8 + $0x28] sm:$0xff] }
  0x65   :  { %5460 = vmatprep.mubr.msk.f32.mxu1 %vm160_vm1, %v6678_v16  ;;  %5441 = vmatmul.mubr.msk.f32.gmra.mxu0 %vm160_vm1, %v6683_v17  ;;  %v6880_v54 = vld [vmem:[#allocation8 + $0x48] sm:$0xff]  ;;  %v6883_v55 = vld [vmem:[#allocation8 + $0x20] sm:$0xff]  ;;  %v6924_v57 = vld [vmem:[%s7764_s4] ss:$0 sm:$0xff] }
  0x66   :  { %5461 = vmatmul.mubr.msk.f32.gmra.mxu1 %vm160_vm1, %v6683_v17  ;;  %5470 = vmatprep.subr.mxu0 %v4972_v18  ;;  %v6888_v56 = vld [vmem:[#allocation8 + $0x40] sm:$0xff]  ;;  %v6929_v58 = vld [vmem:[%s7764_s4 + $0x1] ss:$0 sm:$0xff] }
  0x67   :  { %5490 = vmatprep.subr.mxu1 %v537_v19  ;;  %5471 = vmatpush3.msra.mxu0 %v4972_v18 }
  0x68   :  { %5491 = vmatpush3.msra.mxu1 %v537_v19  ;;  %5443 = vmatprep.mubr.msk.f32.mxu0 %vm160_vm1, %v6699_v20 }
  0x69   :  { %5463 = vmatprep.mubr.msk.f32.mxu1 %vm160_vm1, %v6699_v20  ;;  %5444 = vmatmul.mubr.msk.f32.gmra.mxu0 %vm160_vm1, %v6704_v21 }
  0x6a   :  { %5464 = vmatmul.mubr.msk.f32.gmra.mxu1 %vm160_vm1, %v6704_v21  ;;  %5472 = vmatprep.subr.mxu0 %v4971_v22 }
  0x6b   :  { %5492 = vmatprep.subr.mxu1 %v536_v23  ;;  %5473 = vmatpush3.msra.mxu0 %v4971_v22 }
  0x6c   :  { %5493 = vmatpush3.msra.mxu1 %v536_v23  ;;  %5474 = vmatprep.mubr.msk.f32.mxu0 %vm160_vm1, %v6632_v8  ;;  %v6974_v23 = vld [vmem:[%s7764_s4 + $0x2] ss:$0 sm:$0xff] }
  0x6d   :  { %5494 = vmatprep.mubr.msk.f32.mxu1 %vm160_vm1, %v6632_v8  ;;  %5475 = vmatmul.mubr.msk.f32.vlgmr.msra.gmra.mxu0 %vm160_vm1, %v6637_v9 }
  0x6e   :  { %5495 = vmatmul.mubr.msk.f32.vlgmr.msra.gmra.mxu1 %vm160_vm1, %v6637_v9  ;;  %5506 = vmatprep.subr.msk.mxu0 %vm185_vm0, %v659_v24 }
  0x6f   :  { %5526 = vmatprep.subr.msk.mxu1 %vm185_vm0, %v780_v25  ;;  %5507 = vmatpush3.msk.msra.mxu0 %vm185_vm0, %v659_v24  ;;  %v6979_v24 = vld [vmem:[%s7768_s8] ss:$0 sm:$0xff] }
  0x70   :  { %5527 = vmatpush3.msk.msra.mxu1 %vm185_vm0, %v780_v25  ;;  %5477 = vmatprep.mubr.msk.f32.mxu0 %vm160_vm1, %v6653_v12 }
  0x71   :  { %5497 = vmatprep.mubr.msk.f32.mxu1 %vm160_vm1, %v6653_v12  ;;  %5478 = vmatmul.mubr.msk.f32.gmra.mxu0 %vm160_vm1, %v6660_v13 }
  0x72   :  { %5498 = vmatmul.mubr.msk.f32.gmra.mxu1 %vm160_vm1, %v6660_v13  ;;  %5508 = vmatprep.subr.mxu0 %v658_v26 }
  0x73   :  { %5528 = vmatprep.subr.mxu1 %v779_v27  ;;  %5509 = vmatpush3.msra.mxu0 %v658_v26 }
  0x74   :  { %5529 = vmatpush3.msra.mxu1 %v779_v27  ;;  %5480 = vmatprep.mubr.msk.f32.mxu0 %vm160_vm1, %v6678_v16 }
  0x75   :  { %5500 = vmatprep.mubr.msk.f32.mxu1 %vm160_vm1, %v6678_v16  ;;  %5481 = vmatmul.mubr.msk.f32.gmra.mxu0 %vm160_vm1, %v6683_v17 }
  0x76   :  { %5501 = vmatmul.mubr.msk.f32.gmra.mxu1 %vm160_vm1, %v6683_v17  ;;  %5510 = vmatprep.subr.mxu0 %v657_v28 }
  0x77   :  { %5530 = vmatprep.subr.mxu1 %v778_v29  ;;  %5511 = vmatpush3.msra.mxu0 %v657_v28 }
  0x78   :  { %5531 = vmatpush3.msra.mxu1 %v778_v29  ;;  %5483 = vmatprep.mubr.msk.f32.mxu0 %vm160_vm1, %v6699_v20 }
  0x79   :  { %5503 = vmatprep.mubr.msk.f32.mxu1 %vm160_vm1, %v6699_v20  ;;  %5484 = vmatmul.mubr.msk.f32.gmra.mxu0 %vm160_vm1, %v6704_v21 }
  0x7a   :  { %5504 = vmatmul.mubr.msk.f32.gmra.mxu1 %vm160_vm1, %v6704_v21  ;;  %5512 = vmatprep.subr.mxu0 %v656_v30 }
  0x7b   :  { %5532 = vmatprep.subr.mxu1 %v777_v31  ;;  %5513 = vmatpush3.msra.mxu0 %v656_v30 }
  0x7c   :  { %5533 = vmatpush3.msra.mxu1 %v777_v31  ;;  %5514 = vmatprep.mubr.msk.f32.mxu0 %vm160_vm1, %v6632_v8 }
  0x7d   :  { %5534 = vmatprep.mubr.msk.f32.mxu1 %vm160_vm1, %v6632_v8  ;;  %5515 = vmatmul.mubr.msk.f32.vlgmr.msra.gmra.mxu0 %vm160_vm1, %v6637_v9 }
  0x7e   :  { %5535 = vmatmul.mubr.msk.f32.vlgmr.msra.gmra.mxu1 %vm160_vm1, %v6637_v9  ;;  %5546 = vmatprep.subr.mxu0 %v7775_v34 }
  0x7f   :  { %5557 = vmatprep.subr.mxu1 %v7775_v34  ;;  %5547 = vmatpush3.msra.mxu0 %v6757_v32 }
  0x80   :  { %5558 = vmatpush3.msra.mxu1 %v6759_v33  ;;  %5517 = vmatprep.mubr.msk.f32.mxu0 %vm160_vm1, %v6653_v12 }
  0x81   :  { %5537 = vmatprep.mubr.msk.f32.mxu1 %vm160_vm1, %v6653_v12  ;;  %5518 = vmatmul.mubr.msk.f32.gmra.mxu0 %vm160_vm1, %v6660_v13 }
  0x82   :  { %5538 = vmatmul.mubr.msk.f32.gmra.mxu1 %vm160_vm1, %v6660_v13  ;;  %5548 = vmatprep.subr.mxu0 %v7775_v34 }
  0x83   :  { %5559 = vmatprep.subr.mxu1 %v7775_v34  ;;  %5549 = vmatpush3.msra.mxu0 %v6773_v35 }
  0x84   :  { %5560 = vmatpush3.msra.mxu1 %v6775_v36  ;;  %5520 = vmatprep.mubr.msk.f32.mxu0 %vm160_vm1, %v6678_v16 }
  0x85   :  { %5540 = vmatprep.mubr.msk.f32.mxu1 %vm160_vm1, %v6678_v16  ;;  %5521 = vmatmul.mubr.msk.f32.gmra.mxu0 %vm160_vm1, %v6683_v17 }
  0x86   :  { %5541 = vmatmul.mubr.msk.f32.gmra.mxu1 %vm160_vm1, %v6683_v17  ;;  %5550 = vmatprep.subr.mxu0 %v7775_v34 }
  0x87   :  { %5561 = vmatprep.subr.mxu1 %v7775_v34  ;;  %5551 = vmatpush3.msra.mxu0 %v6789_v37 }
  0x88   :  { %5562 = vmatpush3.msra.mxu1 %v6791_v38  ;;  %5523 = vmatprep.mubr.msk.f32.mxu0 %vm160_vm1, %v6699_v20 }
  0x89   :  { %5543 = vmatprep.mubr.msk.f32.mxu1 %vm160_vm1, %v6699_v20  ;;  %5524 = vmatmul.mubr.msk.f32.gmra.mxu0 %vm160_vm1, %v6704_v21 }
  0x8a   :  { %5544 = vmatmul.mubr.msk.f32.gmra.mxu1 %vm160_vm1, %v6704_v21  ;;  %5552 = vmatprep.subr.mxu0 %v7775_v34 }
  0x8b   :  { %5563 = vmatprep.subr.mxu1 %v7775_v34  ;;  %5553 = vmatpush3.msra.mxu0 %v6805_v39 }
  0x8c   :  { %5564 = vmatpush3.msra.mxu1 %v6807_v40  ;;  %5554 = vmatprep.mubr.msk.f32.mxu0 %vm6485_vm2, %v7775_v34 }
  0x8d   :  { %5565 = vmatprep.mubr.msk.f32.mxu1 %vm6485_vm2, %v7775_v34  ;;  %5568 = vmatprep.subr.mxu0 %v7775_v34 }
  0x8e   :  { %5579 = vmatprep.subr.mxu1 %v7775_v34  ;;  %5555 = vmatmul.mubr.f32.vlgmr.msra.gmra.mxu0 %v7775_v34 }
  0x8f   :  { %5566 = vmatmul.mubr.f32.vlgmr.msra.gmra.mxu1 %v7775_v34  ;;  %5569 = vmatpush3.msra.mxu0 %v6821_v41 }
  0x90   :  { %5580 = vmatpush3.msra.mxu1 %v6823_v42  ;;  %5570 = vmatprep.subr.mxu0 %v7775_v34 }
  0x91   :  { %5581 = vmatprep.subr.mxu1 %v7775_v34  ;;  %5571 = vmatpush3.msra.mxu0 %v6829_v43 }
  0x92   :  { %5582 = vmatpush3.msra.mxu1 %v6831_v44  ;;  %5572 = vmatprep.subr.mxu0 %v7775_v34 }
  0x93   :  { %5583 = vmatprep.subr.mxu1 %v7775_v34  ;;  %5573 = vmatpush3.msra.mxu0 %v6837_v45 }
  0x94   :  { %5584 = vmatpush3.msra.mxu1 %v6839_v46  ;;  %5574 = vmatprep.subr.mxu0 %v7775_v34 }
  0x95   :  { %5585 = vmatprep.subr.mxu1 %v7775_v34  ;;  %5575 = vmatpush3.msra.mxu0 %v6845_v47 }
  0x96   :  { %5586 = vmatpush3.msra.mxu1 %v6847_v48  ;;  %5587 = vmatprep.mubr.msk.f32.mxu1 %vm6485_vm2, %v7775_v34 }
  0x97   :  { %5576 = vmatprep.mubr.msk.f32.mxu0 %vm6485_vm2, %v7775_v34  ;;  %5588 = vmatmul.mubr.f32.vlgmr.msra.gmra.mxu1 %v7775_v34 }
  0x98   :  { %5590 = vmatprep.subr.mxu0 %v7775_v34  ;;  %5577 = vmatmul.mubr.f32.vlgmr.msra.gmra.mxu0 %v7775_v34 }
  0x99   :  { %5601 = vmatprep.subr.mxu1 %v7775_v34  ;;  %5591 = vmatpush3.msra.mxu0 %v6859_v49 }
  0x9a   :  { %5598 = vmatprep.mubr.msk.f32.mxu0 %vm6485_vm2, %v7775_v34  ;;  %5592 = vmatprep.subr.mxu0 %v7775_v34 }
  0x9b   :  { %5602 = vmatpush3.msra.mxu1 %v6863_v50  ;;  %5593 = vmatpush3.msra.mxu0 %v6866_v51 }
  0x9c   :  { %5603 = vmatprep.subr.mxu1 %v7775_v34  ;;  %5594 = vmatprep.subr.mxu0 %v7775_v34 }
  0x9d   :  { %5604 = vmatpush3.msra.mxu1 %v6872_v52  ;;  %5595 = vmatpush3.msra.mxu0 %v6875_v53 }
  0x9e   :  { %5605 = vmatprep.subr.mxu1 %v7775_v34  ;;  %5596 = vmatprep.subr.mxu0 %v7775_v34 }
  0x9f   :  { %5606 = vmatpush3.msra.mxu1 %v6880_v54  ;;  %5597 = vmatpush3.msra.mxu0 %v6883_v55 }
  0xa0   :  { %5607 = vmatprep.subr.mxu1 %v7775_v34  ;;  %5599 = vmatmul.mubr.f32.vlgmr.msra.gmra.mxu0 %v7775_v34 }
  0xa1   :  { %5608 = vmatpush3.msra.mxu1 %v6888_v56  ;;  %5609 = vmatprep.mubr.msk.f32.mxu1 %vm6485_vm2, %v7775_v34 }
  0xa2   :  { %5612 = vmatprep.subr.mxu0 %v7775_v34  ;;  %5610 = vmatmul.mubr.f32.vlgmr.msra.gmra.mxu1 %v7775_v34 }
  0xa3   :  { %5623 = vmatprep.subr.mxu1 %v7775_v34  ;;  %5613 = vmatpush3.msra.mxu0 %v6757_v32 }
  0xa4   :  { %5624 = vmatpush3.msra.mxu1 %v6759_v33  ;;  %5614 = vmatprep.subr.mxu0 %v7775_v34 }
  0xa5   :  { %5625 = vmatprep.subr.mxu1 %v7775_v34  ;;  %5615 = vmatpush3.msra.mxu0 %v6773_v35 }
  0xa6   :  { %5626 = vmatpush3.msra.mxu1 %v6775_v36  ;;  %5616 = vmatprep.subr.mxu0 %v7775_v34 }
  0xa7   :  { %5627 = vmatprep.subr.mxu1 %v7775_v34  ;;  %5617 = vmatpush3.msra.mxu0 %v6789_v37 }
  0xa8   :  { %5628 = vmatpush3.msra.mxu1 %v6791_v38  ;;  %5618 = vmatprep.subr.mxu0 %v7775_v34 }
  0xa9   :  { %5629 = vmatprep.subr.mxu1 %v7775_v34  ;;  %5619 = vmatpush3.msra.mxu0 %v6805_v39 }
  0xaa   :  { %5630 = vmatpush3.msra.mxu1 %v6807_v40  ;;  %5620 = vmatprep.mubr.msk.f32.mxu0 %vm6485_vm2, %v7775_v34 }
  0xab   :  { %5631 = vmatprep.mubr.msk.f32.mxu1 %vm6485_vm2, %v7775_v34  ;;  %5634 = vmatprep.subr.mxu0 %v7775_v34 }
  0xac   :  { %5645 = vmatprep.subr.mxu1 %v7775_v34 }
 0x11d   :  { %v5436_v59 = vpop.f32.mrf.mxu0 }
 0x11e   :  { %v5456_v60 = vpop.f32.mrf.mxu1  ;;  %v6932_v61 = vadd.f32 %v5436_v59, %v6924_v57 }
 0x11f   :  { %v6935_v62 = vadd.f32 %v5456_v60, %v6929_v58  ;;  %v6937_v63 = vpop.f32.mrf.mxu0 }
 0x120   :  { %v6939_v0 = vpop.f32.mrf.mxu1 }
 0x121   :  { %v5439_v1 = vpop.f32.mrf.mxu0 }
 0x122   :  { %v5459_v2 = vpop.f32.mrf.mxu1  ;;  %v6942_v3 = vadd.f32 %v5439_v1, %v6924_v57 }
 0x123   :  { %v6945_v4 = vadd.f32 %v5459_v2, %v6929_v58  ;;  %v265_v5 = vpop.f32.mrf.mxu0 }
 0x124   :  { %7777 = vst [vmem:[#allocation20_spill] sm:$0xff] %v6942_v3  ;;  %v386_v6 = vpop.f32.mrf.mxu1  ;;  %v6948_v7 = vadd.f32 %v6924_v57, %v265_v5 }
 0x125   :  { %7778 = vst [vmem:[#allocation21_spill] sm:$0xff] %v6945_v4  ;;  %v6951_v8 = vadd.f32 %v6929_v58, %v386_v6  ;;  %v5442_v9 = vpop.f32.mrf.mxu0 }
 0x126   :  { %v5462_v10 = vpop.f32.mrf.mxu1  ;;  %v6954_v11 = vadd.f32 %v5442_v9, %v6924_v57 }
 0x127   :  { %v6957_v12 = vadd.f32 %v5462_v10, %v6929_v58  ;;  %v275_v13 = vpop.f32.mrf.mxu0 }
 0x128   :  { %7779 = vst [vmem:[#allocation22_spill] sm:$0xff] %v6954_v11  ;;  %v396_v14 = vpop.f32.mrf.mxu1  ;;  %v6960_v15 = vadd.f32 %v6924_v57, %v275_v13 }
 0x129   :  { %7780 = vst [vmem:[#allocation23_spill] sm:$0xff] %v6957_v12  ;;  %v6963_v16 = vadd.f32 %v6929_v58, %v396_v14  ;;  %v5445_v17 = vpop.f32.mrf.mxu0 }
 0x12a   :  { %7781 = vst [vmem:[#allocation24_spill] sm:$0xff] %v6960_v15  ;;  %v5465_v18 = vpop.f32.mrf.mxu1  ;;  %v6966_v19 = vadd.f32 %v5445_v17, %v6924_v57 }
 0x12b   :  { %7782 = vst [vmem:[#allocation25_spill] sm:$0xff] %v6963_v16  ;;  %v6969_v20 = vadd.f32 %v5465_v18, %v6929_v58  ;;  %v285_v21 = vpop.f32.mrf.mxu0 }
 0x12c   :  { %7783 = vst [vmem:[#allocation26_spill] sm:$0xff] %v6966_v19  ;;  %v406_v22 = vpop.f32.mrf.mxu1  ;;  %v6982_v25 = vadd.f32 %v6924_v57, %v285_v21 }
 0x12d   :  { %7784 = vst [vmem:[#allocation27_spill] sm:$0xff] %v6969_v20  ;;  %v6985_v26 = vadd.f32 %v6929_v58, %v406_v22  ;;  %v5476_v27 = vpop.f32.mrf.mxu0 }
 0x12e   :  { %7785 = vst [vmem:[#allocation28_spill] sm:$0xff] %v6982_v25  ;;  %v5496_v28 = vpop.f32.mrf.mxu1  ;;  %v6988_v29 = vadd.f32 %v5476_v27, %v6974_v23 }
 0x12f   :  { %7786 = vst [vmem:[#allocation29_spill] sm:$0xff] %v6985_v26  ;;  %v6991_v30 = vadd.f32 %v5496_v28, %v6979_v24  ;;  %v6993_v31 = vpop.f32.mrf.mxu0 }
 0x130   :  { %v616_v59 = vpop.f32.mrf.mxu1 }
 0x131   :  { %7787 = vst [vmem:[#allocation30_spill] sm:$0xff] %v6991_v30  ;;  %v6996_v60 = vadd.f32 %v6979_v24, %v616_v59  ;;  %v5479_v1 = vpop.f32.mrf.mxu0 }
 0x132   :  { %v5499_v2 = vpop.f32.mrf.mxu1  ;;  %v6999_v5 = vadd.f32 %v5479_v1, %v6974_v23 }
 0x133   :  { %7788 = vst [vmem:[#allocation31_spill] sm:$0xff] %v6996_v60  ;;  %v7002_v6 = vadd.f32 %v5499_v2, %v6979_v24  ;;  %v507_v9 = vpop.f32.mrf.mxu0 }
 0x134   :  { %7789 = vst [vmem:[#allocation32_spill] sm:$0xff] %v6999_v5  ;;  %v626_v10 = vpop.f32.mrf.mxu1  ;;  %v7005_v13 = vadd.f32 %v6974_v23, %v507_v9 }
 0x135   :  { %7790 = vst [vmem:[#allocation33_spill] sm:$0xff] %v7002_v6  ;;  %v7008_v14 = vadd.f32 %v6979_v24, %v626_v10  ;;  %v5482_v17 = vpop.f32.mrf.mxu0 }
 0x136   :  { %v5502_v18 = vpop.f32.mrf.mxu1  ;;  %v7011_v21 = vadd.f32 %v5482_v17, %v6974_v23  ;;  %v4997_v17 = vld [vmem:[%s7768_s8 + $0x1] ss:$0 sm:$0xff] }
 0x137   :  { %7791 = vst [vmem:[#allocation34_spill] sm:$0xff] %v7008_v14  ;;  %v7014_v22 = vadd.f32 %v5502_v18, %v6979_v24  ;;  %v517_v27 = vpop.f32.mrf.mxu0  ;;  %v7031_v18 = vld [vmem:[%s7768_s8 + $0x2] ss:$0 sm:$0xff] }
 0x138   :  { %7792 = vst [vmem:[#allocation35_spill] sm:$0xff] %v7011_v21  ;;  %v636_v28 = vpop.f32.mrf.mxu1  ;;  %v7017_v59 = vadd.f32 %v6974_v23, %v517_v27 }
 0x139   :  { %v7020_v1 = vadd.f32 %v6979_v24, %v636_v28  ;;  %v5485_v2 = vpop.f32.mrf.mxu0 }
 0x13a   :  { %7793 = vst [vmem:[#allocation36_spill] sm:$0xff] %v7017_v59  ;;  %v5505_v9 = vpop.f32.mrf.mxu1  ;;  %v7023_v10 = vadd.f32 %v5485_v2, %v6974_v23 }
 0x13b   :  { %7794 = vst [vmem:[#allocation37_spill] sm:$0xff] %v7020_v1  ;;  %v527_v34 = vpop.f32.mrf.mxu0 }
 0x13c   :  { %7795 = vst [vmem:[#allocation38_spill] sm:$0xff] %v7023_v10  ;;  %v646_v60 = vpop.f32.mrf.mxu1  ;;  %v7034_v27 = vadd.f32 %v6974_v23, %v527_v34 }
 0x13d   :  { %v7037_v28 = vadd.f32 %v6979_v24, %v646_v60  ;;  %v5516_v20 = vpop.f32.mrf.mxu0 }
 0x13e   :  { %7796 = vst [vmem:[#allocation39_spill] sm:$0xff] %v7034_v27  ;;  %v5536_v2 = vpop.f32.mrf.mxu1  ;;  %v7039_v10 = vadd.f32 %v5516_v20, %v4997_v17 }
 0x13f   :  { %v7042_v19 = vadd.f32 %v5536_v2, %v7031_v18  ;;  %v737_v30 = vpop.f32.mrf.mxu0 }
 0x140   :  { %7797 = vst [vmem:[#allocation40_spill] sm:$0xff] %v7039_v10  ;;  %v858_v26 = vpop.f32.mrf.mxu1  ;;  %v7044_v25 = vadd.f32 %v4997_v17, %v737_v30 }
 0x141   :  { %7798 = vst [vmem:[#allocation41_spill] sm:$0xff] %v7042_v19  ;;  %v7047_v21 = vadd.f32 %v7031_v18, %v858_v26  ;;  %v5519_v14 = vpop.f32.mrf.mxu0 }
 0x142   :  { %7799 = vst [vmem:[#allocation42_spill] sm:$0xff] %v7044_v25  ;;  %v5539_v34 = vpop.f32.mrf.mxu1  ;;  %v7049_v27 = vadd.f32 %v5519_v14, %v4997_v17 }
 0x143   :  { %7800 = vst [vmem:[#allocation43_spill] sm:$0xff] %v7047_v21  ;;  %v7052_v60 = vadd.f32 %v5539_v34, %v7031_v18  ;;  %v747_v12 = vpop.f32.mrf.mxu0 }
 0x144   :  { %7801 = vst [vmem:[#allocation44_spill] sm:$0xff] %v7049_v27  ;;  %v868_v20 = vpop.f32.mrf.mxu1  ;;  %v7054_v10 = vadd.f32 %v4997_v17, %v747_v12 }
 0x145   :  { %7802 = vst [vmem:[#allocation45_spill] sm:$0xff] %v7052_v60  ;;  %v7057_v2 = vadd.f32 %v7031_v18, %v868_v20  ;;  %v5522_v19 = vpop.f32.mrf.mxu0 }
 0x146   :  { %7803 = vst [vmem:[#allocation46_spill] sm:$0xff] %v7054_v10  ;;  %v5542_v30 = vpop.f32.mrf.mxu1  ;;  %v7059_v25 = vadd.f32 %v5522_v19, %v4997_v17  ;;  %v256_v19 = vadd.f32 %v6924_v57, %v6937_v63 }
 0x147   :  { %7804 = vst [vmem:[#allocation47_spill] sm:$0xff] %v7057_v2  ;;  %v7062_v26 = vadd.f32 %v5542_v30, %v7031_v18  ;;  %v757_v21 = vpop.f32.mrf.mxu0 }
 0x148   :  { %v878_v14 = vpop.f32.mrf.mxu1  ;;  %v7064_v11 = vadd.f32 %v4997_v17, %v757_v21 }
 0x149   :  { %v7067_v34 = vadd.f32 %v7031_v18, %v878_v14  ;;  %v5525_v60 = vpop.f32.mrf.mxu0  ;;  %v377_v14 = vadd.f32 %v6929_v58, %v6939_v0 }
 0x14a   :  { %7805 = vst [vmem:[#allocation48_spill] sm:$0xff] %v7064_v11  ;;  %v5545_v12 = vpop.f32.mrf.mxu1  ;;  %v773_v63 = vadd.f32 %v5525_v60, %v4997_v17 }
 0x14b   :  { %7806 = vst [vmem:[#allocation49_spill] sm:$0xff] %v7067_v34  ;;  %v767_v10 = vpop.f32.mrf.mxu0 }
 0x14c   :  { %v888_v59 = vpop.f32.mrf.mxu1  ;;  %v7069_v20 = vadd.f32 %v4997_v17, %v767_v10  ;;  %v652_v10 = vadd.f32 %v5505_v9, %v6979_v24  ;;  %v498_v17 = vadd.f32 %v6974_v23, %v6993_v31 }
 0x14d   :  { %v7072_v2 = vadd.f32 %v7031_v18, %v888_v59 }
 0x14e   :  { %v997_v30 = vpop.f32.mrf.mxu0 }
 0x14f   :  { %v1067_v27 = vpop.f32.mrf.mxu1  ;;  %v1147_v6 = vadd.f32 %v997_v30, %v256_v19 }
 0x150   :  { %v5556_v21 = vpop.f32.mrf.mxu0  ;;  %v1154_v34 = vadd.f32 %v1067_v27, %v377_v14  ;;  %v7090_v14 = vld [vmem:[%s7769_s9] ss:$0 sm:$0xff] }
 0x151   :  { %v5567_v16 = vpop.f32.mrf.mxu1  ;;  %v5019_v15 = vmul.f32 -1.442695, %v1147_v6 }
 0x152   :  { %v5020_v1 = vmul.f32 -1.442695, %v1154_v34 }
 0x153   :  { %6119 = vpow2.f32 %v5019_v15 }
 0x157   :  { %v1234_v5 = vpop.f32.mrf.mxu1 }
 0x158   :  { %v1384_v11 = vadd.f32 %v1234_v5, %v652_v10  ;;  %v1143_v59 = vpop.f32.mrf.mxu0 }
 0x159   :  { %v5589_v4 = vpop.f32.mrf.mxu1 }
 0x15a   :  { %v5022_v3 = vmul.f32 -1.442695, %v1384_v11  ;;  %v5578_v57 = vpop.f32.mrf.mxu0 }
 0x15c   :  { %6121 = vpow2.f32 %v5022_v3  ;;  %v7082_v3 = vld [vmem:[%s7765_s5] ss:$0 sm:$0xff] }
 0x15d   :  { %6123 = vpow2.f32 %v5020_v1  ;;  %v1144_v11 = vadd.f32 %v7082_v3, %v1143_v59  ;;  %v894_v59 = vadd.f32 %v5545_v12, %v7031_v18  ;;  %v7807_v18 = vmov 0.0  }
 0x160   :  { %v6120_v19 = vpop.eup %6119  ;;  %v1304_v16 = vpop.f32.mrf.mxu0 }
 0x161   :  { %v1151_v6 = vadd.f32 1.0, %v6120_v19  ;;  %v1391_v30 = vadd.f32 %v1304_v16, %v773_v63 }
 0x162   :  { %v5600_v21 = vpop.f32.mrf.mxu0  ;;  %v1380_v58 = vpop.f32.mrf.mxu1 }
 0x163   :  { %6125 = vrcp.f32 %v1151_v6  ;;  %v5023_v0 = vmul.f32 -1.442695, %v1391_v30  ;;  %v1381_v57 = vadd.f32 %v7090_v14, %v1380_v58 }
 0x164   :  { %v5611_v15 = vpop.f32.mrf.mxu1 }
 0x165   :  { %6127 = vpow2.f32 %v5023_v0 }
 0x169   :  { %v6122_v24 = vpop.eup %6121 }
 0x16a   :  { %v6124_v5 = vpop.eup %6123  ;;  %v1388_v9 = vadd.f32 1.0, %v6122_v24 }
 0x16b   :  { %v1158_v4 = vadd.f32 1.0, %v6124_v5 }
 0x16c   :  { %6129 = vrcp.f32 %v1388_v9 }
 0x16d   :  { %6131 = vrcp.f32 %v1158_v4 }
 0x170   :  { %v6126_v1 = vpop.eup %6125 }
 0x171   :  { %v1161_v27 = vmul.f32 %v6126_v1, %v1144_v11 }
 0x172   :  { %v6128_v60 = vpop.eup %6127 }
 0x173   :  { %v1162_v34 = vadd.f32 %v1161_v27, %v498_v17  ;;  %v1395_v10 = vadd.f32 1.0, %v6128_v60 }
 0x175   :  { %6133 = vtanh.f32 %v1162_v34 }
 0x176   :  { %6135 = vrcp.f32 %v1395_v10 }
 0x179   :  { %v6130_v63 = vpop.eup %6129 }
 0x17a   :  { %v1398_v19 = vmul.f32 %v6130_v63, %v1381_v57  ;;  %v6132_v23 = vpop.eup %6131 }
 0x17b   :  { %v1164_v31 = vsub.f32 1.0, %v6132_v23  ;;  %v1166_v21 = vmul.f32 0.0, %v6132_v23 }
 0x17c   :  { %v1399_v16 = vadd.f32 %v1398_v19, %v894_v59 }
 0x17e   :  { %6137 = vtanh.f32 %v1399_v16 }
 0x182   :  { %v6134_v6 = vpop.eup %6133 }
 0x183   :  { %v1165_v30 = vmul.f32 %v6134_v6, %v1164_v31  ;;  %v6136_v15 = vpop.eup %6135 }
 0x184   :  { %v1401_v12 = vsub.f32 1.0, %v6136_v15  ;;  %v1403_v5 = vmul.f32 0.0, %v6136_v15 }
 0x185   :  { %v7094_v0 = vadd.f32 %v1166_v21, %v1165_v30 }
 0x187   :  { %5621 = vmatmul.mubr.msk.f32.vlgmr.msra.gmra.mxu0 %vm927_vm3, %v7094_v0  ;;  %5632 = vmatmul.mubr.msk.f32.vlgmr.msra.gmra.mxu1 %vm927_vm3, %v7094_v0 }
 0x188   :  { %5635 = vmatpush3.msra.mxu0 %v6821_v41  ;;  %5646 = vmatpush3.msra.mxu1 %v6823_v42 }
 0x189   :  { %5636 = vmatprep.subr.mxu0 %v7807_v18  ;;  %5647 = vmatprep.subr.mxu1 %v7807_v18 }
 0x18a   :  { %5637 = vmatpush3.msra.mxu0 %v6829_v43  ;;  %5648 = vmatpush3.msra.mxu1 %v6831_v44 }
 0x18b   :  { %v6138_v58 = vpop.eup %6137  ;;  %5638 = vmatprep.subr.mxu0 %v7807_v18  ;;  %5649 = vmatprep.subr.mxu1 %v7807_v18 }
 0x18c   :  { %5639 = vmatpush3.msra.mxu0 %v6837_v45  ;;  %5650 = vmatpush3.msra.mxu1 %v6839_v46  ;;  %v1402_v24 = vmul.f32 %v6138_v58, %v1401_v12 }
 0x18d   :  { %5640 = vmatprep.subr.mxu0 %v7807_v18  ;;  %5651 = vmatprep.subr.mxu1 %v7807_v18 }
 0x18e   :  { %5641 = vmatpush3.msra.mxu0 %v6845_v47  ;;  %5642 = vmatprep.mubr.msk.f32.mxu0 %vm6485_vm2, %v7807_v18  ;;  %v7115_v9 = vadd.f32 %v1403_v5, %v1402_v24 }
 0x18f   :  { %5652 = vmatpush3.msra.mxu1 %v6847_v48  ;;  %5653 = vmatprep.mubr.msk.f32.mxu1 %vm6485_vm2, %v7807_v18 }
 0x190   :  { %5643 = vmatmul.mubr.msk.f32.vlgmr.msra.gmra.mxu0 %vm927_vm3, %v7094_v0  ;;  %5654 = vmatmul.mubr.msk.f32.vlgmr.msra.gmra.mxu1 %vm927_vm3, %v7115_v9 }
 0x191   :  { %5656 = vmatprep.subr.mxu0 %v7807_v18  ;;  %5667 = vmatprep.subr.mxu1 %v7807_v18 }
 0x192   :  { %5657 = vmatpush3.msra.mxu0 %v6859_v49  ;;  %5668 = vmatpush3.msra.mxu1 %v6863_v50 }
 0x193   :  { %5658 = vmatprep.subr.mxu0 %v7807_v18  ;;  %5669 = vmatprep.subr.mxu1 %v7807_v18 }
 0x194   :  { %5659 = vmatpush3.msra.mxu0 %v6866_v51  ;;  %5670 = vmatpush3.msra.mxu1 %v6872_v52 }
 0x195   :  { %5660 = vmatprep.subr.mxu0 %v7807_v18  ;;  %5671 = vmatprep.subr.mxu1 %v7807_v18 }
 0x196   :  { %5661 = vmatpush3.msra.mxu0 %v6875_v53  ;;  %5672 = vmatpush3.msra.mxu1 %v6880_v54 }
 0x197   :  { %5662 = vmatprep.subr.mxu0 %v7807_v18  ;;  %5673 = vmatprep.subr.mxu1 %v7807_v18 }
 0x198   :  { %5663 = vmatpush3.msra.mxu0 %v6883_v55  ;;  %5664 = vmatprep.mubr.msk.f32.mxu0 %vm6485_vm2, %v7807_v18 }
 0x199   :  { %5674 = vmatpush3.msra.mxu1 %v6888_v56  ;;  %5675 = vmatprep.mubr.msk.f32.mxu1 %vm6485_vm2, %v7807_v18 }
 0x19a   :  { %5665 = vmatmul.mubr.msk.f32.vlgmr.msra.gmra.mxu0 %vm927_vm3, %v7115_v9  ;;  %5676 = vmatmul.mubr.msk.f32.vlgmr.msra.gmra.mxu1 %vm927_vm3, %v7115_v9 }
 0x19b   :  { %5678 = vmatprep.subr.mxu0 %v7807_v18  ;;  %5689 = vmatprep.subr.mxu1 %v7807_v18 }
 0x19c   :  { %5679 = vmatpush3.msra.mxu0 %v6757_v32  ;;  %5690 = vmatpush3.msra.mxu1 %v6759_v33 }
 0x19d   :  { %5680 = vmatprep.subr.mxu0 %v7807_v18  ;;  %5691 = vmatprep.subr.mxu1 %v7807_v18 }
 0x19e   :  { %5681 = vmatpush3.msra.mxu0 %v6773_v35  ;;  %5692 = vmatpush3.msra.mxu1 %v6775_v36 }
 0x19f   :  { %5682 = vmatprep.subr.mxu0 %v7807_v18  ;;  %5693 = vmatprep.subr.mxu1 %v7807_v18 }
 0x1a0   :  { %5683 = vmatpush3.msra.mxu0 %v6789_v37  ;;  %5694 = vmatpush3.msra.mxu1 %v6791_v38 }
 0x1a1   :  { %5684 = vmatprep.subr.mxu0 %v7807_v18  ;;  %5695 = vmatprep.subr.mxu1 %v7807_v18 }
 0x1a2   :  { %5685 = vmatpush3.msra.mxu0 %v6805_v39  ;;  %5696 = vmatpush3.msra.mxu1 %v6807_v40 }
 0x1a3   :  { %5686 = vmatprep.mubr.msk.f32.mxu0 %vm6485_vm2, %v7807_v18  ;;  %5697 = vmatprep.mubr.msk.f32.mxu1 %vm6485_vm2, %v7807_v18 }
 0x1a4   :  { %5700 = vmatprep.subr.mxu0 %v7807_v18  ;;  %5711 = vmatprep.subr.mxu1 %v7807_v18 }
 0x247   :  { %v1474_v4 = vpop.f32.mrf.mxu0  ;;  %v1544_v11 = vpop.f32.mrf.mxu1 }
 0x248   :  { %v1618_v1 = vadd.f32 %v1474_v4, %v6932_v61  ;;  %v1625_v34 = vadd.f32 %v1544_v11, %v6935_v62 }
 0x249   :  { %v5622_v17 = vpop.f32.mrf.mxu0  ;;  %v5633_v27 = vpop.f32.mrf.mxu1 }
 0x24a   :  { %v5027_v60 = vmul.f32 -1.442695, %v1618_v1  ;;  %v5028_v59 = vmul.f32 -1.442695, %v1625_v34 }
 0x24c   :  { %6139 = vpow2.f32 %v5027_v60 }
 0x250   :  { %v1614_v10 = vpop.f32.mrf.mxu0  ;;  %v1708_v57 = vpop.f32.mrf.mxu1 }
 0x251   :  { %v1852_v63 = vadd.f32 %v1708_v57, %v7037_v28  ;;  %v1615_v4 = vadd.f32 %v7082_v3, %v1614_v10 }
 0x252   :  { %v5644_v19 = vpop.f32.mrf.mxu0  ;;  %v5655_v16 = vpop.f32.mrf.mxu1 }
 0x253   :  { %v5032_v23 = vmul.f32 -1.442695, %v1852_v63 }
 0x255   :  { %6141 = vpow2.f32 %v5032_v23 }
 0x256   :  { %6143 = vpow2.f32 %v5028_v59 }
 0x259   :  { %v6140_v31 = vpop.eup %6139 }
 0x25a   :  { %v1622_v6 = vadd.f32 1.0, %v6140_v31  ;;  %v1778_v30 = vpop.f32.mrf.mxu0  ;;  %v1848_v61 = vpop.f32.mrf.mxu1 }
 0x25b   :  { %v1859_v21 = vadd.f32 %v1778_v30, %v7069_v20  ;;  %v1849_v60 = vadd.f32 %v7090_v14, %v1848_v61 }
 0x25c   :  { %6145 = vrcp.f32 %v1622_v6  ;;  %v5666_v15 = vpop.f32.mrf.mxu0  ;;  %v5677_v12 = vpop.f32.mrf.mxu1 }
 0x25d   :  { %v5033_v62 = vmul.f32 -1.442695, %v1859_v21 }
 0x25f   :  { %6147 = vpow2.f32 %v5033_v62 }
 0x262   :  { %v6142_v58 = vpop.eup %6141 }
 0x263   :  { %v6144_v24 = vpop.eup %6143  ;;  %v1856_v28 = vadd.f32 1.0, %v6142_v58 }
 0x264   :  { %v1629_v5 = vadd.f32 1.0, %v6144_v24 }
 0x265   :  { %6149 = vrcp.f32 %v1856_v28 }
 0x266   :  { %6151 = vrcp.f32 %v1629_v5 }
 0x269   :  { %v6146_v11 = vpop.eup %6145 }
 0x26a   :  { %v1632_v1 = vmul.f32 %v6146_v11, %v1615_v4 }
 0x26c   :  { %v6148_v17 = vpop.eup %6147  ;;  %v1633_v27 = vadd.f32 %v1632_v1, %v6988_v29 }
 0x26d   :  { %v1863_v20 = vadd.f32 1.0, %v6148_v17 }
 0x26e   :  { %6153 = vtanh.f32 %v1633_v27 }
 0x26f   :  { %6155 = vrcp.f32 %v1863_v20 }
 0x272   :  { %v6150_v34 = vpop.eup %6149 }
 0x273   :  { %v1866_v57 = vmul.f32 %v6150_v34, %v1849_v60  ;;  %v6152_v59 = vpop.eup %6151 }
 0x274   :  { %v1635_v19 = vsub.f32 1.0, %v6152_v59  ;;  %v1637_v23 = vmul.f32 %v6152_v59, %v7094_v0 }
 0x275   :  { %v1867_v63 = vadd.f32 %v1866_v57, %v7072_v2 }
 0x277   :  { %6157 = vtanh.f32 %v1867_v63 }
 0x27b   :  { %v6154_v16 = vpop.eup %6153 }
 0x27c   :  { %v1636_v10 = vmul.f32 %v6154_v16, %v1635_v19  ;;  %v6156_v6 = vpop.eup %6155 }
 0x27d   :  { %v1869_v29 = vsub.f32 1.0, %v6156_v6  ;;  %v1871_v30 = vmul.f32 %v6156_v6, %v7115_v9 }
 0x27e   :  { %v7179_v31 = vadd.f32 %v1637_v23, %v1636_v10 }
 0x280   :  { %5687 = vmatmul.mubr.msk.f32.vlgmr.msra.gmra.mxu0 %vm927_vm3, %v7179_v31  ;;  %5698 = vmatmul.mubr.msk.f32.vlgmr.msra.gmra.mxu1 %vm927_vm3, %v7179_v31 }
 0x281   :  { %5701 = vmatpush3.msra.mxu0 %v6821_v41  ;;  %5712 = vmatpush3.msra.mxu1 %v6823_v42 }
 0x282   :  { %5702 = vmatprep.subr.mxu0 %v7807_v18  ;;  %5713 = vmatprep.subr.mxu1 %v7807_v18 }
 0x283   :  { %5703 = vmatpush3.msra.mxu0 %v6829_v43  ;;  %5714 = vmatpush3.msra.mxu1 %v6831_v44 }
 0x284   :  { %v6158_v2 = vpop.eup %6157  ;;  %5704 = vmatprep.subr.mxu0 %v7807_v18  ;;  %5715 = vmatprep.subr.mxu1 %v7807_v18 }
 0x285   :  { %5705 = vmatpush3.msra.mxu0 %v6837_v45  ;;  %5716 = vmatpush3.msra.mxu1 %v6839_v46  ;;  %v1870_v0 = vmul.f32 %v6158_v2, %v1869_v29 }
 0x286   :  { %5706 = vmatprep.subr.mxu0 %v7807_v18  ;;  %5717 = vmatprep.subr.mxu1 %v7807_v18 }
 0x287   :  { %5707 = vmatpush3.msra.mxu0 %v6845_v47  ;;  %5708 = vmatprep.mubr.msk.f32.mxu0 %vm6485_vm2, %v7807_v18  ;;  %v7201_v61 = vadd.f32 %v1871_v30, %v1870_v0 }
 0x288   :  { %5718 = vmatpush3.msra.mxu1 %v6847_v48  ;;  %5719 = vmatprep.mubr.msk.f32.mxu1 %vm6485_vm2, %v7807_v18 }
 0x289   :  { %5709 = vmatmul.mubr.msk.f32.vlgmr.msra.gmra.mxu0 %vm927_vm3, %v7179_v31  ;;  %5720 = vmatmul.mubr.msk.f32.vlgmr.msra.gmra.mxu1 %vm927_vm3, %v7201_v61 }
 0x28a   :  { %5722 = vmatprep.subr.mxu0 %v7807_v18  ;;  %5733 = vmatprep.subr.mxu1 %v7807_v18 }
 0x28b   :  { %5723 = vmatpush3.msra.mxu0 %v6859_v49  ;;  %5734 = vmatpush3.msra.mxu1 %v6863_v50 }
 0x28c   :  { %5724 = vmatprep.subr.mxu0 %v7807_v18  ;;  %5735 = vmatprep.subr.mxu1 %v7807_v18 }
 0x28d   :  { %5725 = vmatpush3.msra.mxu0 %v6866_v51  ;;  %5736 = vmatpush3.msra.mxu1 %v6872_v52 }
 0x28e   :  { %5726 = vmatprep.subr.mxu0 %v7807_v18  ;;  %5737 = vmatprep.subr.mxu1 %v7807_v18 }
 0x28f   :  { %5727 = vmatpush3.msra.mxu0 %v6875_v53  ;;  %5738 = vmatpush3.msra.mxu1 %v6880_v54 }
 0x290   :  { %5728 = vmatprep.subr.mxu0 %v7807_v18  ;;  %5739 = vmatprep.subr.mxu1 %v7807_v18 }
 0x291   :  { %5729 = vmatpush3.msra.mxu0 %v6883_v55  ;;  %5730 = vmatprep.mubr.msk.f32.mxu0 %vm6485_vm2, %v7807_v18 }
 0x292   :  { %5740 = vmatpush3.msra.mxu1 %v6888_v56  ;;  %5741 = vmatprep.mubr.msk.f32.mxu1 %vm6485_vm2, %v7807_v18 }
 0x293   :  { %5731 = vmatmul.mubr.msk.f32.vlgmr.msra.gmra.mxu0 %vm927_vm3, %v7201_v61  ;;  %5742 = vmatmul.mubr.msk.f32.vlgmr.msra.gmra.mxu1 %vm927_vm3, %v7201_v61 }
 0x294   :  { %5744 = vmatprep.subr.mxu0 %v7807_v18  ;;  %5755 = vmatprep.subr.mxu1 %v7807_v18 }
 0x295   :  { %5745 = vmatpush3.msra.mxu0 %v6757_v32  ;;  %5756 = vmatpush3.msra.mxu1 %v6759_v33 }
 0x296   :  { %5746 = vmatprep.subr.mxu0 %v7807_v18  ;;  %5757 = vmatprep.subr.mxu1 %v7807_v18 }
 0x297   :  { %5747 = vmatpush3.msra.mxu0 %v6773_v35  ;;  %5758 = vmatpush3.msra.mxu1 %v6775_v36 }
 0x298   :  { %5748 = vmatprep.subr.mxu0 %v7807_v18  ;;  %5759 = vmatprep.subr.mxu1 %v7807_v18 }
 0x299   :  { %5749 = vmatpush3.msra.mxu0 %v6789_v37  ;;  %5760 = vmatpush3.msra.mxu1 %v6791_v38 }
 0x29a   :  { %5750 = vmatprep.subr.mxu0 %v7807_v18  ;;  %5761 = vmatprep.subr.mxu1 %v7807_v18 }
 0x29b   :  { %5751 = vmatpush3.msra.mxu0 %v6805_v39  ;;  %5762 = vmatpush3.msra.mxu1 %v6807_v40 }
 0x29c   :  { %5752 = vmatprep.mubr.msk.f32.mxu0 %vm6485_vm2, %v7807_v18  ;;  %5763 = vmatprep.mubr.msk.f32.mxu1 %vm6485_vm2, %v7807_v18 }
 0x29d   :  { %5766 = vmatprep.subr.mxu0 %v7807_v18  ;;  %5777 = vmatprep.subr.mxu1 %v7807_v18 }
 0x340   :  { %v1942_v32 = vpop.f32.mrf.mxu0  ;;  %v2012_v33 = vpop.f32.mrf.mxu1 }
 0x341   :  { %v2086_v35 = vadd.f32 %v1942_v32, %v6948_v7  ;;  %v2093_v39 = vadd.f32 %v2012_v33, %v6951_v8 }
 0x342   :  { %v5688_v36 = vpop.f32.mrf.mxu0  ;;  %v5699_v37 = vpop.f32.mrf.mxu1 }
 0x343   :  { %v5037_v38 = vmul.f32 -1.442695, %v2086_v35  ;;  %v5038_v15 = vmul.f32 -1.442695, %v2093_v39  ;;  %v7809_v35 = vld [vmem:[#allocation21_spill] sm:$0xff] }
 0x344   :  { %v7810_v39 = vld [vmem:[#allocation37_spill] sm:$0xff] }
 0x345   :  { %6159 = vpow2.f32 %v5037_v38 }
 0x349   :  { %v2082_v40 = vpop.f32.mrf.mxu0  ;;  %v2176_v9 = vpop.f32.mrf.mxu1 }
 0x34a   :  { %v2320_v21 = vadd.f32 %v2176_v9, %v7014_v22  ;;  %v2083_v60 = vadd.f32 %v7082_v3, %v2082_v40 }
 0x34b   :  { %v5710_v12 = vpop.f32.mrf.mxu0  ;;  %v5721_v62 = vpop.f32.mrf.mxu1 }
 0x34c   :  { %v5042_v58 = vmul.f32 -1.442695, %v2320_v21 }
 0x34e   :  { %6161 = vpow2.f32 %v5042_v58 }
 0x34f   :  { %6163 = vpow2.f32 %v5038_v15 }
 0x352   :  { %v6160_v24 = vpop.eup %6159 }
 0x353   :  { %v2090_v28 = vadd.f32 1.0, %v6160_v24  ;;  %v2246_v5 = vpop.f32.mrf.mxu0  ;;  %v2316_v7 = vpop.f32.mrf.mxu1 }
 0x354   :  { %v2327_v4 = vadd.f32 %v2246_v5, %v7059_v25  ;;  %v2317_v19 = vadd.f32 %v7090_v14, %v2316_v7  ;;  %v7811_v5 = vld [vmem:[#allocation48_spill] sm:$0xff] }
 0x355   :  { %6165 = vrcp.f32 %v2090_v28  ;;  %v5732_v11 = vpop.f32.mrf.mxu0  ;;  %v5743_v1 = vpop.f32.mrf.mxu1 }
 0x356   :  { %v5043_v8 = vmul.f32 -1.442695, %v2327_v4 }
 0x358   :  { %6167 = vpow2.f32 %v5043_v8 }
 0x35b   :  { %v6162_v17 = vpop.eup %6161 }
 0x35c   :  { %v6164_v27 = vpop.eup %6163  ;;  %v2324_v22 = vadd.f32 1.0, %v6162_v17 }
 0x35d   :  { %v2097_v20 = vadd.f32 1.0, %v6164_v27 }
 0x35e   :  { %6169 = vrcp.f32 %v2324_v22 }
 0x35f   :  { %6171 = vrcp.f32 %v2097_v20 }
 0x362   :  { %v6166_v34 = vpop.eup %6165 }
 0x363   :  { %v2100_v57 = vmul.f32 %v6166_v34, %v2083_v60 }
 0x365   :  { %v6168_v63 = vpop.eup %6167  ;;  %v2101_v59 = vadd.f32 %v2100_v57, %v7005_v13 }
 0x366   :  { %v2331_v25 = vadd.f32 1.0, %v6168_v63  ;;  %v7812_v63 = vld [vmem:[#allocation32_spill] sm:$0xff] }
 0x367   :  { %6173 = vtanh.f32 %v2101_v59 }
 0x368   :  { %6175 = vrcp.f32 %v2331_v25 }
 0x36b   :  { %v6170_v16 = vpop.eup %6169 }
 0x36c   :  { %v2334_v10 = vmul.f32 %v6170_v16, %v2317_v19  ;;  %v6172_v6 = vpop.eup %6171 }
 0x36d   :  { %v2103_v29 = vsub.f32 1.0, %v6172_v6  ;;  %v2105_v30 = vmul.f32 %v6172_v6, %v7179_v31 }
 0x36e   :  { %v2335_v23 = vadd.f32 %v2334_v10, %v7062_v26 }
 0x370   :  { %6177 = vtanh.f32 %v2335_v23  ;;  %v7813_v23 = vld [vmem:[#allocation49_spill] sm:$0xff] }
 0x374   :  { %v6174_v2 = vpop.eup %6173 }
 0x375   :  { %v2104_v0 = vmul.f32 %v6174_v2, %v2103_v29  ;;  %v6176_v33 = vpop.eup %6175 }
 0x376   :  { %v2337_v13 = vsub.f32 1.0, %v6176_v33 }
 0x377   :  { %v7265_v32 = vadd.f32 %v2105_v30, %v2104_v0 }
 0x379   :  { %5753 = vmatmul.mubr.msk.f32.vlgmr.msra.gmra.mxu0 %vm927_vm3, %v7265_v32  ;;  %5764 = vmatmul.mubr.msk.f32.vlgmr.msra.gmra.mxu1 %vm927_vm3, %v7265_v32 }
 0x37a   :  { %5767 = vmatpush3.msra.mxu0 %v6821_v41  ;;  %5778 = vmatpush3.msra.mxu1 %v6823_v42  ;;  %v2339_v42 = vmul.f32 %v6176_v33, %v7201_v61 }
 0x37b   :  { %5768 = vmatprep.subr.mxu0 %v7807_v18  ;;  %5779 = vmatprep.subr.mxu1 %v7807_v18 }
 0x37c   :  { %5769 = vmatpush3.msra.mxu0 %v6829_v43  ;;  %5780 = vmatpush3.msra.mxu1 %v6831_v44  ;;  %v7322_v44 = vld [vmem:[#allocation5 + $0x18] sm:$0xff] }
 0x37d   :  { %v6178_v26 = vpop.eup %6177  ;;  %5770 = vmatprep.subr.mxu0 %v7807_v18  ;;  %5781 = vmatprep.subr.mxu1 %v7807_v18 }
 0x37e   :  { %5771 = vmatpush3.msra.mxu0 %v6837_v45  ;;  %5782 = vmatpush3.msra.mxu1 %v6839_v46  ;;  %v2338_v41 = vmul.f32 %v6178_v26, %v2337_v13  ;;  %v7325_v45 = vld [vmem:[#allocation5 + $0x38] sm:$0xff]  ;;  %v7330_v46 = vld [vmem:[#allocation5 + $0x10] sm:$0xff] }
 0x37f   :  { %5772 = vmatprep.subr.mxu0 %v7807_v18  ;;  %5783 = vmatprep.subr.mxu1 %v7807_v18 }
 0x380   :  { %5773 = vmatpush3.msra.mxu0 %v6845_v47  ;;  %5774 = vmatprep.mubr.msk.f32.mxu0 %vm6485_vm2, %v7807_v18  ;;  %v7287_v43 = vadd.f32 %v2339_v42, %v2338_v41  ;;  %v7333_v47 = vld [vmem:[#allocation5 + $0x30] sm:$0xff]  ;;  %v7373_v41 = vld [vmem:[#allocation5 + $0x58] sm:$0xff] }
 0x381   :  { %5784 = vmatpush3.msra.mxu1 %v6847_v48  ;;  %5785 = vmatprep.mubr.msk.f32.mxu1 %vm6485_vm2, %v7807_v18  ;;  %v7338_v48 = vld [vmem:[#allocation5 + $0x8] sm:$0xff]  ;;  %v7376_v42 = vld [vmem:[#allocation8 + $0x18] sm:$0xff] }
 0x382   :  { %5775 = vmatmul.mubr.msk.f32.vlgmr.msra.gmra.mxu0 %vm927_vm3, %v7265_v32  ;;  %5786 = vmatmul.mubr.msk.f32.vlgmr.msra.gmra.mxu1 %vm927_vm3, %v7287_v43 }
 0x383   :  { %5788 = vmatprep.subr.mxu0 %v7807_v18  ;;  %5799 = vmatprep.subr.mxu1 %v7807_v18 }
 0x384   :  { %5789 = vmatpush3.msra.mxu0 %v6859_v49  ;;  %5800 = vmatpush3.msra.mxu1 %v6863_v50  ;;  %v7341_v49 = vld [vmem:[#allocation5 + $0x28] sm:$0xff]  ;;  %v7346_v50 = vld [vmem:[#allocation5] sm:$0xff] }
 0x385   :  { %5790 = vmatprep.subr.mxu0 %v7807_v18  ;;  %5801 = vmatprep.subr.mxu1 %v7807_v18 }
 0x386   :  { %5791 = vmatpush3.msra.mxu0 %v6866_v51  ;;  %5802 = vmatpush3.msra.mxu1 %v6872_v52  ;;  %v7349_v51 = vld [vmem:[#allocation5 + $0x20] sm:$0xff] }
 0x387   :  { %5792 = vmatprep.subr.mxu0 %v7807_v18  ;;  %5803 = vmatprep.subr.mxu1 %v7807_v18 }
 0x388   :  { %5793 = vmatpush3.msra.mxu0 %v6875_v53  ;;  %5804 = vmatpush3.msra.mxu1 %v6880_v54  ;;  %v7808_v54 = vld [vmem:[#allocation20_spill] sm:$0xff] }
 0x389   :  { %5794 = vmatprep.subr.mxu0 %v7807_v18  ;;  %5805 = vmatprep.subr.mxu1 %v7807_v18 }
 0x38a   :  { %5795 = vmatpush3.msra.mxu0 %v6883_v55  ;;  %5796 = vmatprep.mubr.msk.f32.mxu0 %vm6485_vm2, %v7807_v18 }
 0x38b   :  { %5806 = vmatpush3.msra.mxu1 %v6888_v56  ;;  %5807 = vmatprep.mubr.msk.f32.mxu1 %vm6485_vm2, %v7807_v18 }
 0x38c   :  { %5797 = vmatmul.mubr.msk.f32.vlgmr.msra.gmra.mxu0 %vm927_vm3, %v7287_v43  ;;  %5808 = vmatmul.mubr.msk.f32.vlgmr.msra.gmra.mxu1 %vm927_vm3, %v7287_v43 }
 0x38d   :  { %5810 = vmatprep.subr.mxu0 %v7807_v18  ;;  %5821 = vmatprep.subr.mxu1 %v7807_v18 }
 0x38e   :  { %5811 = vmatpush3.msra.mxu0 %v7322_v44  ;;  %5822 = vmatpush3.msra.mxu1 %v7325_v45 }
 0x38f   :  { %5812 = vmatprep.subr.mxu0 %v7807_v18  ;;  %5823 = vmatprep.subr.mxu1 %v7807_v18 }
 0x390   :  { %5813 = vmatpush3.msra.mxu0 %v7330_v46  ;;  %5824 = vmatpush3.msra.mxu1 %v7333_v47 }
 0x391   :  { %5814 = vmatprep.subr.mxu0 %v7807_v18  ;;  %5825 = vmatprep.subr.mxu1 %v7807_v18 }
 0x392   :  { %5815 = vmatpush3.msra.mxu0 %v7338_v48  ;;  %5826 = vmatpush3.msra.mxu1 %v7341_v49 }
 0x393   :  { %5816 = vmatprep.subr.mxu0 %v7807_v18  ;;  %5827 = vmatprep.subr.mxu1 %v7807_v18 }
 0x394   :  { %5817 = vmatpush3.msra.mxu0 %v7346_v50  ;;  %5828 = vmatpush3.msra.mxu1 %v7349_v51 }
 0x395   :  { %5818 = vmatprep.mubr.msk.f32.mxu0 %vm6485_vm2, %v7807_v18  ;;  %5829 = vmatprep.mubr.msk.f32.mxu1 %vm6485_vm2, %v7807_v18 }
 0x396   :  { %5832 = vmatprep.subr.mxu0 %v7807_v18  ;;  %5843 = vmatprep.subr.mxu1 %v7807_v18 }
 0x439   :  { %v2410_v52 = vpop.f32.mrf.mxu0  ;;  %v2480_v53 = vpop.f32.mrf.mxu1 }
 0x43a   :  { %v2554_v55 = vadd.f32 %v2410_v52, %v7808_v54  ;;  %v2561_v36 = vadd.f32 %v2480_v53, %v7809_v35  ;;  %v7384_v52 = vld [vmem:[#allocation8 + $0x10] sm:$0xff]  ;;  %v7398_v35 = vld [vmem:[#allocation5 + $0x40] sm:$0xff] }
 0x43b   :  { %v5754_v56 = vpop.f32.mrf.mxu0  ;;  %v5765_v31 = vpop.f32.mrf.mxu1 }
 0x43c   :  { %v5047_v61 = vmul.f32 -1.442695, %v2554_v55  ;;  %v5048_v9 = vmul.f32 -1.442695, %v2561_v36  ;;  %v7389_v55 = vld [vmem:[#allocation5 + $0x48] sm:$0xff] }
 0x43d   :  { %v7392_v56 = vld [vmem:[#allocation8 + $0x8] sm:$0xff] }
 0x43e   :  { %6179 = vpow2.f32 %v5047_v61 }
 0x442   :  { %v2550_v37 = vpop.f32.mrf.mxu0  ;;  %v2644_v38 = vpop.f32.mrf.mxu1 }
 0x443   :  { %v2788_v40 = vadd.f32 %v2644_v38, %v7810_v39  ;;  %v2551_v20 = vadd.f32 %v7082_v3, %v2550_v37  ;;  %v7405_v37 = vld [vmem:[#allocation8] sm:$0xff]  ;;  %v7419_v38 = vld [vmem:[#allocation8 + $0x58] sm:$0xff]  ;;  %v7424_v39 = vld [vmem:[#allocation8 + $0x30] sm:$0xff] }
 0x444   :  { %v5776_v21 = vpop.f32.mrf.mxu0  ;;  %v5787_v15 = vpop.f32.mrf.mxu1 }
 0x445   :  { %v5052_v12 = vmul.f32 -1.442695, %v2788_v40  ;;  %v7427_v40 = vld [vmem:[#allocation8 + $0x50] sm:$0xff]  ;;  %v7435_v21 = vld [vmem:[#allocation8 + $0x48] sm:$0xff]  ;;  %v7440_v15 = vld [vmem:[#allocation8 + $0x20] sm:$0xff] }
 0x447   :  { %6181 = vpow2.f32 %v5052_v12  ;;  %v7445_v12 = vld [vmem:[#allocation8 + $0x40] sm:$0xff] }
 0x448   :  { %6183 = vpow2.f32 %v5048_v9  ;;  %v7432_v9 = vld [vmem:[#allocation8 + $0x28] sm:$0xff] }
 0x44b   :  { %v6180_v62 = vpop.eup %6179 }
 0x44c   :  { %v2558_v58 = vadd.f32 1.0, %v6180_v62  ;;  %v2714_v24 = vpop.f32.mrf.mxu0  ;;  %v2784_v28 = vpop.f32.mrf.mxu1 }
 0x44d   :  { %v2795_v7 = vadd.f32 %v2714_v24, %v7811_v5  ;;  %v2785_v19 = vadd.f32 %v7090_v14, %v2784_v28  ;;  %v7814_v24 = vld [vmem:[#allocation24_spill] sm:$0xff] }
 0x44e   :  { %6185 = vrcp.f32 %v2558_v58  ;;  %v5798_v4 = vpop.f32.mrf.mxu0  ;;  %v5809_v11 = vpop.f32.mrf.mxu1 }
 0x44f   :  { %v5053_v1 = vmul.f32 -1.442695, %v2795_v7  ;;  %v7815_v11 = vld [vmem:[#allocation25_spill] sm:$0xff] }
 0x451   :  { %6187 = vpow2.f32 %v5053_v1 }
 0x454   :  { %v6182_v8 = vpop.eup %6181 }
 0x455   :  { %v6184_v17 = vpop.eup %6183  ;;  %v2792_v27 = vadd.f32 1.0, %v6182_v8 }
 0x456   :  { %v2565_v22 = vadd.f32 1.0, %v6184_v17 }
 0x457   :  { %6189 = vrcp.f32 %v2792_v27  ;;  %v7816_v27 = vld [vmem:[#allocation33_spill] sm:$0xff] }
 0x458   :  { %6191 = vrcp.f32 %v2565_v22 }
 0x45b   :  { %v6186_v60 = vpop.eup %6185 }
 0x45c   :  { %v2568_v34 = vmul.f32 %v6186_v60, %v2551_v20 }
 0x45e   :  { %v6188_v57 = vpop.eup %6187  ;;  %v2569_v59 = vadd.f32 %v2568_v34, %v7812_v63 }
 0x45f   :  { %v2799_v25 = vadd.f32 1.0, %v6188_v57 }
 0x460   :  { %6193 = vtanh.f32 %v2569_v59 }
 0x461   :  { %6195 = vrcp.f32 %v2799_v25 }
 0x464   :  { %v6190_v16 = vpop.eup %6189 }
 0x465   :  { %v2802_v10 = vmul.f32 %v6190_v16, %v2785_v19  ;;  %v6192_v29 = vpop.eup %6191  ;;  %v7817_v16 = vld [vmem:[#allocation44_spill] sm:$0xff] }
 0x466   :  { %v2571_v2 = vsub.f32 1.0, %v6192_v29  ;;  %v2573_v33 = vmul.f32 %v6192_v29, %v7265_v32  ;;  %v7381_v32 = vld [vmem:[#allocation5 + $0x50] sm:$0xff] }
 0x467   :  { %v2803_v6 = vadd.f32 %v2802_v10, %v7813_v23 }
 0x469   :  { %6197 = vtanh.f32 %v2803_v6 }
 0x46d   :  { %v6194_v0 = vpop.eup %6193 }
 0x46e   :  { %v2572_v30 = vmul.f32 %v6194_v0, %v2571_v2  ;;  %v6196_v26 = vpop.eup %6195 }
 0x46f   :  { %v2805_v53 = vsub.f32 1.0, %v6196_v26  ;;  %v2807_v61 = vmul.f32 %v6196_v26, %v7287_v43  ;;  %v7416_v43 = vld [vmem:[#allocation8 + $0x38] sm:$0xff] }
 0x470   :  { %v7367_v13 = vadd.f32 %v2573_v33, %v2572_v30 }
 0x472   :  { %5819 = vmatmul.mubr.msk.f32.vlgmr.msra.gmra.mxu0 %vm927_vm3, %v7367_v13  ;;  %5830 = vmatmul.mubr.msk.f32.vlgmr.msra.gmra.mxu1 %vm927_vm3, %v7367_v13 }
 0x473   :  { %5833 = vmatpush3.msra.mxu0 %v7373_v41  ;;  %5844 = vmatpush3.msra.mxu1 %v7376_v42 }
 0x474   :  { %5834 = vmatprep.subr.mxu0 %v7807_v18  ;;  %5845 = vmatprep.subr.mxu1 %v7807_v18 }
 0x475   :  { %5835 = vmatpush3.msra.mxu0 %v7381_v32  ;;  %5846 = vmatpush3.msra.mxu1 %v7384_v52 }
 0x476   :  { %v6198_v54 = vpop.eup %6197  ;;  %5836 = vmatprep.subr.mxu0 %v7807_v18  ;;  %5847 = vmatprep.subr.mxu1 %v7807_v18 }
 0x477   :  { %5837 = vmatpush3.msra.mxu0 %v7389_v55  ;;  %5848 = vmatpush3.msra.mxu1 %v7392_v56  ;;  %v2806_v31 = vmul.f32 %v6198_v54, %v2805_v53 }
 0x478   :  { %5838 = vmatprep.subr.mxu0 %v7807_v18  ;;  %5849 = vmatprep.subr.mxu1 %v7807_v18 }
 0x479   :  { %5839 = vmatpush3.msra.mxu0 %v7398_v35  ;;  %5840 = vmatprep.mubr.msk.f32.mxu0 %vm6485_vm2, %v7807_v18  ;;  %v7403_v36 = vadd.f32 %v2807_v61, %v2806_v31  ;;  %v7818_v61 = vld [vmem:[#allocation36_spill] sm:$0xff] }
 0x47a   :  { %5850 = vmatpush3.msra.mxu1 %v7405_v37  ;;  %5851 = vmatprep.mubr.msk.f32.mxu1 %vm6485_vm2, %v7807_v18 }
 0x47b   :  { %5841 = vmatmul.mubr.msk.f32.vlgmr.msra.gmra.mxu0 %vm927_vm3, %v7367_v13  ;;  %5852 = vmatmul.mubr.msk.f32.vlgmr.msra.gmra.mxu1 %vm927_vm3, %v7403_v36 }
 0x47c   :  { %5854 = vmatprep.subr.mxu0 %v7807_v18  ;;  %5865 = vmatprep.subr.mxu1 %v7807_v18 }
 0x47d   :  { %5855 = vmatpush3.msra.mxu0 %v7416_v43  ;;  %5866 = vmatpush3.msra.mxu1 %v7419_v38 }
 0x47e   :  { %5856 = vmatprep.subr.mxu0 %v7807_v18  ;;  %5867 = vmatprep.subr.mxu1 %v7807_v18 }
 0x47f   :  { %5857 = vmatpush3.msra.mxu0 %v7424_v39  ;;  %5868 = vmatpush3.msra.mxu1 %v7427_v40 }
 0x480   :  { %5858 = vmatprep.subr.mxu0 %v7807_v18  ;;  %5869 = vmatprep.subr.mxu1 %v7807_v18 }
 0x481   :  { %5859 = vmatpush3.msra.mxu0 %v7432_v9  ;;  %5870 = vmatpush3.msra.mxu1 %v7435_v21 }
 0x482   :  { %5860 = vmatprep.subr.mxu0 %v7807_v18  ;;  %5871 = vmatprep.subr.mxu1 %v7807_v18 }
 0x483   :  { %5861 = vmatpush3.msra.mxu0 %v7440_v15  ;;  %5862 = vmatprep.mubr.msk.f32.mxu0 %vm6485_vm2, %v7807_v18 }
 0x484   :  { %5872 = vmatpush3.msra.mxu1 %v7445_v12  ;;  %5873 = vmatprep.mubr.msk.f32.mxu1 %vm6485_vm2, %v7807_v18 }
 0x485   :  { %5863 = vmatmul.mubr.msk.f32.vlgmr.msra.gmra.mxu0 %vm927_vm3, %v7403_v36  ;;  %5874 = vmatmul.mubr.msk.f32.vlgmr.msra.gmra.mxu1 %vm927_vm3, %v7403_v36 }
 0x486   :  { %5876 = vmatprep.subr.mxu0 %v7807_v18  ;;  %5887 = vmatprep.subr.mxu1 %v7807_v18 }
 0x487   :  { %5877 = vmatpush3.msra.mxu0 %v7322_v44  ;;  %5888 = vmatpush3.msra.mxu1 %v7325_v45 }
 0x488   :  { %5878 = vmatprep.subr.mxu0 %v7807_v18  ;;  %5889 = vmatprep.subr.mxu1 %v7807_v18 }
 0x489   :  { %5879 = vmatpush3.msra.mxu0 %v7330_v46  ;;  %5890 = vmatpush3.msra.mxu1 %v7333_v47 }
 0x48a   :  { %5880 = vmatprep.subr.mxu0 %v7807_v18  ;;  %5891 = vmatprep.subr.mxu1 %v7807_v18 }
 0x48b   :  { %5881 = vmatpush3.msra.mxu0 %v7338_v48  ;;  %5892 = vmatpush3.msra.mxu1 %v7341_v49 }
 0x48c   :  { %5882 = vmatprep.subr.mxu0 %v7807_v18  ;;  %5893 = vmatprep.subr.mxu1 %v7807_v18 }
 0x48d   :  { %5883 = vmatpush3.msra.mxu0 %v7346_v50  ;;  %5894 = vmatpush3.msra.mxu1 %v7349_v51 }
 0x48e   :  { %5884 = vmatprep.mubr.msk.f32.mxu0 %vm6485_vm2, %v7807_v18  ;;  %5895 = vmatprep.mubr.msk.f32.mxu1 %vm6485_vm2, %v7807_v18 }
 0x48f   :  { %5898 = vmatprep.subr.mxu0 %v7807_v18  ;;  %5909 = vmatprep.subr.mxu1 %v7807_v18 }
 0x532   :  { %v2878_v62 = vpop.f32.mrf.mxu0  ;;  %v2948_v58 = vpop.f32.mrf.mxu1 }
 0x533   :  { %v3022_v28 = vadd.f32 %v2878_v62, %v7814_v24  ;;  %v3029_v1 = vadd.f32 %v2948_v58, %v7815_v11 }
 0x534   :  { %v5820_v5 = vpop.f32.mrf.mxu0  ;;  %v5831_v7 = vpop.f32.mrf.mxu1 }
 0x535   :  { %v5057_v4 = vmul.f32 -1.442695, %v3022_v28  ;;  %v5058_v20 = vmul.f32 -1.442695, %v3029_v1  ;;  %v7819_v7 = vld [vmem:[#allocation45_spill] sm:$0xff] }
 0x537   :  { %6199 = vpow2.f32 %v5057_v4 }
 0x53b   :  { %v3018_v8 = vpop.f32.mrf.mxu0  ;;  %v3112_v17 = vpop.f32.mrf.mxu1 }
 0x53c   :  { %v3256_v22 = vadd.f32 %v3112_v17, %v7816_v27  ;;  %v3019_v26 = vadd.f32 %v7082_v3, %v3018_v8 }
 0x53d   :  { %v5842_v60 = vpop.f32.mrf.mxu0  ;;  %v5853_v34 = vpop.f32.mrf.mxu1 }
 0x53e   :  { %v5062_v57 = vmul.f32 -1.442695, %v3256_v22 }
 0x540   :  { %6201 = vpow2.f32 %v5062_v57 }
 0x541   :  { %6203 = vpow2.f32 %v5058_v20 }
 0x544   :  { %v6200_v63 = vpop.eup %6199 }
 0x545   :  { %v3026_v59 = vadd.f32 1.0, %v6200_v63  ;;  %v3182_v25 = vpop.f32.mrf.mxu0  ;;  %v3252_v19 = vpop.f32.mrf.mxu1  ;;  %v7820_v63 = vld [vmem:[#allocation22_spill] sm:$0xff] }
 0x546   :  { %v3263_v10 = vadd.f32 %v3182_v25, %v7817_v16  ;;  %v3253_v24 = vadd.f32 %v7090_v14, %v3252_v19 }
 0x547   :  { %6205 = vrcp.f32 %v3026_v59  ;;  %v5864_v23 = vpop.f32.mrf.mxu0  ;;  %v5875_v6 = vpop.f32.mrf.mxu1 }
 0x548   :  { %v5063_v29 = vmul.f32 -1.442695, %v3263_v10  ;;  %v7821_v10 = vld [vmem:[#allocation23_spill] sm:$0xff] }
 0x54a   :  { %6207 = vpow2.f32 %v5063_v29 }
 0x54d   :  { %v6202_v2 = vpop.eup %6201 }
 0x54e   :  { %v6204_v0 = vpop.eup %6203  ;;  %v3260_v30 = vadd.f32 1.0, %v6202_v2  ;;  %v7822_v2 = vld [vmem:[#allocation34_spill] sm:$0xff] }
 0x54f   :  { %v3033_v33 = vadd.f32 1.0, %v6204_v0 }
 0x550   :  { %6209 = vrcp.f32 %v3260_v30 }
 0x551   :  { %6211 = vrcp.f32 %v3033_v33 }
 0x554   :  { %v6206_v53 = vpop.eup %6205 }
 0x555   :  { %v3036_v54 = vmul.f32 %v6206_v53, %v3019_v26 }
 0x557   :  { %v6208_v31 = vpop.eup %6207  ;;  %v3037_v62 = vadd.f32 %v3036_v54, %v7818_v61 }
 0x558   :  { %v3267_v58 = vadd.f32 1.0, %v6208_v31 }
 0x559   :  { %6213 = vtanh.f32 %v3037_v62 }
 0x55a   :  { %6215 = vrcp.f32 %v3267_v58  ;;  %v7823_v58 = vld [vmem:[#allocation46_spill] sm:$0xff] }
 0x55d   :  { %v6210_v28 = vpop.eup %6209 }
 0x55e   :  { %v3270_v5 = vmul.f32 %v6210_v28, %v3253_v24  ;;  %v6212_v11 = vpop.eup %6211 }
 0x55f   :  { %v3039_v1 = vsub.f32 1.0, %v6212_v11  ;;  %v3041_v8 = vmul.f32 %v6212_v11, %v7367_v13 }
 0x560   :  { %v3271_v4 = vadd.f32 %v3270_v5, %v7819_v7 }
 0x562   :  { %6217 = vtanh.f32 %v3271_v4 }
 0x566   :  { %v6214_v17 = vpop.eup %6213 }
 0x567   :  { %v3040_v3 = vmul.f32 %v6214_v17, %v3039_v1  ;;  %v6216_v22 = vpop.eup %6215 }
 0x568   :  { %v3273_v14 = vsub.f32 1.0, %v6216_v22  ;;  %v3275_v60 = vmul.f32 %v6216_v22, %v7403_v36 }
 0x569   :  { %v7485_v27 = vadd.f32 %v3041_v8, %v3040_v3  ;;  %v7569_v3 = vld [vmem:[%s7765_s5] ss:$0 sm:$0xff] }
 0x56b   :  { %5885 = vmatmul.mubr.msk.f32.vlgmr.msra.gmra.mxu0 %vm927_vm3, %v7485_v27  ;;  %5896 = vmatmul.mubr.msk.f32.vlgmr.msra.gmra.mxu1 %vm927_vm3, %v7485_v27 }
 0x56c   :  { %5899 = vmatpush3.msra.mxu0 %v7373_v41  ;;  %5910 = vmatpush3.msra.mxu1 %v7376_v42 }
 0x56d   :  { %5900 = vmatprep.subr.mxu0 %v7807_v18  ;;  %5911 = vmatprep.subr.mxu1 %v7807_v18 }
 0x56e   :  { %5901 = vmatpush3.msra.mxu0 %v7381_v32  ;;  %5912 = vmatpush3.msra.mxu1 %v7384_v52 }
 0x56f   :  { %v6218_v13 = vpop.eup %6217  ;;  %5902 = vmatprep.subr.mxu0 %v7807_v18  ;;  %5913 = vmatprep.subr.mxu1 %v7807_v18 }
 0x570   :  { %5903 = vmatpush3.msra.mxu0 %v7389_v55  ;;  %5914 = vmatpush3.msra.mxu1 %v7392_v56  ;;  %v3274_v20 = vmul.f32 %v6218_v13, %v3273_v14 }
 0x571   :  { %5904 = vmatprep.subr.mxu0 %v7807_v18  ;;  %5915 = vmatprep.subr.mxu1 %v7807_v18 }
 0x572   :  { %5905 = vmatpush3.msra.mxu0 %v7398_v35  ;;  %5906 = vmatprep.mubr.msk.f32.mxu0 %vm6485_vm2, %v7807_v18  ;;  %v7507_v34 = vadd.f32 %v3275_v60, %v3274_v20  ;;  %v7824_v20 = vld [vmem:[#allocation35_spill] sm:$0xff] }
 0x573   :  { %5916 = vmatpush3.msra.mxu1 %v7405_v37  ;;  %5917 = vmatprep.mubr.msk.f32.mxu1 %vm6485_vm2, %v7807_v18 }
 0x574   :  { %5907 = vmatmul.mubr.msk.f32.vlgmr.msra.gmra.mxu0 %vm927_vm3, %v7485_v27  ;;  %5918 = vmatmul.mubr.msk.f32.vlgmr.msra.gmra.mxu1 %vm927_vm3, %v7507_v34 }
 0x575   :  { %5920 = vmatprep.subr.mxu0 %v7807_v18  ;;  %5931 = vmatprep.subr.mxu1 %v7807_v18 }
 0x576   :  { %5921 = vmatpush3.msra.mxu0 %v7416_v43  ;;  %5932 = vmatpush3.msra.mxu1 %v7419_v38 }
 0x577   :  { %5922 = vmatprep.subr.mxu0 %v7807_v18  ;;  %5933 = vmatprep.subr.mxu1 %v7807_v18 }
 0x578   :  { %5923 = vmatpush3.msra.mxu0 %v7424_v39  ;;  %5934 = vmatpush3.msra.mxu1 %v7427_v40 }
 0x579   :  { %5924 = vmatprep.subr.mxu0 %v7807_v18  ;;  %5935 = vmatprep.subr.mxu1 %v7807_v18 }
 0x57a   :  { %5925 = vmatpush3.msra.mxu0 %v7432_v9  ;;  %5936 = vmatpush3.msra.mxu1 %v7435_v21 }
 0x57b   :  { %5926 = vmatprep.subr.mxu0 %v7807_v18  ;;  %5937 = vmatprep.subr.mxu1 %v7807_v18 }
 0x57c   :  { %5927 = vmatpush3.msra.mxu0 %v7440_v15  ;;  %5928 = vmatprep.mubr.msk.f32.mxu0 %vm6485_vm2, %v7807_v18 }
 0x57d   :  { %5938 = vmatpush3.msra.mxu1 %v7445_v12  ;;  %5939 = vmatprep.mubr.msk.f32.mxu1 %vm6485_vm2, %v7807_v18 }
 0x57e   :  { %5929 = vmatmul.mubr.msk.f32.vlgmr.msra.gmra.mxu0 %vm927_vm3, %v7507_v34  ;;  %5940 = vmatmul.mubr.msk.f32.vlgmr.msra.gmra.mxu1 %vm927_vm3, %v7507_v34 }
 0x57f   :  { %5942 = vmatprep.subr.mxu0 %v7807_v18  ;;  %5953 = vmatprep.subr.mxu1 %v7807_v18 }
 0x580   :  { %5943 = vmatpush3.msra.mxu0 %v7322_v44  ;;  %5954 = vmatpush3.msra.mxu1 %v7325_v45 }
 0x581   :  { %5944 = vmatprep.subr.mxu0 %v7807_v18  ;;  %5955 = vmatprep.subr.mxu1 %v7807_v18 }
 0x582   :  { %5945 = vmatpush3.msra.mxu0 %v7330_v46  ;;  %5956 = vmatpush3.msra.mxu1 %v7333_v47 }
 0x583   :  { %5946 = vmatprep.subr.mxu0 %v7807_v18  ;;  %5957 = vmatprep.subr.mxu1 %v7807_v18 }
 0x584   :  { %5947 = vmatpush3.msra.mxu0 %v7338_v48  ;;  %5958 = vmatpush3.msra.mxu1 %v7341_v49 }
 0x585   :  { %5948 = vmatprep.subr.mxu0 %v7807_v18  ;;  %5959 = vmatprep.subr.mxu1 %v7807_v18 }
 0x586   :  { %5949 = vmatpush3.msra.mxu0 %v7346_v50  ;;  %5960 = vmatpush3.msra.mxu1 %v7349_v51 }
 0x587   :  { %5950 = vmatprep.mubr.msk.f32.mxu0 %vm6485_vm2, %v7807_v18  ;;  %5961 = vmatprep.mubr.msk.f32.mxu1 %vm6485_vm2, %v7807_v18 }
 0x588   :  { %5964 = vmatprep.subr.mxu0 %v7807_v18  ;;  %5975 = vmatprep.subr.mxu1 %v7807_v18 }
 0x62b   :  { %v3346_v36 = vpop.f32.mrf.mxu0  ;;  %v3416_v57 = vpop.f32.mrf.mxu1 }
 0x62c   :  { %v3490_v59 = vadd.f32 %v3346_v36, %v7820_v63  ;;  %v3497_v23 = vadd.f32 %v3416_v57, %v7821_v10  ;;  %v7576_v57 = vld [vmem:[%s7769_s9] ss:$0 sm:$0xff] }
 0x62d   :  { %v5886_v25 = vpop.f32.mrf.mxu0  ;;  %v5897_v19 = vpop.f32.mrf.mxu1 }
 0x62e   :  { %v5067_v16 = vmul.f32 -1.442695, %v3490_v59  ;;  %v5068_v30 = vmul.f32 -1.442695, %v3497_v23  ;;  %v7825_v19 = vld [vmem:[#allocation47_spill] sm:$0xff] }
 0x630   :  { %6219 = vpow2.f32 %v5067_v16 }
 0x634   :  { %v3486_v6 = vpop.f32.mrf.mxu0  ;;  %v3580_v29 = vpop.f32.mrf.mxu1 }
 0x635   :  { %v3724_v0 = vadd.f32 %v3580_v29, %v7822_v2  ;;  %v3487_v8 = vadd.f32 %v7569_v3, %v3486_v6 }
 0x636   :  { %v5908_v33 = vpop.f32.mrf.mxu0  ;;  %v5919_v26 = vpop.f32.mrf.mxu1 }
 0x637   :  { %v5072_v53 = vmul.f32 -1.442695, %v3724_v0 }
 0x639   :  { %6221 = vpow2.f32 %v5072_v53 }
 0x63a   :  { %6223 = vpow2.f32 %v5068_v30 }
 0x63d   :  { %v6220_v54 = vpop.eup %6219 }
 0x63e   :  { %v3494_v31 = vadd.f32 1.0, %v6220_v54  ;;  %v3650_v61 = vpop.f32.mrf.mxu0  ;;  %v3720_v62 = vpop.f32.mrf.mxu1 }
 0x63f   :  { %v3731_v24 = vadd.f32 %v3650_v61, %v7823_v58  ;;  %v3721_v63 = vadd.f32 %v7576_v57, %v3720_v62  ;;  %v7828_v62 = vld [vmem:[#allocation30_spill] sm:$0xff] }
 0x640   :  { %6225 = vrcp.f32 %v3494_v31  ;;  %v5930_v28 = vpop.f32.mrf.mxu0  ;;  %v5941_v5 = vpop.f32.mrf.mxu1 }
 0x641   :  { %v5073_v7 = vmul.f32 -1.442695, %v3731_v24 }
 0x643   :  { %6227 = vpow2.f32 %v5073_v7 }
 0x646   :  { %v6222_v4 = vpop.eup %6221 }
 0x647   :  { %v6224_v11 = vpop.eup %6223  ;;  %v3728_v1 = vadd.f32 1.0, %v6222_v4 }
 0x648   :  { %v3501_v17 = vadd.f32 1.0, %v6224_v11 }
 0x649   :  { %6229 = vrcp.f32 %v3728_v1 }
 0x64a   :  { %6231 = vrcp.f32 %v3501_v17 }
 0x64d   :  { %v6226_v22 = vpop.eup %6225 }
 0x64e   :  { %v3504_v14 = vmul.f32 %v6226_v22, %v3487_v8  ;;  %v7829_v8 = vld [vmem:[#allocation40_spill] sm:$0xff] }
 0x650   :  { %v6228_v13 = vpop.eup %6227  ;;  %v3505_v60 = vadd.f32 %v3504_v14, %v7824_v20 }
 0x651   :  { %v3735_v36 = vadd.f32 1.0, %v6228_v13 }
 0x652   :  { %6233 = vtanh.f32 %v3505_v60 }
 0x653   :  { %6235 = vrcp.f32 %v3735_v36 }
 0x656   :  { %v6230_v59 = vpop.eup %6229 }
 0x657   :  { %v3738_v25 = vmul.f32 %v6230_v59, %v3721_v63  ;;  %v6232_v10 = vpop.eup %6231 }
 0x658   :  { %v3507_v23 = vsub.f32 1.0, %v6232_v10  ;;  %v3509_v2 = vmul.f32 %v6232_v10, %v7485_v27 }
 0x659   :  { %v3739_v16 = vadd.f32 %v3738_v25, %v7825_v19 }
 0x65b   :  { %6237 = vtanh.f32 %v3739_v16 }
 0x65f   :  { %v6234_v6 = vpop.eup %6233 }
 0x660   :  { %v3508_v29 = vmul.f32 %v6234_v6, %v3507_v23  ;;  %v6236_v30 = vpop.eup %6235  ;;  %v7830_v23 = vld [vmem:[#allocation39_spill] sm:$0xff] }
 0x661   :  { %v3741_v27 = vsub.f32 1.0, %v6236_v30  ;;  %v3743_v53 = vmul.f32 %v6236_v30, %v7507_v34 }
 0x662   :  { %v7581_v0 = vadd.f32 %v3509_v2, %v3508_v29 }
 0x664   :  { %5951 = vmatmul.mubr.msk.f32.vlgmr.msra.gmra.mxu0 %vm927_vm3, %v7581_v0  ;;  %5962 = vmatmul.mubr.msk.f32.vlgmr.msra.gmra.mxu1 %vm927_vm3, %v7581_v0 }
 0x665   :  { %5965 = vmatpush3.msra.mxu0 %v7373_v41  ;;  %5976 = vmatpush3.msra.mxu1 %v7376_v42 }
 0x666   :  { %5966 = vmatprep.subr.mxu0 %v7807_v18  ;;  %5977 = vmatprep.subr.mxu1 %v7807_v18 }
 0x667   :  { %5967 = vmatpush3.msra.mxu0 %v7381_v32  ;;  %5978 = vmatpush3.msra.mxu1 %v7384_v52 }
 0x668   :  { %v6238_v33 = vpop.eup %6237  ;;  %5968 = vmatprep.subr.mxu0 %v7807_v18  ;;  %5979 = vmatprep.subr.mxu1 %v7807_v18 }
 0x669   :  { %5969 = vmatpush3.msra.mxu0 %v7389_v55  ;;  %5980 = vmatpush3.msra.mxu1 %v7392_v56  ;;  %v3742_v26 = vmul.f32 %v6238_v33, %v3741_v27  ;;  %v7831_v33 = vld [vmem:[#allocation41_spill] sm:$0xff] }
 0x66a   :  { %5970 = vmatprep.subr.mxu0 %v7807_v18  ;;  %5981 = vmatprep.subr.mxu1 %v7807_v18 }
 0x66b   :  { %5971 = vmatpush3.msra.mxu0 %v7398_v35  ;;  %5972 = vmatprep.mubr.msk.f32.mxu0 %vm6485_vm2, %v7807_v18  ;;  %v7603_v54 = vadd.f32 %v3743_v53, %v3742_v26 }
 0x66c   :  { %5982 = vmatpush3.msra.mxu1 %v7405_v37  ;;  %5983 = vmatprep.mubr.msk.f32.mxu1 %vm6485_vm2, %v7807_v18 }
 0x66d   :  { %5973 = vmatmul.mubr.msk.f32.vlgmr.msra.gmra.mxu0 %vm927_vm3, %v7581_v0  ;;  %5984 = vmatmul.mubr.msk.f32.vlgmr.msra.gmra.mxu1 %vm927_vm3, %v7603_v54 }
 0x66e   :  { %5986 = vmatprep.subr.mxu0 %v7807_v18  ;;  %5997 = vmatprep.subr.mxu1 %v7807_v18 }
 0x66f   :  { %5987 = vmatpush3.msra.mxu0 %v7416_v43  ;;  %5998 = vmatpush3.msra.mxu1 %v7419_v38 }
 0x670   :  { %5988 = vmatprep.subr.mxu0 %v7807_v18  ;;  %5999 = vmatprep.subr.mxu1 %v7807_v18 }
 0x671   :  { %5989 = vmatpush3.msra.mxu0 %v7424_v39  ;;  %6000 = vmatpush3.msra.mxu1 %v7427_v40 }
 0x672   :  { %5990 = vmatprep.subr.mxu0 %v7807_v18  ;;  %6001 = vmatprep.subr.mxu1 %v7807_v18 }
 0x673   :  { %5991 = vmatpush3.msra.mxu0 %v7432_v9  ;;  %6002 = vmatpush3.msra.mxu1 %v7435_v21 }
 0x674   :  { %5992 = vmatprep.subr.mxu0 %v7807_v18  ;;  %6003 = vmatprep.subr.mxu1 %v7807_v18 }
 0x675   :  { %5993 = vmatpush3.msra.mxu0 %v7440_v15  ;;  %5994 = vmatprep.mubr.msk.f32.mxu0 %vm6485_vm2, %v7807_v18 }
 0x676   :  { %6004 = vmatpush3.msra.mxu1 %v7445_v12  ;;  %6005 = vmatprep.mubr.msk.f32.mxu1 %vm6485_vm2, %v7807_v18 }
 0x677   :  { %5995 = vmatmul.mubr.msk.f32.vlgmr.msra.gmra.mxu0 %vm927_vm3, %v7603_v54  ;;  %6006 = vmatmul.mubr.msk.f32.vlgmr.msra.gmra.mxu1 %vm927_vm3, %v7603_v54 }
 0x678   :  { %6008 = vmatprep.subr.mxu0 %v7807_v18  ;;  %6019 = vmatprep.subr.mxu1 %v7807_v18 }
 0x679   :  { %6009 = vmatpush3.msra.mxu0 %v7322_v44  ;;  %6020 = vmatpush3.msra.mxu1 %v7325_v45 }
 0x67a   :  { %6010 = vmatprep.subr.mxu0 %v7807_v18  ;;  %6021 = vmatprep.subr.mxu1 %v7807_v18 }
 0x67b   :  { %6011 = vmatpush3.msra.mxu0 %v7330_v46  ;;  %6022 = vmatpush3.msra.mxu1 %v7333_v47  ;;  %v7826_v46 = vld [vmem:[#allocation28_spill] sm:$0xff] }
 0x67c   :  { %6012 = vmatprep.subr.mxu0 %v7807_v18  ;;  %6023 = vmatprep.subr.mxu1 %v7807_v18 }
 0x67d   :  { %6013 = vmatpush3.msra.mxu0 %v7338_v48  ;;  %6024 = vmatpush3.msra.mxu1 %v7341_v49 }
 0x67e   :  { %6014 = vmatprep.subr.mxu0 %v7807_v18  ;;  %6025 = vmatprep.subr.mxu1 %v7807_v18 }
 0x67f   :  { %6015 = vmatpush3.msra.mxu0 %v7346_v50  ;;  %6026 = vmatpush3.msra.mxu1 %v7349_v51  ;;  %v7827_v50 = vld [vmem:[#allocation29_spill] sm:$0xff] }
 0x680   :  { %6016 = vmatprep.mubr.msk.f32.mxu0 %vm6485_vm2, %v7807_v18  ;;  %6027 = vmatprep.mubr.msk.f32.mxu1 %vm6485_vm2, %v7807_v18 }
 0x681   :  { %6030 = vmatprep.subr.mxu0 %v7807_v18  ;;  %6041 = vmatprep.subr.mxu1 %v7807_v18 }
 0x724   :  { %v3814_v44 = vpop.f32.mrf.mxu0  ;;  %v3884_v45 = vpop.f32.mrf.mxu1 }
 0x725   :  { %v3958_v47 = vadd.f32 %v3814_v44, %v7826_v46  ;;  %v3965_v51 = vadd.f32 %v3884_v45, %v7827_v50 }
 0x726   :  { %v5952_v48 = vpop.f32.mrf.mxu0  ;;  %v5963_v49 = vpop.f32.mrf.mxu1 }
 0x727   :  { %v5077_v34 = vmul.f32 -1.442695, %v3958_v47  ;;  %v5078_v24 = vmul.f32 -1.442695, %v3965_v51  ;;  %v7833_v51 = vld [vmem:[#allocation27_spill] sm:$0xff] }
 0x729   :  { %6239 = vpow2.f32 %v5077_v34 }
 0x72d   :  { %v3954_v31 = vpop.f32.mrf.mxu0  ;;  %v4048_v61 = vpop.f32.mrf.mxu1 }
 0x72e   :  { %v4192_v58 = vadd.f32 %v4048_v61, %v7828_v62  ;;  %v3955_v25 = vadd.f32 %v7569_v3, %v3954_v31 }
 0x72f   :  { %v5974_v28 = vpop.f32.mrf.mxu0  ;;  %v5985_v5 = vpop.f32.mrf.mxu1 }
 0x730   :  { %v5082_v7 = vmul.f32 -1.442695, %v4192_v58  ;;  %v7834_v58 = vld [vmem:[#allocation31_spill] sm:$0xff] }
 0x732   :  { %6241 = vpow2.f32 %v5082_v7 }
 0x733   :  { %6243 = vpow2.f32 %v5078_v24 }
 0x736   :  { %v6240_v4 = vpop.eup %6239 }
 0x737   :  { %v3962_v11 = vadd.f32 1.0, %v6240_v4  ;;  %v4118_v1 = vpop.f32.mrf.mxu0  ;;  %v4188_v17 = vpop.f32.mrf.mxu1 }
 0x738   :  { %v4199_v22 = vadd.f32 %v4118_v1, %v7829_v8  ;;  %v4189_v2 = vadd.f32 %v7576_v57, %v4188_v17 }
 0x739   :  { %6245 = vrcp.f32 %v3962_v11  ;;  %v5996_v14 = vpop.f32.mrf.mxu0  ;;  %v6007_v13 = vpop.f32.mrf.mxu1 }
 0x73a   :  { %v5083_v20 = vmul.f32 -1.442695, %v4199_v22  ;;  %v7835_v22 = vld [vmem:[#allocation42_spill] sm:$0xff] }
 0x73c   :  { %6247 = vpow2.f32 %v5083_v20 }
 0x73f   :  { %v6242_v60 = vpop.eup %6241 }
 0x740   :  { %v6244_v36 = vpop.eup %6243  ;;  %v4196_v63 = vadd.f32 1.0, %v6242_v60 }
 0x741   :  { %v3969_v59 = vadd.f32 1.0, %v6244_v36 }
 0x742   :  { %6249 = vrcp.f32 %v4196_v63 }
 0x743   :  { %6251 = vrcp.f32 %v3969_v59 }
 0x746   :  { %v6246_v19 = vpop.eup %6245 }
 0x747   :  { %v3972_v16 = vmul.f32 %v6246_v19, %v3955_v25 }
 0x749   :  { %v6248_v10 = vpop.eup %6247  ;;  %v3973_v6 = vadd.f32 %v3972_v16, %v7830_v23 }
 0x74a   :  { %v4203_v29 = vadd.f32 1.0, %v6248_v10 }
 0x74b   :  { %6253 = vtanh.f32 %v3973_v6  ;;  %v7836_v6 = vld [vmem:[#allocation38_spill] sm:$0xff] }
 0x74c   :  { %6255 = vrcp.f32 %v4203_v29 }
 0x74f   :  { %v6250_v30 = vpop.eup %6249 }
 0x750   :  { %v4206_v27 = vmul.f32 %v6250_v30, %v4189_v2  ;;  %v6252_v53 = vpop.eup %6251 }
 0x751   :  { %v3975_v44 = vsub.f32 1.0, %v6252_v53  ;;  %v3977_v47 = vmul.f32 %v6252_v53, %v7581_v0 }
 0x752   :  { %v4207_v26 = vadd.f32 %v4206_v27, %v7831_v33 }
 0x754   :  { %6257 = vtanh.f32 %v4207_v26  ;;  %v7837_v26 = vld [vmem:[#allocation43_spill] sm:$0xff] }
 0x758   :  { %v6254_v45 = vpop.eup %6253 }
 0x759   :  { %v3976_v46 = vmul.f32 %v6254_v45, %v3975_v44  ;;  %v6256_v49 = vpop.eup %6255 }
 0x75a   :  { %v4209_v0 = vsub.f32 1.0, %v6256_v49 }
 0x75b   :  { %v7667_v48 = vadd.f32 %v3977_v47, %v3976_v46 }
 0x75d   :  { %6017 = vmatmul.mubr.msk.f32.vlgmr.msra.gmra.mxu0 %vm927_vm3, %v7667_v48  ;;  %6028 = vmatmul.mubr.msk.f32.vlgmr.msra.gmra.mxu1 %vm927_vm3, %v7667_v48 }
 0x75e   :  { %6031 = vmatpush3.msra.mxu0 %v7373_v41  ;;  %6042 = vmatpush3.msra.mxu1 %v7376_v42  ;;  %v4211_v42 = vmul.f32 %v6256_v49, %v7603_v54 }
 0x75f   :  { %6032 = vmatprep.subr.mxu0 %v7807_v18  ;;  %6043 = vmatprep.subr.mxu1 %v7807_v18 }
 0x760   :  { %6033 = vmatpush3.msra.mxu0 %v7381_v32  ;;  %6044 = vmatpush3.msra.mxu1 %v7384_v52  ;;  %v4684_v52 = vld [vmem:[#allocation10 + $0x18] sm:$0xff] }
 0x761   :  { %v6258_v34 = vpop.eup %6257  ;;  %6034 = vmatprep.subr.mxu0 %v7807_v18  ;;  %6045 = vmatprep.subr.mxu1 %v7807_v18 }
 0x762   :  { %6035 = vmatpush3.msra.mxu0 %v7389_v55  ;;  %6046 = vmatpush3.msra.mxu1 %v7392_v56  ;;  %v4210_v41 = vmul.f32 %v6258_v34, %v4209_v0  ;;  %v4683_v55 = vld [vmem:[#allocation10 + $0x10] sm:$0xff]  ;;  %v4688_v56 = vld [vmem:[#allocation11 + $0x18] sm:$0xff] }
 0x763   :  { %6036 = vmatprep.subr.mxu0 %v7807_v18  ;;  %6047 = vmatprep.subr.mxu1 %v7807_v18 }
 0x764   :  { %6037 = vmatpush3.msra.mxu0 %v7398_v35  ;;  %6038 = vmatprep.mubr.msk.f32.mxu0 %vm6485_vm2, %v7807_v18  ;;  %v7689_v32 = vadd.f32 %v4211_v42, %v4210_v41  ;;  %v4682_v35 = vld [vmem:[#allocation10 + $0x8] sm:$0xff] }
 0x765   :  { %6048 = vmatpush3.msra.mxu1 %v7405_v37  ;;  %6049 = vmatprep.mubr.msk.f32.mxu1 %vm6485_vm2, %v7807_v18  ;;  %v4681_v37 = vld [vmem:[#allocation10] sm:$0xff] }
 0x766   :  { %6039 = vmatmul.mubr.msk.f32.vlgmr.msra.gmra.mxu0 %vm927_vm3, %v7667_v48  ;;  %6050 = vmatmul.mubr.msk.f32.vlgmr.msra.gmra.mxu1 %vm927_vm3, %v7689_v32 }
 0x767   :  { %6052 = vmatprep.subr.mxu0 %v7807_v18  ;;  %6063 = vmatprep.subr.mxu1 %v7807_v18 }
 0x768   :  { %6053 = vmatpush3.msra.mxu0 %v7416_v43  ;;  %6064 = vmatpush3.msra.mxu1 %v7419_v38  ;;  %v4687_v43 = vld [vmem:[#allocation11 + $0x10] sm:$0xff]  ;;  %v4686_v38 = vld [vmem:[#allocation11 + $0x8] sm:$0xff] }
 0x769   :  { %6054 = vmatprep.subr.mxu0 %v7807_v18  ;;  %6065 = vmatprep.subr.mxu1 %v7807_v18 }
 0x76a   :  { %6055 = vmatpush3.msra.mxu0 %v7424_v39  ;;  %6066 = vmatpush3.msra.mxu1 %v7427_v40  ;;  %v4685_v39 = vld [vmem:[#allocation11] sm:$0xff] }
 0x76b   :  { %6056 = vmatprep.subr.mxu0 %v7807_v18  ;;  %6067 = vmatprep.subr.mxu1 %v7807_v18 }
 0x76c   :  { %6057 = vmatpush3.msra.mxu0 %v7432_v9  ;;  %6068 = vmatpush3.msra.mxu1 %v7435_v21  ;;  %v7832_v21 = vld [vmem:[#allocation26_spill] sm:$0xff] }
 0x76d   :  { %6058 = vmatprep.subr.mxu0 %v7807_v18  ;;  %6069 = vmatprep.subr.mxu1 %v7807_v18 }
 0x76e   :  { %6059 = vmatpush3.msra.mxu0 %v7440_v15  ;;  %6060 = vmatprep.mubr.msk.f32.mxu0 %vm6485_vm2, %v7807_v18 }
 0x76f   :  { %6070 = vmatpush3.msra.mxu1 %v7445_v12  ;;  %6071 = vmatprep.mubr.msk.f32.mxu1 %vm6485_vm2, %v7807_v18 }
 0x770   :  { %6061 = vmatmul.mubr.msk.f32.vlgmr.msra.gmra.mxu0 %vm927_vm3, %v7689_v32  ;;  %6072 = vmatmul.mubr.msk.f32.vlgmr.msra.gmra.mxu1 %vm927_vm3, %v7689_v32 }
 0x771   :  { %6085 = vmatprep.subr.mxu1 %v7807_v18  ;;  %6074 = vmatprep.subr.mxu0 %v7807_v18 }
 0x772   :  { %6093 = vmatprep.mubr.msk.f32.mxu1 %vm6485_vm2, %v7807_v18  ;;  %6082 = vmatprep.mubr.msk.f32.mxu0 %vm6485_vm2, %v7807_v18 }
 0x773   :  { %6086 = vmatpush3.msra.mxu1 %v4684_v52  ;;  %6075 = vmatpush3.msra.mxu0 %v4688_v56  ;;  %v4838_v56 = vld [vmem:[#allocation13 + $0x10] sm:$0xff] }
 0x774   :  { %6087 = vmatprep.subr.mxu1 %v7807_v18  ;;  %6076 = vmatprep.subr.mxu0 %v7807_v18 }
 0x775   :  { %6088 = vmatpush3.msra.mxu1 %v4683_v55  ;;  %6077 = vmatpush3.msra.mxu0 %v4687_v43  ;;  %v4839_v55 = vld [vmem:[#allocation13 + $0x18] sm:$0x3] }
 0x776   :  { %6089 = vmatprep.subr.mxu1 %v7807_v18  ;;  %6078 = vmatprep.subr.mxu0 %v7807_v18 }
 0x777   :  { %6090 = vmatpush3.msra.mxu1 %v4682_v35  ;;  %6079 = vmatpush3.msra.mxu0 %v4686_v38  ;;  %v4836_v35 = vld [vmem:[#allocation13] sm:$0xff] }
 0x778   :  { %6091 = vmatprep.subr.mxu1 %v7807_v18  ;;  %6080 = vmatprep.subr.mxu0 %v7807_v18 }
 0x779   :  { %6092 = vmatpush3.msra.mxu1 %v4681_v37  ;;  %6081 = vmatpush3.msra.mxu0 %v4685_v39  ;;  %v4835_v37 = vld [vmem:[#allocation2] sm:$0xff] }
 0x77a   :  { %6096 = vmatprep.subr.mxu0 %v7807_v18 }
 0x81d   :  { %v4282_v40 = vpop.f32.mrf.mxu0  ;;  %v4352_v9 = vpop.f32.mrf.mxu1 }
 0x81e   :  { %v4426_v15 = vadd.f32 %v4282_v40, %v7832_v21  ;;  %v4433_v31 = vadd.f32 %v4352_v9, %v7833_v51  ;;  %v5098_v21 = vld [vmem:[%s7773_s13] ss:$0 sm:$0xff] }
 0x81f   :  { %v6018_v12 = vpop.f32.mrf.mxu0  ;;  %v6029_v54 = vpop.f32.mrf.mxu1 }
 0x820   :  { %v5087_v50 = vmul.f32 -1.442695, %v4426_v15  ;;  %v5088_v28 = vmul.f32 -1.442695, %v4433_v31 }
 0x822   :  { %6259 = vpow2.f32 %v5087_v50 }
 0x826   :  { %v4422_v61 = vpop.f32.mrf.mxu0  ;;  %v4516_v62 = vpop.f32.mrf.mxu1 }
 0x827   :  { %v4660_v24 = vadd.f32 %v4516_v62, %v7834_v58  ;;  %v4423_v19 = vadd.f32 %v7569_v3, %v4422_v61 }
 0x828   :  { %v6040_v5 = vpop.f32.mrf.mxu0  ;;  %v6051_v7 = vpop.f32.mrf.mxu1 }
 0x829   :  { %v5092_v4 = vmul.f32 -1.442695, %v4660_v24 }
 0x82b   :  { %6261 = vpow2.f32 %v5092_v4 }
 0x82c   :  { %6263 = vpow2.f32 %v5088_v28 }
 0x82f   :  { %v6260_v11 = vpop.eup %6259 }
 0x830   :  { %v4430_v1 = vadd.f32 1.0, %v6260_v11  ;;  %v4586_v17 = vpop.f32.mrf.mxu0  ;;  %v4656_v8 = vpop.f32.mrf.mxu1 }
 0x831   :  { %v4667_v14 = vadd.f32 %v4586_v17, %v7835_v22  ;;  %v4657_v30 = vadd.f32 %v7576_v57, %v4656_v8 }
 0x832   :  { %6265 = vrcp.f32 %v4430_v1  ;;  %v6062_v13 = vpop.f32.mrf.mxu0  ;;  %v6073_v20 = vpop.f32.mrf.mxu1 }
 0x833   :  { %v5093_v60 = vmul.f32 -1.442695, %v4667_v14 }
 0x835   :  { %6267 = vpow2.f32 %v5093_v60 }
 0x838   :  { %v6262_v36 = vpop.eup %6261 }
 0x839   :  { %v6264_v63 = vpop.eup %6263  ;;  %v4664_v59 = vadd.f32 1.0, %v6262_v36 }
 0x83a   :  { %v4437_v25 = vadd.f32 1.0, %v6264_v63 }
 0x83b   :  { %6269 = vrcp.f32 %v4664_v59 }
 0x83c   :  { %6271 = vrcp.f32 %v4437_v25 }
 0x83f   :  { %v6266_v16 = vpop.eup %6265 }
 0x840   :  { %v4440_v10 = vmul.f32 %v6266_v16, %v4423_v19 }
 0x842   :  { %v6268_v23 = vpop.eup %6267  ;;  %v4441_v29 = vadd.f32 %v4440_v10, %v7836_v6 }
 0x843   :  { %v4671_v2 = vadd.f32 1.0, %v6268_v23 }
 0x844   :  { %6273 = vtanh.f32 %v4441_v29 }
 0x845   :  { %6275 = vrcp.f32 %v4671_v2 }
 0x848   :  { %v6270_v27 = vpop.eup %6269 }
 0x849   :  { %v4674_v33 = vmul.f32 %v6270_v27, %v4657_v30  ;;  %v6272_v44 = vpop.eup %6271 }
 0x84a   :  { %v4443_v45 = vsub.f32 1.0, %v6272_v44  ;;  %v4445_v47 = vmul.f32 %v6272_v44, %v7667_v48  ;;  %v4837_v48 = vld [vmem:[#allocation13 + $0x8] sm:$0xff] }
 0x84b   :  { %v4675_v53 = vadd.f32 %v4674_v33, %v7837_v26 }
 0x84d   :  { %6277 = vtanh.f32 %v4675_v53 }
 0x851   :  { %v6274_v46 = vpop.eup %6273 }
 0x852   :  { %v4444_v3 = vmul.f32 %v6274_v46, %v4443_v45  ;;  %v6276_v0 = vpop.eup %6275 }
 0x853   :  { %v4677_v34 = vsub.f32 1.0, %v6276_v0  ;;  %v4679_v57 = vmul.f32 %v6276_v0, %v7689_v32 }
 0x854   :  { %v4446_v49 = vadd.f32 %v4445_v47, %v4444_v3 }
 0x856   :  { %6094 = vmatmul.mubr.msk.f32.vlgmr.msra.gmra.mxu1 %vm927_vm3, %v4446_v49 }
 0x85a   :  { %v6278_v41 = vpop.eup %6277 }
 0x85b   :  { %v4678_v42 = vmul.f32 %v6278_v41, %v4677_v34 }
 0x85d   :  { %v4680_v52 = vadd.f32 %v4679_v57, %v4678_v42 }
 0x85f   :  { %6083 = vmatmul.mubr.msk.f32.vlgmr.msra.gmra.mxu0 %vm927_vm3, %v4680_v52 }
 0x860   :  { %6097 = vmatpush3.msk.msra.mxu0 %vm4844_vm4, %v4839_v55  ;;  %6104 = vmatprep.mubr.msk.f32.mxu0 %vm6485_vm2, %v7807_v18 }
 0x861   :  { %6098 = vmatprep.subr.mxu0 %v7807_v18 }
 0x862   :  { %6099 = vmatpush3.msra.mxu0 %v4838_v56 }
 0x863   :  { %6100 = vmatprep.subr.mxu0 %v7807_v18 }
 0x864   :  { %6101 = vmatpush3.msra.mxu0 %v4837_v48 }
 0x865   :  { %6102 = vmatprep.subr.mxu0 %v7807_v18 }
 0x866   :  { %6103 = vmatpush3.msra.mxu0 %v4836_v35 }
 0x867   :  { %6105 = vmatmul.mubr.msk.f32.vlgmr.msra.gmra.mxu0 %vm4840_vm5, %v4835_v37 }
 0x916   :  { %v4831_v32 = vpop.f32.mrf.mxu1 }
 0x918   :  { %v6095_v43 = vpop.f32.mrf.mxu1 }
 0x91f   :  { %v4758_v38 = vpop.f32.mrf.mxu0 }
 0x920   :  { %v4832_v40 = vadd.f32 %v4831_v32, %v4758_v38 }
 0x921   :  { %v6084_v39 = vpop.f32.mrf.mxu0 }
 0x927   :  { %v4914_v9 = vpop.f32.mrf.mxu0 }
 0x928   :  { %v4918_v15 = vadd.f32 %v4914_v9, %v4832_v40 }
 0x929   :  { %v6106_v12 = vpop.f32.mrf.mxu0 }
 0x92a   :  { %v4926_v54 = vadd.f32 %v5098_v21, %v4918_v15 }
 0x92c   :  { %4927 = vst.msk [vmem:[#allocation14] sm:$0xff] %vm4840_vm5, %v4926_v54 }
 0x92d   :  { %6456 = shalt.err (!%p6453_p11)
}
 0x92e   :  { %4937 = dma.vmem_to_hbm [thread:$0]  %s4935_s11, 128, %s7774_s14, [#allocation4]  }
 0x92f   :  { %6473 = dma.done.wait [#allocation4], 128  }
 0x930   :  { %6474 = vsyncadd [#allocation4], 4294967168 }
 0x931   :  { %4941 = vsyncpa [#allocation3], 1 }
 0x932   :  { %4942 = vsyncpa [#allocation6], 1 }
 0x933   :  { %4943 = vsyncpa [#allocation9], 1 }
 0x934   :  { %4944 = vsyncpa [#allocation12], 1 }
 0x935   :  { %4945 = vsyncpa [#allocation4], 1 }

</bundles_post_ra>
